<compile_context>
chip_gen: v7x
topology: tpu7x:2x2x1
jax: 0.10.0
libtpu: 0.0.40
codegen_flags: <defaults>
</compile_context>

<pallas_src>
import functools
import math

import jax
import jax.numpy as jnp
from jax.experimental import pallas as pl
from jax.experimental.pallas import tpu as pltpu

EPS = 1e-8
BN_EPS = 1e-5

# The PyTorch module computes `log10(c + EPS) / 0.69897000433` (numerically log base ~5).
# We keep that exact constant for forward-semantics fidelity (it is the module's behavior,
# even though the name suggests log2 was intended).
_ENTROPY_LOG_SCALE = 1.0 / (math.log(10.0) * 0.69897000433)


# --------------------------------------------------------------------------- #
# Tiling helper
# --------------------------------------------------------------------------- #
def _pick_tile(n, cap, multiple=1):
    """Largest divisor of n that is <= cap and (if possible) a multiple of `multiple`."""
    best_mult, best_any = None, None
    for d in range(1, n + 1):
        if n % d or d > cap:
            continue
        best_any = d
        if d % multiple == 0:
            best_mult = d
    if best_mult is not None:
        return best_mult
    if best_any is not None:
        return best_any
    return n  # no divisor fits (e.g. prime > cap); whole axis (small shapes only)


# --------------------------------------------------------------------------- #
# Conv2d + folded BatchNorm as a lane-dense Pallas matmul
#   per (b, i):  preds[b, i] = W_fold (Cout, K) @ patches[b, i] (K, P) + bias_fold
# --------------------------------------------------------------------------- #
def _conv_bn_kernel(a_ref, w_ref, b_ref, o_ref, *, tbi):
    w = w_ref[...]          # (Cout, K)
    bias = b_ref[...]       # (Cout, 1) f32
    for n in range(tbi):    # static unroll; each dot is a clean 2-D MXU matmul
        o_ref[n] = (
            jnp.dot(w, a_ref[n], preferred_element_type=jnp.float32) + bias
        )


def conv_bn_predictions(pat3, w_fold, b_fold, *, use_bf16_matmul=False):
    """pat3: (BI, K, P) im2col patches; w_fold: (Cout, K); b_fold: (Cout, 1).

    Returns preds (BI, Cout, P) float32 with BN already applied.
    """
    BI, K, P = pat3.shape
    Cout = w_fold.shape[0]

    # Lane tile: multiple of 128, capped (keeps blocks small enough for v7x VMEM).
    tP = _pick_tile(P, cap=1024, multiple=128)
    bytes_per_bi = K * tP * 4
    tbi = _pick_tile(BI, cap=max(1, min(8, (2 * 1024 * 1024) // max(bytes_per_bi, 1))))

    if use_bf16_matmul:
        pat_in = pat3.astype(jnp.bfloat16)
        w_in = w_fold.astype(jnp.bfloat16)
    else:
        pat_in = pat3
        w_in = w_fold

    preds = pl.pallas_call(
        functools.partial(_conv_bn_kernel, tbi=tbi),
        out_shape=jax.ShapeDtypeStruct((BI, Cout, P), jnp.float32),
        grid=(BI // tbi, P // tP),
        in_specs=[
            pl.BlockSpec((tbi, K, tP), lambda n, p: (n, 0, p)),
            pl.BlockSpec((Cout, K), lambda n, p: (0, 0)),
            pl.BlockSpec((Cout, 1), lambda n, p: (0, 0)),
        ],
        out_specs=pl.BlockSpec((tbi, Cout, tP), lambda n, p: (n, 0, p)),
        compiler_params=pltpu.CompilerParams(
            dimension_semantics=("parallel", "parallel")),
    )(pat_in, w_in, b_fold)
    return preds


# --------------------------------------------------------------------------- #
# Dynamic routing kernel
# --------------------------------------------------------------------------- #
def _routing_kernel(pred_ref, v_ref, ent_ref, *, n_iter):
    p = pred_ref[0]                       # (I, J, D, TP) f32
    I, J, D, TP = p.shape

    b = jnp.zeros((I, J, 1, TP), jnp.float32)
    c = None
    v = None
    for it in range(n_iter):
        # softmax over out_caps (J); reciprocal on the EUP
        m = jnp.max(b, axis=1, keepdims=True)
        e = jnp.exp(b - m)
        c = e * pl.reciprocal(jnp.sum(e, axis=1, keepdims=True), approx=True)
        # s_j = sum_i c_ij * u_hat_ij
        s = jnp.sum(c * p, axis=0)                          # (J, D, TP)
        # squash over capsule dim D: scale = sq/(1+sq)/(norm+1e-8), one EUP reciprocal
        sq = jnp.sum(s * s, axis=1, keepdims=True)          # (J, 1, TP)
        norm = jnp.sqrt(sq)
        scale = sq * pl.reciprocal((1.0 + sq) * (norm + 1e-8), approx=True)
        v = scale * s                                        # (J, D, TP)
        if it < n_iter - 1:
            b = b + jnp.sum(p * v[None], axis=2, keepdims=True)

    v_ref[0] = v
    # entropy partial, reduced over (I, J) but kept lane-wide (no SMEM padding)
    logc = jnp.log(c + EPS) * _ENTROPY_LOG_SCALE
    ent_ref[0, 0] = jnp.sum(c * logc, axis=(0, 1, 2))        # (TP,)


def dynamic_routing(preds, n_iter=3, lane_cap=1024):
    """preds: (B, I, J, D, P) float32 -> v (B, J, D, P), entropy partials (B, 1, P)."""
    B, I, J, D, P = preds.shape
    tp = _pick_tile(P, cap=lane_cap, multiple=128)

    v, ent = pl.pallas_call(
        functools.partial(_routing_kernel, n_iter=n_iter),
        out_shape=(
            jax.ShapeDtypeStruct((B, J, D, P), jnp.float32),
            jax.ShapeDtypeStruct((B, 1, P), jnp.float32),
        ),
        grid=(B, P // tp),
        in_specs=[
            pl.BlockSpec((1, I, J, D, tp), lambda b, p: (b, 0, 0, 0, p)),
        ],
        out_specs=[
            pl.BlockSpec((1, J, D, tp), lambda b, p: (b, 0, 0, p)),
            pl.BlockSpec((1, 1, tp), lambda b, p: (b, 0, p)),
        ],
        compiler_params=pltpu.CompilerParams(
            dimension_semantics=("parallel", "parallel")),
    )(preds)
    return v, ent


# --------------------------------------------------------------------------- #
# ConvCapsule forward
# --------------------------------------------------------------------------- #
def conv_capsule_forward(in_capsules, params, *, in_caps, in_dim, out_caps, out_dim,
                         kernel_size, stride, padding, n_iter=3,
                         use_bf16_matmul=False):
    B = in_capsules.shape[0]
    H, W = in_capsules.shape[-2:]
    BI = B * in_caps
    x = in_capsules.reshape(BI, in_dim, H, W)

    weight = params["w"].astype(jnp.float32)      # (Cout, Cin, kh, kw)
    bias = params["b"].astype(jnp.float32)        # (Cout,)
    Cout = out_caps * out_dim
    kh = kw = kernel_size
    Hout = (H + 2 * padding - kh) // stride + 1
    Wout = (W + 2 * padding - kw) // stride + 1
    P = Hout * Wout
    K = in_dim * kh * kw

    # --- im2col in (BI, K, P) layout: K ordered (cin, dh, dw), P ordered (ho, wo) ---
    xp = jnp.pad(x, ((0, 0), (0, 0), (padding, padding), (padding, padding)))
    slabs = []
    for dh in range(kh):
        for dw in range(kw):
            slabs.append(
                xp[:, :,
                   dh: dh + (Hout - 1) * stride + 1: stride,
                   dw: dw + (Wout - 1) * stride + 1: stride]
            )
    pat = jnp.stack(slabs, axis=2)                # (BI, Cin, kh*kw, Hout, Wout)
    pat = pat.reshape(BI, K, P).astype(jnp.float32)

    # --- fold BatchNorm2d (training-mode batch stats, biased var) into the matmul ---
    # y = A @ W2^T + b with A the (M, K) patch matrix, M = BI*P.
    #   mean_c = mu_A . w_c + b_c ;  var_c = w_c^T Cov(A) w_c
    W2 = weight.reshape(Cout, K)                  # rows are w_c, K ordered (cin, dh, dw)
    M = BI * P
    mu = jnp.mean(pat, axis=(0, 2))               # (K,)
    patc = pat - mu[None, :, None]
    cov = jnp.einsum('nkp,nlp->kl', patc, patc) / M           # (K, K), tiny
    mean_y = W2 @ mu + bias                                    # (Cout,)
    var_y = jnp.maximum(jnp.sum((W2 @ cov) * W2, axis=1), 0.0)  # (Cout,)
    scale = params["gamma"] * jax.lax.rsqrt(var_y + BN_EPS)
    w_fold = W2 * scale[:, None]                               # (Cout, K)
    b_fold = (params["beta"] + (bias - mean_y) * scale).reshape(Cout, 1)

    # --- conv + BN in one Pallas matmul, lane-dense (Cout, P) output per (b, i) ---
    preds = conv_bn_predictions(pat, w_fold, b_fold, use_bf16_matmul=use_bf16_matmul)

    # (BI, Cout, P) -> (B, I, J, D, P): pure reshape, no transpose pass.
    preds5 = preds.reshape(B, in_caps, out_caps, out_dim, P)

    # --- dynamic routing ---
    v, ent = dynamic_routing(preds5, n_iter=n_iter)

    out_capsules = v.reshape(B, out_caps, out_dim, Hout, Wout)
    cij_entr = -(1.0 / (B * in_caps * Hout * Wout)) * jnp.sum(ent)
    return out_capsules, cij_entr


# --------------------------------------------------------------------------- #
if __name__ == "__main__":
    # small shapes consistent with the module
    B, IN_CAPS, IN_DIM, OUT_CAPS, OUT_DIM = 2, 4, 8, 4, 8
    H = W = 16
    KSIZE, STRIDE, PAD = 3, 1, 1

    key = jax.random.PRNGKey(0)
    k1, k2, k3, k4, k5 = jax.random.split(key, 5)
    params = {
        "w": 0.1 * jax.random.normal(k1, (OUT_CAPS * OUT_DIM, IN_DIM, KSIZE, KSIZE),
                                     jnp.float32),
        "b": 0.1 * jax.random.normal(k2, (OUT_CAPS * OUT_DIM,), jnp.float32),
        "gamma": 1.0 + 0.1 * jax.random.normal(k3, (OUT_CAPS * OUT_DIM,), jnp.float32),
        "beta": 0.1 * jax.random.normal(k4, (OUT_CAPS * OUT_DIM,), jnp.float32),
    }
    in_capsules = jax.random.normal(k5, (B, IN_CAPS, IN_DIM, H, W), jnp.float32)

    fwd = jax.jit(functools.partial(
        conv_capsule_forward,
        in_caps=IN_CAPS, in_dim=IN_DIM, out_caps=OUT_CAPS, out_dim=OUT_DIM,
        kernel_size=KSIZE, stride=STRIDE, padding=PAD, n_iter=3,
        use_bf16_matmul=False,
    ))

    out_caps_arr, cij_entr = fwd(in_capsules, params)
    jax.block_until_ready((out_caps_arr, cij_entr))

    assert out_caps_arr.shape == (B, OUT_CAPS, OUT_DIM, H, W)
    assert cij_entr.shape == ()
    assert bool(jnp.isfinite(cij_entr))
    print("KERNEL_OK")
</pallas_src>

<mosaic_0001>
module attributes {stable_mosaic.version = 11 : i64} {
  func.func @_conv_bn_kernel(%arg0: i32, %arg1: i32, %arg2: memref<8x72x256xf32, #tpu.memory_space<vmem>>, %arg3: memref<32x72xf32, #tpu.memory_space<vmem>>, %arg4: memref<32x1xf32, #tpu.memory_space<vmem>>, %arg5: memref<8x32x256xf32, #tpu.memory_space<vmem>>) attributes {dimension_semantics = [#tpu.dimension_semantics<parallel>, #tpu.dimension_semantics<parallel>], iteration_bounds = array<i64: 1, 1>, scalar_prefetch = 0 : i64, scratch_operands = 0 : i64, tpu.core_type = #tpu.core_type<tc>, window_params = [{transform_indices = @transform_0, window_bounds = array<i64: 8, 72, 256>}, {pipeline_mode = #tpu.pipeline_mode<synchronous>, transform_indices = @transform_1, window_bounds = array<i64: 32, 72>}, {pipeline_mode = #tpu.pipeline_mode<synchronous>, transform_indices = @transform_2, window_bounds = array<i64: 32, 1>}, {transform_indices = @transform_3, window_bounds = array<i64: 8, 32, 256>}]} {
    %c0 = arith.constant 0 : index
    %c0_0 = arith.constant 0 : index
    %0 = vector.load %arg3[%c0, %c0_0] : memref<32x72xf32, #tpu.memory_space<vmem>>, vector<32x72xf32>
    %c0_1 = arith.constant 0 : index
    %c0_2 = arith.constant 0 : index
    %1 = vector.load %arg4[%c0_1, %c0_2] : memref<32x1xf32, #tpu.memory_space<vmem>>, vector<32x1xf32>
    %c0_3 = arith.constant 0 : index
    %c0_4 = arith.constant 0 : index
    %c0_5 = arith.constant 0 : index
    %2 = vector.load %arg2[%c0_3, %c0_4, %c0_5] : memref<8x72x256xf32, #tpu.memory_space<vmem>>, vector<1x72x256xf32>
    %3 = vector.shape_cast %2 : vector<1x72x256xf32> to vector<72x256xf32>
    %cst = arith.constant dense<0.000000e+00> : vector<32x256xf32>
    %4 = tpu.matmul %0, %3, %cst {dimension_numbers = #tpu.dot_dimension_numbers<[1], [0], [0], [1], [0, 0, 1, 1], [], []>} : vector<32x72xf32>, vector<72x256xf32>, vector<32x256xf32> -> vector<32x256xf32>
    %5 = vector.broadcast %1 : vector<32x1xf32> to vector<32x256xf32>
    %6 = arith.addf %4, %5 : vector<32x256xf32>
    %c0_6 = arith.constant 0 : index
    %c0_7 = arith.constant 0 : index
    %c0_8 = arith.constant 0 : index
    %7 = vector.load %arg5[%c0_6, %c0_7, %c0_8] : memref<8x32x256xf32, #tpu.memory_space<vmem>>, vector<1x32x256xf32>
    %8 = vector.shape_cast %7 : vector<1x32x256xf32> to vector<32x256xf32>
    %9 = vector.shape_cast %6 : vector<32x256xf32> to vector<1x32x256xf32>
    tpu.vector_store %arg5[%c0_6, %c0_7, %c0_8], %9 {strides = array<i32>} : memref<8x32x256xf32, #tpu.memory_space<vmem>>, vector<1x32x256xf32>,
    %c1 = arith.constant 1 : index
    %c0_9 = arith.constant 0 : index
    %c0_10 = arith.constant 0 : index
    %10 = vector.load %arg2[%c1, %c0_9, %c0_10] : memref<8x72x256xf32, #tpu.memory_space<vmem>>, vector<1x72x256xf32>
    %11 = vector.shape_cast %10 : vector<1x72x256xf32> to vector<72x256xf32>
    %cst_11 = arith.constant dense<0.000000e+00> : vector<32x256xf32>
    %12 = tpu.matmul %0, %11, %cst_11 {dimension_numbers = #tpu.dot_dimension_numbers<[1], [0], [0], [1], [0, 0, 1, 1], [], []>} : vector<32x72xf32>, vector<72x256xf32>, vector<32x256xf32> -> vector<32x256xf32>
    %13 = vector.broadcast %1 : vector<32x1xf32> to vector<32x256xf32>
    %14 = arith.addf %12, %13 : vector<32x256xf32>
    %c1_12 = arith.constant 1 : index
    %c0_13 = arith.constant 0 : index
    %c0_14 = arith.constant 0 : index
    %15 = vector.load %arg5[%c1_12, %c0_13, %c0_14] : memref<8x32x256xf32, #tpu.memory_space<vmem>>, vector<1x32x256xf32>
    %16 = vector.shape_cast %15 : vector<1x32x256xf32> to vector<32x256xf32>
    %17 = vector.shape_cast %14 : vector<32x256xf32> to vector<1x32x256xf32>
    tpu.vector_store %arg5[%c1_12, %c0_13, %c0_14], %17 {strides = array<i32>} : memref<8x32x256xf32, #tpu.memory_space<vmem>>, vector<1x32x256xf32>,
    %c2 = arith.constant 2 : index
    %c0_15 = arith.constant 0 : index
    %c0_16 = arith.constant 0 : index
    %18 = vector.load %arg2[%c2, %c0_15, %c0_16] : memref<8x72x256xf32, #tpu.memory_space<vmem>>, vector<1x72x256xf32>
    %19 = vector.shape_cast %18 : vector<1x72x256xf32> to vector<72x256xf32>
    %cst_17 = arith.constant dense<0.000000e+00> : vector<32x256xf32>
    %20 = tpu.matmul %0, %19, %cst_17 {dimension_numbers = #tpu.dot_dimension_numbers<[1], [0], [0], [1], [0, 0, 1, 1], [], []>} : vector<32x72xf32>, vector<72x256xf32>, vector<32x256xf32> -> vector<32x256xf32>
    %21 = vector.broadcast %1 : vector<32x1xf32> to vector<32x256xf32>
    %22 = arith.addf %20, %21 : vector<32x256xf32>
    %c2_18 = arith.constant 2 : index
    %c0_19 = arith.constant 0 : index
    %c0_20 = arith.constant 0 : index
    %23 = vector.load %arg5[%c2_18, %c0_19, %c0_20] : memref<8x32x256xf32, #tpu.memory_space<vmem>>, vector<1x32x256xf32>
    %24 = vector.shape_cast %23 : vector<1x32x256xf32> to vector<32x256xf32>
    %25 = vector.shape_cast %22 : vector<32x256xf32> to vector<1x32x256xf32>
    tpu.vector_store %arg5[%c2_18, %c0_19, %c0_20], %25 {strides = array<i32>} : memref<8x32x256xf32, #tpu.memory_space<vmem>>, vector<1x32x256xf32>,
    %c3 = arith.constant 3 : index
    %c0_21 = arith.constant 0 : index
    %c0_22 = arith.constant 0 : index
    %26 = vector.load %arg2[%c3, %c0_21, %c0_22] : memref<8x72x256xf32, #tpu.memory_space<vmem>>, vector<1x72x256xf32>
    %27 = vector.shape_cast %26 : vector<1x72x256xf32> to vector<72x256xf32>
    %cst_23 = arith.constant dense<0.000000e+00> : vector<32x256xf32>
    %28 = tpu.matmul %0, %27, %cst_23 {dimension_numbers = #tpu.dot_dimension_numbers<[1], [0], [0], [1], [0, 0, 1, 1], [], []>} : vector<32x72xf32>, vector<72x256xf32>, vector<32x256xf32> -> vector<32x256xf32>
    %29 = vector.broadcast %1 : vector<32x1xf32> to vector<32x256xf32>
    %30 = arith.addf %28, %29 : vector<32x256xf32>
    %c3_24 = arith.constant 3 : index
    %c0_25 = arith.constant 0 : index
    %c0_26 = arith.constant 0 : index
    %31 = vector.load %arg5[%c3_24, %c0_25, %c0_26] : memref<8x32x256xf32, #tpu.memory_space<vmem>>, vector<1x32x256xf32>
    %32 = vector.shape_cast %31 : vector<1x32x256xf32> to vector<32x256xf32>
    %33 = vector.shape_cast %30 : vector<32x256xf32> to vector<1x32x256xf32>
    tpu.vector_store %arg5[%c3_24, %c0_25, %c0_26], %33 {strides = array<i32>} : memref<8x32x256xf32, #tpu.memory_space<vmem>>, vector<1x32x256xf32>,
    %c4 = arith.constant 4 : index
    %c0_27 = arith.constant 0 : index
    %c0_28 = arith.constant 0 : index
    %34 = vector.load %arg2[%c4, %c0_27, %c0_28] : memref<8x72x256xf32, #tpu.memory_space<vmem>>, vector<1x72x256xf32>
    %35 = vector.shape_cast %34 : vector<1x72x256xf32> to vector<72x256xf32>
    %cst_29 = arith.constant dense<0.000000e+00> : vector<32x256xf32>
    %36 = tpu.matmul %0, %35, %cst_29 {dimension_numbers = #tpu.dot_dimension_numbers<[1], [0], [0], [1], [0, 0, 1, 1], [], []>} : vector<32x72xf32>, vector<72x256xf32>, vector<32x256xf32> -> vector<32x256xf32>
    %37 = vector.broadcast %1 : vector<32x1xf32> to vector<32x256xf32>
    %38 = arith.addf %36, %37 : vector<32x256xf32>
    %c4_30 = arith.constant 4 : index
    %c0_31 = arith.constant 0 : index
    %c0_32 = arith.constant 0 : index
    %39 = vector.load %arg5[%c4_30, %c0_31, %c0_32] : memref<8x32x256xf32, #tpu.memory_space<vmem>>, vector<1x32x256xf32>
    %40 = vector.shape_cast %39 : vector<1x32x256xf32> to vector<32x256xf32>
    %41 = vector.shape_cast %38 : vector<32x256xf32> to vector<1x32x256xf32>
    tpu.vector_store %arg5[%c4_30, %c0_31, %c0_32], %41 {strides = array<i32>} : memref<8x32x256xf32, #tpu.memory_space<vmem>>, vector<1x32x256xf32>,
    %c5 = arith.constant 5 : index
    %c0_33 = arith.constant 0 : index
    %c0_34 = arith.constant 0 : index
    %42 = vector.load %arg2[%c5, %c0_33, %c0_34] : memref<8x72x256xf32, #tpu.memory_space<vmem>>, vector<1x72x256xf32>
    %43 = vector.shape_cast %42 : vector<1x72x256xf32> to vector<72x256xf32>
    %cst_35 = arith.constant dense<0.000000e+00> : vector<32x256xf32>
    %44 = tpu.matmul %0, %43, %cst_35 {dimension_numbers = #tpu.dot_dimension_numbers<[1], [0], [0], [1], [0, 0, 1, 1], [], []>} : vector<32x72xf32>, vector<72x256xf32>, vector<32x256xf32> -> vector<32x256xf32>
    %45 = vector.broadcast %1 : vector<32x1xf32> to vector<32x256xf32>
    %46 = arith.addf %44, %45 : vector<32x256xf32>
    %c5_36 = arith.constant 5 : index
    %c0_37 = arith.constant 0 : index
    %c0_38 = arith.constant 0 : index
    %47 = vector.load %arg5[%c5_36, %c0_37, %c0_38] : memref<8x32x256xf32, #tpu.memory_space<vmem>>, vector<1x32x256xf32>
    %48 = vector.shape_cast %47 : vector<1x32x256xf32> to vector<32x256xf32>
    %49 = vector.shape_cast %46 : vector<32x256xf32> to vector<1x32x256xf32>
    tpu.vector_store %arg5[%c5_36, %c0_37, %c0_38], %49 {strides = array<i32>} : memref<8x32x256xf32, #tpu.memory_space<vmem>>, vector<1x32x256xf32>,
    %c6 = arith.constant 6 : index
    %c0_39 = arith.constant 0 : index
    %c0_40 = arith.constant 0 : index
    %50 = vector.load %arg2[%c6, %c0_39, %c0_40] : memref<8x72x256xf32, #tpu.memory_space<vmem>>, vector<1x72x256xf32>
    %51 = vector.shape_cast %50 : vector<1x72x256xf32> to vector<72x256xf32>
    %cst_41 = arith.constant dense<0.000000e+00> : vector<32x256xf32>
    %52 = tpu.matmul %0, %51, %cst_41 {dimension_numbers = #tpu.dot_dimension_numbers<[1], [0], [0], [1], [0, 0, 1, 1], [], []>} : vector<32x72xf32>, vector<72x256xf32>, vector<32x256xf32> -> vector<32x256xf32>
    %53 = vector.broadcast %1 : vector<32x1xf32> to vector<32x256xf32>
    %54 = arith.addf %52, %53 : vector<32x256xf32>
    %c6_42 = arith.constant 6 : index
    %c0_43 = arith.constant 0 : index
    %c0_44 = arith.constant 0 : index
    %55 = vector.load %arg5[%c6_42, %c0_43, %c0_44] : memref<8x32x256xf32, #tpu.memory_space<vmem>>, vector<1x32x256xf32>
    %56 = vector.shape_cast %55 : vector<1x32x256xf32> to vector<32x256xf32>
    %57 = vector.shape_cast %54 : vector<32x256xf32> to vector<1x32x256xf32>
    tpu.vector_store %arg5[%c6_42, %c0_43, %c0_44], %57 {strides = array<i32>} : memref<8x32x256xf32, #tpu.memory_space<vmem>>, vector<1x32x256xf32>,
    %c7 = arith.constant 7 : index
    %c0_45 = arith.constant 0 : index
    %c0_46 = arith.constant 0 : index
    %58 = vector.load %arg2[%c7, %c0_45, %c0_46] : memref<8x72x256xf32, #tpu.memory_space<vmem>>, vector<1x72x256xf32>
    %59 = vector.shape_cast %58 : vector<1x72x256xf32> to vector<72x256xf32>
    %cst_47 = arith.constant dense<0.000000e+00> : vector<32x256xf32>
    %60 = tpu.matmul %0, %59, %cst_47 {dimension_numbers = #tpu.dot_dimension_numbers<[1], [0], [0], [1], [0, 0, 1, 1], [], []>} : vector<32x72xf32>, vector<72x256xf32>, vector<32x256xf32> -> vector<32x256xf32>
    %61 = vector.broadcast %1 : vector<32x1xf32> to vector<32x256xf32>
    %62 = arith.addf %60, %61 : vector<32x256xf32>
    %c7_48 = arith.constant 7 : index
    %c0_49 = arith.constant 0 : index
    %c0_50 = arith.constant 0 : index
    %63 = vector.load %arg5[%c7_48, %c0_49, %c0_50] : memref<8x32x256xf32, #tpu.memory_space<vmem>>, vector<1x32x256xf32>
    %64 = vector.shape_cast %63 : vector<1x32x256xf32> to vector<32x256xf32>
    %65 = vector.shape_cast %62 : vector<32x256xf32> to vector<1x32x256xf32>
    tpu.vector_store %arg5[%c7_48, %c0_49, %c0_50], %65 {strides = array<i32>} : memref<8x32x256xf32, #tpu.memory_space<vmem>>, vector<1x32x256xf32>,
    return
  }
  func.func @transform_0(%arg0: i32, %arg1: i32) -> (i32, i32, i32) {
    %c0_i32 = arith.constant 0 : i32
    %c0_i32_0 = arith.constant 0 : i32
    return %arg0, %c0_i32, %arg1 : i32, i32, i32
  }
  func.func @transform_1(%arg0: i32, %arg1: i32) -> (i32, i32) {
    %c0_i32 = arith.constant 0 : i32
    %c0_i32_0 = arith.constant 0 : i32
    %c0_i32_1 = arith.constant 0 : i32
    return %c0_i32, %c0_i32_0 : i32, i32
  }
  func.func @transform_2(%arg0: i32, %arg1: i32) -> (i32, i32) {
    %c0_i32 = arith.constant 0 : i32
    %c0_i32_0 = arith.constant 0 : i32
    %c0_i32_1 = arith.constant 0 : i32
    return %c0_i32, %c0_i32_0 : i32, i32
  }
  func.func @transform_3(%arg0: i32, %arg1: i32) -> (i32, i32, i32) {
    %c0_i32 = arith.constant 0 : i32
    %c0_i32_0 = arith.constant 0 : i32
    return %arg0, %c0_i32, %arg1 : i32, i32, i32
  }
}

module attributes {stable_mosaic.version = 11 : i64} {
  func.func @_routing_kernel(%arg0: i32, %arg1: i32, %arg2: memref<1x4x4x8x256xf32, #tpu.memory_space<vmem>>, %arg3: memref<1x4x8x256xf32, #tpu.memory_space<vmem>>, %arg4: memref<1x1x256xf32, #tpu.memory_space<vmem>>) attributes {dimension_semantics = [#tpu.dimension_semantics<parallel>, #tpu.dimension_semantics<parallel>], iteration_bounds = array<i64: 2, 1>, scalar_prefetch = 0 : i64, scratch_operands = 0 : i64, tpu.core_type = #tpu.core_type<tc>, window_params = [{transform_indices = @transform_0, window_bounds = array<i64: 1, 4, 4, 8, 256>}, {transform_indices = @transform_1, window_bounds = array<i64: 1, 4, 8, 256>}, {transform_indices = @transform_2, window_bounds = array<i64: 1, 1, 256>}]} {
    %c0 = arith.constant 0 : index
    %c0_0 = arith.constant 0 : index
    %c0_1 = arith.constant 0 : index
    %c0_2 = arith.constant 0 : index
    %c0_3 = arith.constant 0 : index
    %0 = vector.load %arg2[%c0, %c0_0, %c0_1, %c0_2, %c0_3] : memref<1x4x4x8x256xf32, #tpu.memory_space<vmem>>, vector<1x4x4x8x256xf32>
    %1 = vector.shape_cast %0 : vector<1x4x4x8x256xf32> to vector<4x4x8x256xf32>
    %cst = arith.constant 0.000000e+00 : f32
    %2 = vector.broadcast %cst : f32 to vector<4x4x1x256xf32>
    %cst_4 = arith.constant dense<0xFF800000> : vector<4x1x256xf32>
    %3 = vector.multi_reduction <maximumf>, %2, %cst_4 [1] : vector<4x4x1x256xf32> to vector<4x1x256xf32>
    %4 = vector.shape_cast %3 : vector<4x1x256xf32> to vector<4x1x1x256xf32>
    %5 = vector.broadcast %4 : vector<4x1x1x256xf32> to vector<4x4x1x256xf32>
    %6 = arith.subf %2, %5 : vector<4x4x1x256xf32>
    %7 = math.exp %6 : vector<4x4x1x256xf32>
    %cst_5 = arith.constant dense<0.000000e+00> : vector<4x1x256xf32>
    %8 = vector.multi_reduction <add>, %7, %cst_5 [1] : vector<4x4x1x256xf32> to vector<4x1x256xf32>
    %9 = vector.shape_cast %8 : vector<4x1x256xf32> to vector<4x1x1x256xf32>
    %10 = tpu.reciprocal %9 {approx = true} : vector<4x1x1x256xf32> -> vector<4x1x1x256xf32>
    %11 = vector.broadcast %10 : vector<4x1x1x256xf32> to vector<4x4x1x256xf32>
    %12 = arith.mulf %7, %11 : vector<4x4x1x256xf32>
    %13 = vector.broadcast %12 : vector<4x4x1x256xf32> to vector<4x4x8x256xf32>
    %14 = arith.mulf %13, %1 : vector<4x4x8x256xf32>
    %cst_6 = arith.constant dense<0.000000e+00> : vector<4x8x256xf32>
    %15 = vector.multi_reduction <add>, %14, %cst_6 [0] : vector<4x4x8x256xf32> to vector<4x8x256xf32>
    %16 = arith.mulf %15, %15 : vector<4x8x256xf32>
    %cst_7 = arith.constant dense<0.000000e+00> : vector<4x256xf32>
    %17 = vector.multi_reduction <add>, %16, %cst_7 [1] : vector<4x8x256xf32> to vector<4x256xf32>
    %18 = vector.shape_cast %17 : vector<4x256xf32> to vector<4x1x256xf32>
    %19 = math.sqrt %18 : vector<4x1x256xf32>
    %cst_8 = arith.constant 1.000000e+00 : f32
    %20 = vector.broadcast %cst_8 : f32 to vector<4x1x256xf32>
    %21 = arith.addf %20, %18 : vector<4x1x256xf32>
    %cst_9 = arith.constant 9.99999993E-9 : f32
    %22 = vector.broadcast %cst_9 : f32 to vector<4x1x256xf32>
    %23 = arith.addf %19, %22 : vector<4x1x256xf32>
    %24 = arith.mulf %21, %23 : vector<4x1x256xf32>
    %25 = tpu.reciprocal %24 {approx = true} : vector<4x1x256xf32> -> vector<4x1x256xf32>
    %26 = arith.mulf %18, %25 : vector<4x1x256xf32>
    %27 = vector.broadcast %26 : vector<4x1x256xf32> to vector<4x8x256xf32>
    %28 = arith.mulf %27, %15 : vector<4x8x256xf32>
    %29 = vector.shape_cast %28 : vector<4x8x256xf32> to vector<1x4x8x256xf32>
    %30 = vector.broadcast %29 : vector<1x4x8x256xf32> to vector<4x4x8x256xf32>
    %31 = arith.mulf %1, %30 : vector<4x4x8x256xf32>
    %cst_10 = arith.constant dense<0.000000e+00> : vector<4x4x256xf32>
    %32 = vector.multi_reduction <add>, %31, %cst_10 [2] : vector<4x4x8x256xf32> to vector<4x4x256xf32>
    %33 = vector.shape_cast %32 : vector<4x4x256xf32> to vector<4x4x1x256xf32>
    %34 = arith.addf %2, %33 : vector<4x4x1x256xf32>
    %cst_11 = arith.constant dense<0xFF800000> : vector<4x1x256xf32>
    %35 = vector.multi_reduction <maximumf>, %34, %cst_11 [1] : vector<4x4x1x256xf32> to vector<4x1x256xf32>
    %36 = vector.shape_cast %35 : vector<4x1x256xf32> to vector<4x1x1x256xf32>
    %37 = vector.broadcast %36 : vector<4x1x1x256xf32> to vector<4x4x1x256xf32>
    %38 = arith.subf %34, %37 : vector<4x4x1x256xf32>
    %39 = math.exp %38 : vector<4x4x1x256xf32>
    %cst_12 = arith.constant dense<0.000000e+00> : vector<4x1x256xf32>
    %40 = vector.multi_reduction <add>, %39, %cst_12 [1] : vector<4x4x1x256xf32> to vector<4x1x256xf32>
    %41 = vector.shape_cast %40 : vector<4x1x256xf32> to vector<4x1x1x256xf32>
    %42 = tpu.reciprocal %41 {approx = true} : vector<4x1x1x256xf32> -> vector<4x1x1x256xf32>
    %43 = vector.broadcast %42 : vector<4x1x1x256xf32> to vector<4x4x1x256xf32>
    %44 = arith.mulf %39, %43 : vector<4x4x1x256xf32>
    %45 = vector.broadcast %44 : vector<4x4x1x256xf32> to vector<4x4x8x256xf32>
    %46 = arith.mulf %45, %1 : vector<4x4x8x256xf32>
    %cst_13 = arith.constant dense<0.000000e+00> : vector<4x8x256xf32>
    %47 = vector.multi_reduction <add>, %46, %cst_13 [0] : vector<4x4x8x256xf32> to vector<4x8x256xf32>
    %48 = arith.mulf %47, %47 : vector<4x8x256xf32>
    %cst_14 = arith.constant dense<0.000000e+00> : vector<4x256xf32>
    %49 = vector.multi_reduction <add>, %48, %cst_14 [1] : vector<4x8x256xf32> to vector<4x256xf32>
    %50 = vector.shape_cast %49 : vector<4x256xf32> to vector<4x1x256xf32>
    %51 = math.sqrt %50 : vector<4x1x256xf32>
    %cst_15 = arith.constant 1.000000e+00 : f32
    %52 = vector.broadcast %cst_15 : f32 to vector<4x1x256xf32>
    %53 = arith.addf %52, %50 : vector<4x1x256xf32>
    %cst_16 = arith.constant 9.99999993E-9 : f32
    %54 = vector.broadcast %cst_16 : f32 to vector<4x1x256xf32>
    %55 = arith.addf %51, %54 : vector<4x1x256xf32>
    %56 = arith.mulf %53, %55 : vector<4x1x256xf32>
    %57 = tpu.reciprocal %56 {approx = true} : vector<4x1x256xf32> -> vector<4x1x256xf32>
    %58 = arith.mulf %50, %57 : vector<4x1x256xf32>
    %59 = vector.broadcast %58 : vector<4x1x256xf32> to vector<4x8x256xf32>
    %60 = arith.mulf %59, %47 : vector<4x8x256xf32>
    %61 = vector.shape_cast %60 : vector<4x8x256xf32> to vector<1x4x8x256xf32>
    %62 = vector.broadcast %61 : vector<1x4x8x256xf32> to vector<4x4x8x256xf32>
    %63 = arith.mulf %1, %62 : vector<4x4x8x256xf32>
    %cst_17 = arith.constant dense<0.000000e+00> : vector<4x4x256xf32>
    %64 = vector.multi_reduction <add>, %63, %cst_17 [2] : vector<4x4x8x256xf32> to vector<4x4x256xf32>
    %65 = vector.shape_cast %64 : vector<4x4x256xf32> to vector<4x4x1x256xf32>
    %66 = arith.addf %34, %65 : vector<4x4x1x256xf32>
    %cst_18 = arith.constant dense<0xFF800000> : vector<4x1x256xf32>
    %67 = vector.multi_reduction <maximumf>, %66, %cst_18 [1] : vector<4x4x1x256xf32> to vector<4x1x256xf32>
    %68 = vector.shape_cast %67 : vector<4x1x256xf32> to vector<4x1x1x256xf32>
    %69 = vector.broadcast %68 : vector<4x1x1x256xf32> to vector<4x4x1x256xf32>
    %70 = arith.subf %66, %69 : vector<4x4x1x256xf32>
    %71 = math.exp %70 : vector<4x4x1x256xf32>
    %cst_19 = arith.constant dense<0.000000e+00> : vector<4x1x256xf32>
    %72 = vector.multi_reduction <add>, %71, %cst_19 [1] : vector<4x4x1x256xf32> to vector<4x1x256xf32>
    %73 = vector.shape_cast %72 : vector<4x1x256xf32> to vector<4x1x1x256xf32>
    %74 = tpu.reciprocal %73 {approx = true} : vector<4x1x1x256xf32> -> vector<4x1x1x256xf32>
    %75 = vector.broadcast %74 : vector<4x1x1x256xf32> to vector<4x4x1x256xf32>
    %76 = arith.mulf %71, %75 : vector<4x4x1x256xf32>
    %77 = vector.broadcast %76 : vector<4x4x1x256xf32> to vector<4x4x8x256xf32>
    %78 = arith.mulf %77, %1 : vector<4x4x8x256xf32>
    %cst_20 = arith.constant dense<0.000000e+00> : vector<4x8x256xf32>
    %79 = vector.multi_reduction <add>, %78, %cst_20 [0] : vector<4x4x8x256xf32> to vector<4x8x256xf32>
    %80 = arith.mulf %79, %79 : vector<4x8x256xf32>
    %cst_21 = arith.constant dense<0.000000e+00> : vector<4x256xf32>
    %81 = vector.multi_reduction <add>, %80, %cst_21 [1] : vector<4x8x256xf32> to vector<4x256xf32>
    %82 = vector.shape_cast %81 : vector<4x256xf32> to vector<4x1x256xf32>
    %83 = math.sqrt %82 : vector<4x1x256xf32>
    %cst_22 = arith.constant 1.000000e+00 : f32
    %84 = vector.broadcast %cst_22 : f32 to vector<4x1x256xf32>
    %85 = arith.addf %84, %82 : vector<4x1x256xf32>
    %cst_23 = arith.constant 9.99999993E-9 : f32
    %86 = vector.broadcast %cst_23 : f32 to vector<4x1x256xf32>
    %87 = arith.addf %83, %86 : vector<4x1x256xf32>
    %88 = arith.mulf %85, %87 : vector<4x1x256xf32>
    %89 = tpu.reciprocal %88 {approx = true} : vector<4x1x256xf32> -> vector<4x1x256xf32>
    %90 = arith.mulf %82, %89 : vector<4x1x256xf32>
    %91 = vector.broadcast %90 : vector<4x1x256xf32> to vector<4x8x256xf32>
    %92 = arith.mulf %91, %79 : vector<4x8x256xf32>
    %c0_24 = arith.constant 0 : index
    %c0_25 = arith.constant 0 : index
    %c0_26 = arith.constant 0 : index
    %c0_27 = arith.constant 0 : index
    %93 = vector.load %arg3[%c0_24, %c0_25, %c0_26, %c0_27] : memref<1x4x8x256xf32, #tpu.memory_space<vmem>>, vector<1x4x8x256xf32>
    %94 = vector.shape_cast %93 : vector<1x4x8x256xf32> to vector<4x8x256xf32>
    %95 = vector.shape_cast %92 : vector<4x8x256xf32> to vector<1x4x8x256xf32>
    tpu.vector_store %arg3[%c0_24, %c0_25, %c0_26, %c0_27], %95 {strides = array<i32>} : memref<1x4x8x256xf32, #tpu.memory_space<vmem>>, vector<1x4x8x256xf32>,
    %cst_28 = arith.constant 9.99999993E-9 : f32
    %96 = vector.broadcast %cst_28 : f32 to vector<4x4x1x256xf32>
    %97 = arith.addf %76, %96 : vector<4x4x1x256xf32>
    %98 = math.log %97 : vector<4x4x1x256xf32>
    %cst_29 = arith.constant 0.62133491 : f32
    %99 = vector.broadcast %cst_29 : f32 to vector<4x4x1x256xf32>
    %100 = arith.mulf %98, %99 : vector<4x4x1x256xf32>
    %101 = arith.mulf %76, %100 : vector<4x4x1x256xf32>
    %cst_30 = arith.constant dense<0.000000e+00> : vector<256xf32>
    %102 = vector.multi_reduction <add>, %101, %cst_30 [0, 1, 2] : vector<4x4x1x256xf32> to vector<256xf32>
    %c0_31 = arith.constant 0 : index
    %c0_32 = arith.constant 0 : index
    %c0_33 = arith.constant 0 : index
    %103 = vector.load %arg4[%c0_31, %c0_32, %c0_33] : memref<1x1x256xf32, #tpu.memory_space<vmem>>, vector<1x1x256xf32>
    %104 = vector.shape_cast %103 : vector<1x1x256xf32> to vector<256xf32>
    %105 = vector.shape_cast %102 : vector<256xf32> to vector<1x1x256xf32>
    tpu.vector_store %arg4[%c0_31, %c0_32, %c0_33], %105 {strides = array<i32>} : memref<1x1x256xf32, #tpu.memory_space<vmem>>, vector<1x1x256xf32>,
    return
  }
  func.func @transform_0(%arg0: i32, %arg1: i32) -> (i32, i32, i32, i32, i32) {
    %c0_i32 = arith.constant 0 : i32
    %c0_i32_0 = arith.constant 0 : i32
    %c0_i32_1 = arith.constant 0 : i32
    %c0_i32_2 = arith.constant 0 : i32
    return %arg0, %c0_i32, %c0_i32_0, %c0_i32_1, %arg1 : i32, i32, i32, i32, i32
  }
  func.func @transform_1(%arg0: i32, %arg1: i32) -> (i32, i32, i32, i32) {
    %c0_i32 = arith.constant 0 : i32
    %c0_i32_0 = arith.constant 0 : i32
    %c0_i32_1 = arith.constant 0 : i32
    return %arg0, %c0_i32, %c0_i32_0, %arg1 : i32, i32, i32, i32
  }
  func.func @transform_2(%arg0: i32, %arg1: i32) -> (i32, i32, i32) {
    %c0_i32 = arith.constant 0 : i32
    %c0_i32_0 = arith.constant 0 : i32
    return %arg0, %c0_i32, %arg1 : i32, i32, i32
  }
}

</mosaic_0001>

<bundles_post_ra>
// kernel: conv_capsule_forward.2
= control target key start
LH: loop header
LB: loop body
LE: loop exit
PB: predicated region body
PF: predicated region fallthrough
CT: control target
= control target key end

     0   :  { %v1339_v3 = vmov 0.0   ;;  %v1340_v8 = vmov 0   ;;  %vm60_vm0 = vcmask 588800   ;;  %s2185_s0 = inlined_call_operand.vmem [shape: f32[8,72,256], index: 0, kind: input, shape index: {}]   ;;  %s2186_s1 = inlined_call_operand.vmem [shape: f32[32,72], index: 1, kind: input, shape index: {}]   ;;  %s2187_s2 = inlined_call_operand.vmem [shape: f32[32,1], index: 2, kind: input, shape index: {}]   ;;  %s2188_s3 = inlined_call_operand.vmem [shape: f32[8,32,256], index: 3, kind: output, shape index: {}]  }
   0x1   :  { %v23_v0 = vld [vmem:[%s2185_s0 + $0x8] sm:$0xff]  ;;  %v25_v1 = vld [vmem:[%s2185_s0 + $0x18] sm:$0xff]  ;;  %137 = vmatprep.mubr.f32.mxu0 %v1339_v3  ;;  %253 = vmatprep.mubr.f32.mxu1 %v1339_v3  ;;  %v22_v6 = vld [vmem:[%s2185_s0] sm:$0xff] }
   0x2   :  { %v998_v2 = vld [vmem:[%s2185_s0 + $0x98] sm:$0xff]  ;;  %v1207_v4 = vpack.c.bf16 %v25_v1, %v23_v0  ;;  %v1000_v5 = vld [vmem:[%s2185_s0 + $0xa8] sm:$0xff]  ;;  %v24_v7 = vld [vmem:[%s2185_s0 + $0x10] sm:$0xff]  ;;  %1337 = vset.pattern.permute.xlu0 %v1340_v8  ;;  %1338 = vset.pattern.permute.xlu1 %v1340_v8 }
   0x3   :  { %v1223_v9 = vpack.c.bf16 %v1000_v5, %v998_v2  ;;  %v1209_v10 = vpack.c.bf16 %v24_v7, %v22_v6  ;;  %v997_v11 = vld [vmem:[%s2185_s0 + $0x90] sm:$0xff]  ;;  %v999_v12 = vld [vmem:[%s2185_s0 + $0xa0] sm:$0xff]  ;;  %v27_v13 = vld [vmem:[%s2185_s0 + $0x28] sm:$0xff] }
   0x4   :  { %1208 = vmatprep.subr.bf16.mxu0 %v1207_v4  ;;  %v1225_v14 = vpack.c.bf16 %v999_v12, %v997_v11  ;;  %v29_v15 = vld [vmem:[%s2185_s0 + $0x38] sm:$0xff]  ;;  %v1004_v17 = vld [vmem:[%s2185_s0 + $0xc8] sm:$0xff]  ;;  %v26_v20 = vld [vmem:[%s2185_s0 + $0x20] sm:$0xff] }
   0x5   :  { %v1002_v16 = vld [vmem:[%s2185_s0 + $0xb8] sm:$0xff]  ;;  %1224 = vmatprep.subr.bf16.mxu1 %v1223_v9  ;;  %1210 = vmatpush1.bf16.msra.mxu0 %v1209_v10  ;;  %v1211_v18 = vpack.c.bf16 %v29_v15, %v27_v13  ;;  %v28_v21 = vld [vmem:[%s2185_s0 + $0x30] sm:$0xff]  ;;  %v1003_v24 = vld [vmem:[%s2185_s0 + $0xc0] sm:$0xff] }
   0x6   :  { %v1227_v19 = vpack.c.bf16 %v1004_v17, %v1002_v16  ;;  %v1001_v22 = vld [vmem:[%s2185_s0 + $0xb0] sm:$0xff]  ;;  %1226 = vmatpush1.bf16.msra.mxu1 %v1225_v14  ;;  %v1213_v23 = vpack.c.bf16 %v28_v21, %v26_v20  ;;  %v31_v25 = vld [vmem:[%s2185_s0 + $0x48] sm:$0xff]  ;;  %v33_v26 = vld [vmem:[%s2185_s0 + $0x58] sm:$0xff] }
   0x7   :  { %1212 = vmatprep.subr.bf16.mxu0 %v1211_v18  ;;  %v1229_v27 = vpack.c.bf16 %v1003_v24, %v1001_v22  ;;  %v1215_v28 = vpack.c.bf16 %v33_v26, %v31_v25  ;;  %v1006_v29 = vld [vmem:[%s2185_s0 + $0xd8] sm:$0xff]  ;;  %v1008_v30 = vld [vmem:[%s2185_s0 + $0xe8] sm:$0xff]  ;;  %v30_v31 = vld [vmem:[%s2185_s0 + $0x40] sm:$0xff] }
   0x8   :  { %1228 = vmatprep.subr.bf16.mxu1 %v1227_v19  ;;  %v1231_v32 = vpack.c.bf16 %v1008_v30, %v1006_v29  ;;  %v32_v33 = vld [vmem:[%s2185_s0 + $0x50] sm:$0xff]  ;;  %v1007_v35 = vld [vmem:[%s2185_s0 + $0xe0] sm:$0xff]  ;;  %v35_v37 = vld [vmem:[%s2185_s0 + $0x68] sm:$0xff] }
   0x9   :  { %v1005_v34 = vld [vmem:[%s2185_s0 + $0xd0] sm:$0xff]  ;;  %1214 = vmatpush1.bf16.msra.mxu0 %v1213_v23  ;;  %v1217_v36 = vpack.c.bf16 %v32_v33, %v30_v31  ;;  %v37_v38 = vld [vmem:[%s2185_s0 + $0x78] sm:$0xff]  ;;  %v1012_v42 = vld [vmem:[%s2185_s0 + $0x108] sm:$0xff] }
   0xa   :  { %v1010_v39 = vld [vmem:[%s2185_s0 + $0xf8] sm:$0xff]  ;;  %1230 = vmatpush1.bf16.msra.mxu1 %v1229_v27  ;;  %1216 = vmatprep.subr.bf16.mxu0 %v1215_v28  ;;  %v1233_v40 = vpack.c.bf16 %v1007_v35, %v1005_v34  ;;  %v1219_v41 = vpack.c.bf16 %v37_v38, %v35_v37  ;;  %v34_v43 = vld [vmem:[%s2185_s0 + $0x60] sm:$0xff]  ;;  %v36_v44 = vld [vmem:[%s2185_s0 + $0x70] sm:$0xff] }
   0xb   :  { %1232 = vmatprep.subr.bf16.mxu1 %v1231_v32  ;;  %v1235_v45 = vpack.c.bf16 %v1012_v42, %v1010_v39  ;;  %v1009_v46 = vld [vmem:[%s2185_s0 + $0xf0] sm:$0xff]  ;;  %v1011_v47 = vld [vmem:[%s2185_s0 + $0x100] sm:$0xff]  ;;  %v1221_v48 = vpack.c.bf16 %v36_v44, %v34_v43  ;;  %v39_v50 = vld [vmem:[%s2185_s0 + $0x88] sm:$0xff] }
   0xc   :  { %v1237_v49 = vpack.c.bf16 %v1011_v47, %v1009_v46  ;;  %v1014_v51 = vld [vmem:[%s2185_s0 + $0x118] sm:$0xff]  ;;  %v1028_v52 = vld [vmem:[%s2185_s0 + $0x128] sm:$0xff]  ;;  %v38_v53 = vld [vmem:[%s2185_s0 + $0x80] sm:$0xff] }
   0xd   :  { %1218 = vmatpush1.bf16.msra.mxu0 %v1217_v36  ;;  %v1030_v54 = vld [vmem:[%s2185_s0 + $0x138] sm:$0xff]  ;;  %v1060_v56 = vld [vmem:[%s2185_s0 + $0x1c8] sm:$0xff]  ;;  %v1013_v57 = vld [vmem:[%s2185_s0 + $0x110] sm:$0xff] }
   0xe   :  { %1234 = vmatpush1.bf16.msra.mxu1 %v1233_v40  ;;  %1220 = vmatprep.subr.bf16.mxu0 %v1219_v41  ;;  %v1058_v55 = vld [vmem:[%s2185_s0 + $0x1b8] sm:$0xff]  ;;  %v1027_v58 = vld [vmem:[%s2185_s0 + $0x120] sm:$0xff]  ;;  %v1029_v59 = vld [vmem:[%s2185_s0 + $0x130] sm:$0xff]  ;;  %v1239_v1 = vpack.c.bf16 %v1030_v54, %v1028_v52 }
   0xf   :  { %1236 = vmatprep.subr.bf16.mxu1 %v1235_v45  ;;  %v1057_v60 = vld [vmem:[%s2185_s0 + $0x1b0] sm:$0xff]  ;;  %v1059_v61 = vld [vmem:[%s2185_s0 + $0x1c0] sm:$0xff]  ;;  %v1032_v62 = vld [vmem:[%s2185_s0 + $0x148] sm:$0xff]  ;;  %v1255_v5 = vpack.c.bf16 %v1060_v56, %v1058_v55  ;;  %v1241_v6 = vpack.c.bf16 %v1029_v59, %v1027_v58 }
  0x10   :  { %v1034_v63 = vld [vmem:[%s2185_s0 + $0x158] sm:$0xff]  ;;  %v1504_v0 = vld [vmem:[%s2186_s1] sm:$0xff]  ;;  %v1064_v4 = vld [vmem:[%s2185_s0 + $0x1e8] sm:$0xff]  ;;  %v1257_v7 = vpack.c.bf16 %v1059_v61, %v1057_v60 }
  0x11   :  { %1222 = vmatpush1.bf16.msra.mxu0 %v1221_v48  ;;  %v1062_v2 = vld [vmem:[%s2185_s0 + $0x1d8] sm:$0xff]  ;;  %v1243_v8 = vpack.c.bf16 %v1034_v63, %v1032_v62  ;;  %v1031_v9 = vld [vmem:[%s2185_s0 + $0x140] sm:$0xff]  ;;  %v1033_v10 = vld [vmem:[%s2185_s0 + $0x150] sm:$0xff] }
  0x12   :  { %1238 = vmatpush1.bf16.msra.mxu1 %v1237_v49  ;;  %89 = vmatprep.subr.mxu0 %v39_v50  ;;  %v1061_v11 = vld [vmem:[%s2185_s0 + $0x1d0] sm:$0xff]  ;;  %v1259_v12 = vpack.c.bf16 %v1064_v4, %v1062_v2  ;;  %v1063_v13 = vld [vmem:[%s2185_s0 + $0x1e0] sm:$0xff]  ;;  %v1036_v14 = vld [vmem:[%s2185_s0 + $0x168] sm:$0xff]  ;;  %v1245_v18 = vpack.c.bf16 %v1033_v10, %v1031_v9 }
  0x13   :  { %205 = vmatprep.subr.mxu1 %v1014_v51  ;;  %v1038_v15 = vld [vmem:[%s2185_s0 + $0x178] sm:$0xff]  ;;  %v1068_v17 = vld [vmem:[%s2185_s0 + $0x208] sm:$0xff]  ;;  %v1261_v20 = vpack.c.bf16 %v1063_v13, %v1061_v11  ;;  %v1035_v22 = vld [vmem:[%s2185_s0 + $0x160] sm:$0xff] }
  0x14   :  { %v1066_v16 = vld [vmem:[%s2185_s0 + $0x1f8] sm:$0xff]  ;;  %v1543_v19 = vld [vmem:[%s2186_s1 + $0x8] sm:$0xff]  ;;  %v1247_v21 = vpack.c.bf16 %v1038_v15, %v1036_v14  ;;  %v1037_v23 = vld [vmem:[%s2185_s0 + $0x170] sm:$0xff] }
  0x15   :  { %90 = vmatpush1.msra.mxu0 %v38_v53  ;;  %v1065_v24 = vld [vmem:[%s2185_s0 + $0x1f0] sm:$0xff]  ;;  %v1263_v25 = vpack.c.bf16 %v1068_v17, %v1066_v16  ;;  %v1067_v26 = vld [vmem:[%s2185_s0 + $0x200] sm:$0xff]  ;;  %v1040_v27 = vld [vmem:[%s2185_s0 + $0x188] sm:$0xff]  ;;  %v1249_v31 = vpack.c.bf16 %v1037_v23, %v1035_v22 }
  0x16   :  { %206 = vmatpush1.msra.mxu1 %v1013_v57  ;;  %993 = vmatmul.mubr.msk.f32.vlgmr.msra.gmra.mrb[0].mxu0 %vm60_vm0, %v1504_v0  ;;  %v1042_v28 = vld [vmem:[%s2185_s0 + $0x198] sm:$0xff]  ;;  %v1072_v30 = vld [vmem:[%s2185_s0 + $0x228] sm:$0xff]  ;;  %v1578_v32 = vld [vmem:[%s2186_s1 + $0x10] sm:$0xff]  ;;  %v1265_v33 = vpack.c.bf16 %v1067_v26, %v1065_v24 }
  0x17   :  { %1015 = vmatmul.mubr.msk.f32.vlgmr.msra.gmra.mrb[0].mxu1 %vm60_vm0, %v1504_v0  ;;  %1240 = vmatprep.subr.bf16.mxu0 %v1239_v1  ;;  %v1070_v29 = vld [vmem:[%s2185_s0 + $0x218] sm:$0xff]  ;;  %v1251_v34 = vpack.c.bf16 %v1042_v28, %v1040_v27  ;;  %v1039_v35 = vld [vmem:[%s2185_s0 + $0x180] sm:$0xff]  ;;  %v1041_v36 = vld [vmem:[%s2185_s0 + $0x190] sm:$0xff] }
  0x18   :  { %1256 = vmatprep.subr.bf16.mxu1 %v1255_v5  ;;  %1242 = vmatpush1.bf16.msra.mxu0 %v1241_v6  ;;  %v1267_v37 = vpack.c.bf16 %v1072_v30, %v1070_v29  ;;  %v1069_v38 = vld [vmem:[%s2185_s0 + $0x210] sm:$0xff]  ;;  %v1071_v39 = vld [vmem:[%s2185_s0 + $0x220] sm:$0xff]  ;;  %v1253_v40 = vpack.c.bf16 %v1041_v36, %v1039_v35  ;;  %v1601_v41 = vld [vmem:[%s2186_s1 + $0x18] sm:$0xff] }
  0x19   :  { %1258 = vmatpush1.bf16.msra.mxu1 %v1257_v7  ;;  %1244 = vmatprep.subr.bf16.mxu0 %v1243_v8  ;;  %v1269_v42 = vpack.c.bf16 %v1071_v39, %v1069_v38  ;;  %v1044_v43 = vld [vmem:[%s2185_s0 + $0x1a8] sm:$0xff]  ;;  %v1074_v44 = vld [vmem:[%s2185_s0 + $0x238] sm:$0xff]  ;;  %v1043_v46 = vld [vmem:[%s2185_s0 + $0x1a0] sm:$0xff] }
  0x1a   :  { %1260 = vmatprep.subr.bf16.mxu1 %v1259_v12  ;;  %143 = vmatprep.mubr.f32.mxu0 %v1339_v3  ;;  %v1088_v45 = vld [vmem:[%s2185_s0 + $0x248] sm:$0xff]  ;;  %v1090_v47 = vld [vmem:[%s2185_s0 + $0x258] sm:$0xff]  ;;  %v1087_v50 = vld [vmem:[%s2185_s0 + $0x240] sm:$0xff] }
  0x1b   :  { %259 = vmatprep.mubr.f32.mxu1 %v1339_v3  ;;  %994 = vmatmul.mubr.msk.f32.gmra.mrb[2].mxu0 %vm60_vm0, %v1543_v19  ;;  %v1118_v48 = vld [vmem:[%s2185_s0 + $0x2d8] sm:$0xff]  ;;  %v1120_v49 = vld [vmem:[%s2185_s0 + $0x2e8] sm:$0xff]  ;;  %v1089_v51 = vld [vmem:[%s2185_s0 + $0x250] sm:$0xff]  ;;  %v1271_v57 = vpack.c.bf16 %v1090_v47, %v1088_v45 }
  0x1c   :  { %1246 = vmatpush1.bf16.msra.mxu0 %v1245_v18  ;;  %1016 = vmatmul.mubr.msk.f32.gmra.mrb[2].mxu1 %vm60_vm0, %v1543_v19  ;;  %v1117_v52 = vld [vmem:[%s2185_s0 + $0x2d0] sm:$0xff]  ;;  %v1119_v53 = vld [vmem:[%s2185_s0 + $0x2e0] sm:$0xff]  ;;  %v1092_v54 = vld [vmem:[%s2185_s0 + $0x268] sm:$0xff]  ;;  %v1287_v60 = vpack.c.bf16 %v1120_v49, %v1118_v48  ;;  %v1273_v61 = vpack.c.bf16 %v1089_v51, %v1087_v50 }
  0x1d   :  { %1262 = vmatpush1.bf16.msra.mxu1 %v1261_v20  ;;  %1248 = vmatprep.subr.bf16.mxu0 %v1247_v21  ;;  %v1094_v55 = vld [vmem:[%s2185_s0 + $0x278] sm:$0xff]  ;;  %v1073_v56 = vld [vmem:[%s2185_s0 + $0x230] sm:$0xff]  ;;  %v1124_v59 = vld [vmem:[%s2185_s0 + $0x308] sm:$0xff]  ;;  %v1289_v62 = vpack.c.bf16 %v1119_v53, %v1117_v52 }
  0x1e   :  { %1264 = vmatprep.subr.bf16.mxu1 %v1263_v25  ;;  %149 = vmatprep.mubr.f32.mxu0 %v1339_v3  ;;  %v1122_v58 = vld [vmem:[%s2185_s0 + $0x2f8] sm:$0xff]  ;;  %v1275_v63 = vpack.c.bf16 %v1094_v55, %v1092_v54  ;;  %v1091_v1 = vld [vmem:[%s2185_s0 + $0x260] sm:$0xff]  ;;  %v1093_v2 = vld [vmem:[%s2185_s0 + $0x270] sm:$0xff] }
  0x1f   :  { %265 = vmatprep.mubr.f32.mxu1 %v1339_v3  ;;  %995 = vmatmul.mubr.msk.f32.gmra.mrb[4].mxu0 %vm60_vm0, %v1578_v32  ;;  %v1121_v4 = vld [vmem:[%s2185_s0 + $0x2f0] sm:$0xff]  ;;  %v1291_v5 = vpack.c.bf16 %v1124_v59, %v1122_v58  ;;  %v1123_v6 = vld [vmem:[%s2185_s0 + $0x300] sm:$0xff]  ;;  %v1096_v7 = vld [vmem:[%s2185_s0 + $0x288] sm:$0xff]  ;;  %v1277_v11 = vpack.c.bf16 %v1093_v2, %v1091_v1 }
  0x20   :  { %1250 = vmatpush1.bf16.msra.mxu0 %v1249_v31  ;;  %1017 = vmatmul.mubr.msk.f32.gmra.mrb[4].mxu1 %vm60_vm0, %v1578_v32  ;;  %v1098_v8 = vld [vmem:[%s2185_s0 + $0x298] sm:$0xff]  ;;  %v1128_v10 = vld [vmem:[%s2185_s0 + $0x328] sm:$0xff]  ;;  %v1293_v12 = vpack.c.bf16 %v1123_v6, %v1121_v4  ;;  %v1095_v14 = vld [vmem:[%s2185_s0 + $0x280] sm:$0xff] }
  0x21   :  { %1266 = vmatpush1.bf16.msra.mxu1 %v1265_v33  ;;  %1252 = vmatprep.subr.bf16.mxu0 %v1251_v34  ;;  %v1126_v9 = vld [vmem:[%s2185_s0 + $0x318] sm:$0xff]  ;;  %v1279_v13 = vpack.c.bf16 %v1098_v8, %v1096_v7  ;;  %v1097_v15 = vld [vmem:[%s2185_s0 + $0x290] sm:$0xff]  ;;  %v1127_v18 = vld [vmem:[%s2185_s0 + $0x320] sm:$0xff] }
  0x22   :  { %1268 = vmatprep.subr.bf16.mxu1 %v1267_v37  ;;  %155 = vmatprep.mubr.f32.mxu0 %v1339_v3  ;;  %v1125_v16 = vld [vmem:[%s2185_s0 + $0x310] sm:$0xff]  ;;  %v1295_v17 = vpack.c.bf16 %v1128_v10, %v1126_v9  ;;  %v1100_v20 = vld [vmem:[%s2185_s0 + $0x2a8] sm:$0xff]  ;;  %v1102_v21 = vld [vmem:[%s2185_s0 + $0x2b8] sm:$0xff]  ;;  %v1281_v24 = vpack.c.bf16 %v1097_v15, %v1095_v14 }
  0x23   :  { %271 = vmatprep.mubr.f32.mxu1 %v1339_v3  ;;  %996 = vmatmul.mubr.msk.f32.gmra.mrb[6].mxu0 %vm60_vm0, %v1601_v41  ;;  %v1130_v22 = vld [vmem:[%s2185_s0 + $0x338] sm:$0xff]  ;;  %v1132_v23 = vld [vmem:[%s2185_s0 + $0x348] sm:$0xff]  ;;  %v1297_v25 = vpack.c.bf16 %v1127_v18, %v1125_v16  ;;  %v1283_v26 = vpack.c.bf16 %v1102_v21, %v1100_v20  ;;  %v1099_v27 = vld [vmem:[%s2185_s0 + $0x2a0] sm:$0xff] }
  0x24   :  { %1254 = vmatpush1.bf16.msra.mxu0 %v1253_v40  ;;  %1018 = vmatmul.mubr.msk.f32.gmra.mrb[6].mxu1 %vm60_vm0, %v1601_v41  ;;  %v1101_v28 = vld [vmem:[%s2185_s0 + $0x2b0] sm:$0xff]  ;;  %v1299_v29 = vpack.c.bf16 %v1132_v23, %v1130_v22  ;;  %v1131_v31 = vld [vmem:[%s2185_s0 + $0x340] sm:$0xff]  ;;  %v1104_v35 = vld [vmem:[%s2185_s0 + $0x2c8] sm:$0xff] }
  0x25   :  { %1270 = vmatpush1.bf16.msra.mxu1 %v1269_v42  ;;  %322 = vmatprep.subr.mxu0 %v1044_v43  ;;  %v1129_v30 = vld [vmem:[%s2185_s0 + $0x330] sm:$0xff]  ;;  %v1285_v33 = vpack.c.bf16 %v1101_v28, %v1099_v27  ;;  %v1134_v36 = vld [vmem:[%s2185_s0 + $0x358] sm:$0xff]  ;;  %v1148_v37 = vld [vmem:[%s2185_s0 + $0x368] sm:$0xff] }
  0x26   :  { %439 = vmatprep.subr.mxu1 %v1074_v44  ;;  %370 = vmatprep.mubr.f32.mxu0 %v1339_v3  ;;  %v1301_v34 = vpack.c.bf16 %v1131_v31, %v1129_v30  ;;  %v1150_v38 = vld [vmem:[%s2185_s0 + $0x378] sm:$0xff]  ;;  %v1103_v40 = vld [vmem:[%s2185_s0 + $0x2c0] sm:$0xff]  ;;  %v1180_v42 = vld [vmem:[%s2185_s0 + $0x408] sm:$0xff] }
  0x27   :  { %487 = vmatprep.mubr.f32.mxu1 %v1339_v3  ;;  %v1178_v39 = vld [vmem:[%s2185_s0 + $0x3f8] sm:$0xff]  ;;  %v1147_v43 = vld [vmem:[%s2185_s0 + $0x360] sm:$0xff]  ;;  %v1149_v44 = vld [vmem:[%s2185_s0 + $0x370] sm:$0xff]  ;;  %v1303_v52 = vpack.c.bf16 %v1150_v38, %v1148_v37 }
  0x28   :  { %323 = vmatpush1.msra.mxu0 %v1043_v46  ;;  %v1177_v45 = vld [vmem:[%s2185_s0 + $0x3f0] sm:$0xff]  ;;  %v1179_v46 = vld [vmem:[%s2185_s0 + $0x400] sm:$0xff]  ;;  %v1152_v48 = vld [vmem:[%s2185_s0 + $0x388] sm:$0xff]  ;;  %v1319_v55 = vpack.c.bf16 %v1180_v42, %v1178_v39 }
  0x29   :  { %440 = vmatpush1.msra.mxu1 %v1073_v56  ;;  %1045 = vmatmul.mubr.msk.f32.vlgmr.msra.gmra.mrb[8].mxu0 %vm60_vm0, %v1504_v0  ;;  %v18_v47 = vld [vmem:[%s2187_s2] sm:$0xff]  ;;  %v1154_v49 = vld [vmem:[%s2185_s0 + $0x398] sm:$0xff]  ;;  %v20_v50 = vld [vmem:[%s2187_s2 + $0x10] sm:$0xff]  ;;  %v1305_v56 = vpack.c.bf16 %v1149_v44, %v1147_v43 }
  0x2a   :  { %1075 = vmatmul.mubr.msk.f32.vlgmr.msra.gmra.mrb[8].mxu1 %vm60_vm0, %v1504_v0  ;;  %1272 = vmatprep.subr.bf16.mxu0 %v1271_v57  ;;  %v1133_v51 = vld [vmem:[%s2185_s0 + $0x350] sm:$0xff]  ;;  %v1182_v53 = vld [vmem:[%s2185_s0 + $0x418] sm:$0xff]  ;;  %v1184_v54 = vld [vmem:[%s2185_s0 + $0x428] sm:$0xff]  ;;  %v1321_v57 = vpack.c.bf16 %v1179_v46, %v1177_v45  ;;  %v1307_v58 = vpack.c.bf16 %v1154_v49, %v1152_v48 }
  0x2b   :  { %1288 = vmatprep.subr.bf16.mxu1 %v1287_v60  ;;  %1274 = vmatpush1.bf16.msra.mxu0 %v1273_v61  ;;  %v1151_v59 = vld [vmem:[%s2185_s0 + $0x380] sm:$0xff]  ;;  %v1153_v60 = vld [vmem:[%s2185_s0 + $0x390] sm:$0xff]  ;;  %v1156_v1 = vld [vmem:[%s2185_s0 + $0x3a8] sm:$0xff] }
  0x2c   :  { %1290 = vmatpush1.bf16.msra.mxu1 %v1289_v62  ;;  %1276 = vmatprep.subr.bf16.mxu0 %v1275_v63  ;;  %v1181_v61 = vld [vmem:[%s2185_s0 + $0x410] sm:$0xff]  ;;  %v1323_v62 = vpack.c.bf16 %v1184_v54, %v1182_v53  ;;  %v1183_v63 = vld [vmem:[%s2185_s0 + $0x420] sm:$0xff]  ;;  %v1158_v2 = vld [vmem:[%s2185_s0 + $0x3b8] sm:$0xff]  ;;  %v1309_v6 = vpack.c.bf16 %v1153_v60, %v1151_v59 }
  0x2d   :  { %1292 = vmatprep.subr.bf16.mxu1 %v1291_v5  ;;  %376 = vmatprep.mubr.f32.mxu0 %v1339_v3  ;;  %v1186_v4 = vld [vmem:[%s2185_s0 + $0x438] sm:$0xff]  ;;  %v1188_v5 = vld [vmem:[%s2185_s0 + $0x448] sm:$0xff]  ;;  %v1325_v7 = vpack.c.bf16 %v1183_v63, %v1181_v61  ;;  %v1311_v8 = vpack.c.bf16 %v1158_v2, %v1156_v1  ;;  %v1155_v9 = vld [vmem:[%s2185_s0 + $0x3a0] sm:$0xff] }
  0x2e   :  { %493 = vmatprep.mubr.f32.mxu1 %v1339_v3  ;;  %1046 = vmatmul.mubr.msk.f32.gmra.mrb[10].mxu0 %vm60_vm0, %v1543_v19  ;;  %v1157_v10 = vld [vmem:[%s2185_s0 + $0x3b0] sm:$0xff]  ;;  %v1160_v14 = vld [vmem:[%s2185_s0 + $0x3c8] sm:$0xff]  ;;  %v1162_v15 = vld [vmem:[%s2185_s0 + $0x3d8] sm:$0xff] }
  0x2f   :  { %1278 = vmatpush1.bf16.msra.mxu0 %v1277_v11  ;;  %1076 = vmatmul.mubr.msk.f32.gmra.mrb[10].mxu1 %vm60_vm0, %v1543_v19  ;;  %v1185_v11 = vld [vmem:[%s2185_s0 + $0x430] sm:$0xff]  ;;  %v1190_v16 = vld [vmem:[%s2185_s0 + $0x458] sm:$0xff]  ;;  %v1313_v18 = vpack.c.bf16 %v1157_v10, %v1155_v9  ;;  %v1315_v21 = vpack.c.bf16 %v1162_v15, %v1160_v14  ;;  %v1159_v22 = vld [vmem:[%s2185_s0 + $0x3c0] sm:$0xff] }
  0x30   :  { %1294 = vmatpush1.bf16.msra.mxu1 %v1293_v12  ;;  %1280 = vmatprep.subr.bf16.mxu0 %v1279_v13  ;;  %v1327_v12 = vpack.c.bf16 %v1188_v5, %v1186_v4  ;;  %v1187_v13 = vld [vmem:[%s2185_s0 + $0x440] sm:$0xff]  ;;  %v1161_v23 = vld [vmem:[%s2185_s0 + $0x3d0] sm:$0xff]  ;;  %v1194_v30 = vld [vmem:[%s2185_s0 + $0x478] sm:$0xff] }
  0x31   :  { %1296 = vmatprep.subr.bf16.mxu1 %v1295_v17  ;;  %382 = vmatprep.mubr.f32.mxu0 %v1339_v3  ;;  %v1192_v17 = vld [vmem:[%s2185_s0 + $0x468] sm:$0xff]  ;;  %v1329_v20 = vpack.c.bf16 %v1187_v13, %v1185_v11  ;;  %v1317_v27 = vpack.c.bf16 %v1161_v23, %v1159_v22 }
  0x32   :  { %499 = vmatprep.mubr.f32.mxu1 %v1339_v3  ;;  %1047 = vmatmul.mubr.msk.f32.gmra.mrb[12].mxu0 %vm60_vm0, %v1578_v32  ;;  %v19_v31 = vld [vmem:[%s2187_s2 + $0x8] sm:$0xff] }
  0x33   :  { %1282 = vmatpush1.bf16.msra.mxu0 %v1281_v24  ;;  %1077 = vmatmul.mubr.msk.f32.gmra.mrb[12].mxu1 %vm60_vm0, %v1578_v32  ;;  %v1331_v24 = vpack.c.bf16 %v1192_v17, %v1190_v16 }
  0x34   :  { %1298 = vmatpush1.bf16.msra.mxu1 %v1297_v25  ;;  %1284 = vmatprep.subr.bf16.mxu0 %v1283_v26  ;;  %v1189_v25 = vld [vmem:[%s2185_s0 + $0x450] sm:$0xff]  ;;  %v1191_v26 = vld [vmem:[%s2185_s0 + $0x460] sm:$0xff] }
  0x35   :  { %1300 = vmatprep.subr.bf16.mxu1 %v1299_v29  ;;  %388 = vmatprep.mubr.f32.mxu0 %v1339_v3  ;;  %v1333_v28 = vpack.c.bf16 %v1191_v26, %v1189_v25  ;;  %v1164_v29 = vld [vmem:[%s2185_s0 + $0x3e8] sm:$0xff] }
  0x36   :  { %505 = vmatprep.mubr.f32.mxu1 %v1339_v3  ;;  %1048 = vmatmul.mubr.msk.f32.gmra.mrb[14].mxu0 %vm60_vm0, %v1601_v41 }
  0x37   :  { %1286 = vmatpush1.bf16.msra.mxu0 %v1285_v33  ;;  %1078 = vmatmul.mubr.msk.f32.gmra.mrb[14].mxu1 %vm60_vm0, %v1601_v41  ;;  %v1163_v33 = vld [vmem:[%s2185_s0 + $0x3e0] sm:$0xff] }
  0x38   :  { %1302 = vmatpush1.bf16.msra.mxu1 %v1301_v34  ;;  %556 = vmatprep.subr.mxu0 %v1104_v35  ;;  %v21_v34 = vld [vmem:[%s2187_s2 + $0x18] sm:$0xff]  ;;  %v1193_v35 = vld [vmem:[%s2185_s0 + $0x470] sm:$0xff] }
  0x39   :  { %673 = vmatprep.subr.mxu1 %v1134_v36  ;;  %604 = vmatprep.mubr.f32.mxu0 %v1339_v3 }
  0x3a   :  { %721 = vmatprep.mubr.f32.mxu1 %v1339_v3  ;;  %42 = vperm.xlu0 %1337, %v18_v47  }
  0x3b   :  { %557 = vmatpush1.msra.mxu0 %v1103_v40  ;;  %52 = vperm.xlu1 %1338, %v20_v50  }
  0x3c   :  { %674 = vmatpush1.msra.mxu1 %v1133_v51  ;;  %1105 = vmatmul.mubr.msk.f32.vlgmr.msra.gmra.mrb[16].mxu0 %vm60_vm0, %v1504_v0 }
  0x3d   :  { %1135 = vmatmul.mubr.msk.f32.vlgmr.msra.gmra.mrb[16].mxu1 %vm60_vm0, %v1504_v0  ;;  %1304 = vmatprep.subr.bf16.mxu0 %v1303_v52 }
  0x3e   :  { %1320 = vmatprep.subr.bf16.mxu1 %v1319_v55  ;;  %1306 = vmatpush1.bf16.msra.mxu0 %v1305_v56 }
  0x3f   :  { %1322 = vmatpush1.bf16.msra.mxu1 %v1321_v57  ;;  %1308 = vmatprep.subr.bf16.mxu0 %v1307_v58 }
  0x40   :  { %1324 = vmatprep.subr.bf16.mxu1 %v1323_v62  ;;  %610 = vmatprep.mubr.f32.mxu0 %v1339_v3 }
  0x41   :  { %727 = vmatprep.mubr.f32.mxu1 %v1339_v3  ;;  %1106 = vmatmul.mubr.msk.f32.gmra.mrb[18].mxu0 %vm60_vm0, %v1543_v19 }
  0x42   :  { %1310 = vmatpush1.bf16.msra.mxu0 %v1309_v6  ;;  %1136 = vmatmul.mubr.msk.f32.gmra.mrb[18].mxu1 %vm60_vm0, %v1543_v19 }
  0x43   :  { %1326 = vmatpush1.bf16.msra.mxu1 %v1325_v7  ;;  %1312 = vmatprep.subr.bf16.mxu0 %v1311_v8 }
  0x44   :  { %1328 = vmatprep.subr.bf16.mxu1 %v1327_v12  ;;  %616 = vmatprep.mubr.f32.mxu0 %v1339_v3 }
  0x45   :  { %733 = vmatprep.mubr.f32.mxu1 %v1339_v3  ;;  %1107 = vmatmul.mubr.msk.f32.gmra.mrb[20].mxu0 %vm60_vm0, %v1578_v32 }
  0x46   :  { %1314 = vmatpush1.bf16.msra.mxu0 %v1313_v18  ;;  %1137 = vmatmul.mubr.msk.f32.gmra.mrb[20].mxu1 %vm60_vm0, %v1578_v32 }
  0x47   :  { %1330 = vmatpush1.bf16.msra.mxu1 %v1329_v20  ;;  %1316 = vmatprep.subr.bf16.mxu0 %v1315_v21 }
  0x48   :  { %1332 = vmatprep.subr.bf16.mxu1 %v1331_v24  ;;  %622 = vmatprep.mubr.f32.mxu0 %v1339_v3 }
  0x49   :  { %739 = vmatprep.mubr.f32.mxu1 %v1339_v3  ;;  %1108 = vmatmul.mubr.msk.f32.gmra.mrb[22].mxu0 %vm60_vm0, %v1601_v41 }
  0x4a   :  { %1318 = vmatpush1.bf16.msra.mxu0 %v1317_v27  ;;  %1138 = vmatmul.mubr.msk.f32.gmra.mrb[22].mxu1 %vm60_vm0, %v1601_v41 }
  0x4b   :  { %1334 = vmatpush1.bf16.msra.mxu1 %v1333_v28  ;;  %790 = vmatprep.subr.mxu0 %v1164_v29 }
  0x4c   :  { %907 = vmatprep.subr.mxu1 %v1194_v30  ;;  %838 = vmatprep.mubr.f32.mxu0 %v1339_v3 }
  0x4d   :  { %955 = vmatprep.mubr.f32.mxu1 %v1339_v3  ;;  %47 = vperm.xlu0 %1337, %v19_v31  }
  0x4e   :  { %791 = vmatpush1.msra.mxu0 %v1163_v33  ;;  %57 = vperm.xlu1 %1338, %v21_v34  }
  0x4f   :  { %908 = vmatpush1.msra.mxu1 %v1193_v35  ;;  %1165 = vmatmul.mubr.msk.f32.vlgmr.msra.gmra.mrb[24].mxu0 %vm60_vm0, %v1504_v0 }
  0x50   :  { %1195 = vmatmul.mubr.msk.f32.vlgmr.msra.gmra.mrb[24].mxu1 %vm60_vm0, %v1504_v0  ;;  %844 = vmatprep.mubr.f32.mxu0 %v1339_v3 }
  0x51   :  { %961 = vmatprep.mubr.f32.mxu1 %v1339_v3 }
  0x53   :  { %1166 = vmatmul.mubr.msk.f32.gmra.mrb[26].mxu0 %vm60_vm0, %v1543_v19 }
  0x54   :  { %1196 = vmatmul.mubr.msk.f32.gmra.mrb[26].mxu1 %vm60_vm0, %v1543_v19  ;;  %850 = vmatprep.mubr.f32.mxu0 %v1339_v3 }
  0x55   :  { %967 = vmatprep.mubr.f32.mxu1 %v1339_v3 }
  0x57   :  { %1167 = vmatmul.mubr.msk.f32.gmra.mrb[28].mxu0 %vm60_vm0, %v1578_v32 }
  0x58   :  { %1197 = vmatmul.mubr.msk.f32.gmra.mrb[28].mxu1 %vm60_vm0, %v1578_v32  ;;  %856 = vmatprep.mubr.f32.mxu0 %v1339_v3 }
  0x59   :  { %973 = vmatprep.mubr.f32.mxu1 %v1339_v3 }
  0x5b   :  { %1168 = vmatmul.mubr.msk.f32.gmra.mrb[30].mxu0 %vm60_vm0, %v1601_v41 }
  0x5c   :  { %1198 = vmatmul.mubr.msk.f32.gmra.mrb[30].mxu1 %vm60_vm0, %v1601_v41 }
  0xb9   :  { %v1921_v0 = vpop.permute.xlu0 %42 }
  0xba   :  { %v1941_v43 = vpop.permute.xlu1 %52 }
  0xcc   :  { %v1930_v42 = vpop.permute.xlu0 %47 }
  0xcd   :  { %v1962_v58 = vpop.permute.xlu1 %57 }
  0xe9   :  { %v139_v19 = vpop.f32.mrb[0].mxu0 }
  0xea   :  { %v255_v36 = vpop.f32.mrb[0].mxu1  ;;  %v140_v37 = vadd.f32 %v139_v19, %v1921_v0  ;;  %v141_v38 = vpop.f32.mrb[1].mxu0 }
  0xeb   :  { %v256_v39 = vadd.f32 %v255_v36, %v1921_v0  ;;  %v142_v32 = vadd.f32 %v141_v38, %v1921_v0  ;;  %v257_v40 = vpop.f32.mrb[1].mxu1 }
  0xec   :  { %162 = vst [vmem:[%s2188_s3] sm:$0xff] %v140_v37  ;;  %v258_v3 = vadd.f32 %v257_v40, %v1921_v0 }
  0xed   :  { %1019 = vst [vmem:[%s2188_s3 + $0x40] sm:$0xff] %v256_v39  ;;  %163 = vst [vmem:[%s2188_s3 + $0x8] sm:$0xff] %v142_v32 }
  0xee   :  { %1020 = vst [vmem:[%s2188_s3 + $0x48] sm:$0xff] %v258_v3  ;;  %v145_v41 = vpop.f32.mrb[2].mxu0 }
  0xef   :  { %v261_v44 = vpop.f32.mrb[2].mxu1  ;;  %v146_v45 = vadd.f32 %v145_v41, %v1930_v42  ;;  %v147_v46 = vpop.f32.mrb[3].mxu0 }
  0xf0   :  { %v262_v47 = vadd.f32 %v261_v44, %v1930_v42  ;;  %v148_v48 = vadd.f32 %v147_v46, %v1930_v42  ;;  %v263_v49 = vpop.f32.mrb[3].mxu1 }
  0xf1   :  { %164 = vst [vmem:[%s2188_s3 + $0x10] sm:$0xff] %v146_v45  ;;  %v264_v50 = vadd.f32 %v263_v49, %v1930_v42 }
  0xf2   :  { %1021 = vst [vmem:[%s2188_s3 + $0x50] sm:$0xff] %v262_v47  ;;  %165 = vst [vmem:[%s2188_s3 + $0x18] sm:$0xff] %v148_v48  ;;  %v151_v51 = vpop.f32.mrb[4].mxu0 }
  0xf3   :  { %1022 = vst [vmem:[%s2188_s3 + $0x58] sm:$0xff] %v264_v50  ;;  %v267_v52 = vpop.f32.mrb[4].mxu1  ;;  %v152_v53 = vadd.f32 %v151_v51, %v1941_v43  ;;  %v153_v54 = vpop.f32.mrb[5].mxu0 }
  0xf4   :  { %v268_v55 = vadd.f32 %v267_v52, %v1941_v43  ;;  %v154_v56 = vadd.f32 %v153_v54, %v1941_v43  ;;  %v269_v57 = vpop.f32.mrb[5].mxu1 }
  0xf5   :  { %166 = vst [vmem:[%s2188_s3 + $0x20] sm:$0xff] %v152_v53  ;;  %v270_v59 = vadd.f32 %v269_v57, %v1941_v43 }
  0xf6   :  { %1023 = vst [vmem:[%s2188_s3 + $0x60] sm:$0xff] %v268_v55  ;;  %167 = vst [vmem:[%s2188_s3 + $0x28] sm:$0xff] %v154_v56  ;;  %v157_v60 = vpop.f32.mrb[6].mxu0 }
  0xf7   :  { %1024 = vst [vmem:[%s2188_s3 + $0x68] sm:$0xff] %v270_v59  ;;  %v273_v61 = vpop.f32.mrb[6].mxu1  ;;  %v158_v62 = vadd.f32 %v157_v60, %v1962_v58  ;;  %v159_v63 = vpop.f32.mrb[7].mxu0 }
  0xf8   :  { %v274_v1 = vadd.f32 %v273_v61, %v1962_v58  ;;  %v160_v2 = vadd.f32 %v159_v63, %v1962_v58  ;;  %v275_v4 = vpop.f32.mrb[7].mxu1 }
  0xf9   :  { %168 = vst [vmem:[%s2188_s3 + $0x30] sm:$0xff] %v158_v62  ;;  %v276_v5 = vadd.f32 %v275_v4, %v1962_v58 }
  0xfa   :  { %1025 = vst [vmem:[%s2188_s3 + $0x70] sm:$0xff] %v274_v1  ;;  %169 = vst [vmem:[%s2188_s3 + $0x38] sm:$0xff] %v160_v2 }
  0xfb   :  { %1026 = vst [vmem:[%s2188_s3 + $0x78] sm:$0xff] %v276_v5 }
  0xfc   :  { %v372_v6 = vpop.f32.mrb[8].mxu0 }
  0xfd   :  { %v373_v7 = vadd.f32 %v372_v6, %v1921_v0  ;;  %v489_v8 = vpop.f32.mrb[8].mxu1  ;;  %v374_v9 = vpop.f32.mrb[9].mxu0 }
  0xfe   :  { %v490_v10 = vadd.f32 %v489_v8, %v1921_v0  ;;  %v375_v11 = vadd.f32 %v374_v9, %v1921_v0  ;;  %v491_v12 = vpop.f32.mrb[9].mxu1 }
  0xff   :  { %1049 = vst [vmem:[%s2188_s3 + $0x80] sm:$0xff] %v373_v7  ;;  %v492_v13 = vadd.f32 %v491_v12, %v1921_v0 }
 0x100   :  { %1079 = vst [vmem:[%s2188_s3 + $0xc0] sm:$0xff] %v490_v10  ;;  %1050 = vst [vmem:[%s2188_s3 + $0x88] sm:$0xff] %v375_v11 }
 0x101   :  { %1080 = vst [vmem:[%s2188_s3 + $0xc8] sm:$0xff] %v492_v13  ;;  %v378_v14 = vpop.f32.mrb[10].mxu0 }
 0x102   :  { %v379_v15 = vadd.f32 %v378_v14, %v1930_v42  ;;  %v495_v16 = vpop.f32.mrb[10].mxu1  ;;  %v380_v17 = vpop.f32.mrb[11].mxu0 }
 0x103   :  { %v496_v18 = vadd.f32 %v495_v16, %v1930_v42  ;;  %v381_v20 = vadd.f32 %v380_v17, %v1930_v42  ;;  %v497_v21 = vpop.f32.mrb[11].mxu1 }
 0x104   :  { %1051 = vst [vmem:[%s2188_s3 + $0x90] sm:$0xff] %v379_v15  ;;  %v498_v22 = vadd.f32 %v497_v21, %v1930_v42 }
 0x105   :  { %1081 = vst [vmem:[%s2188_s3 + $0xd0] sm:$0xff] %v496_v18  ;;  %1052 = vst [vmem:[%s2188_s3 + $0x98] sm:$0xff] %v381_v20  ;;  %v384_v23 = vpop.f32.mrb[12].mxu0 }
 0x106   :  { %1082 = vst [vmem:[%s2188_s3 + $0xd8] sm:$0xff] %v498_v22  ;;  %v385_v24 = vadd.f32 %v384_v23, %v1941_v43  ;;  %v501_v25 = vpop.f32.mrb[12].mxu1  ;;  %v386_v26 = vpop.f32.mrb[13].mxu0 }
 0x107   :  { %v502_v27 = vadd.f32 %v501_v25, %v1941_v43  ;;  %v387_v28 = vadd.f32 %v386_v26, %v1941_v43  ;;  %v503_v29 = vpop.f32.mrb[13].mxu1 }
 0x108   :  { %1053 = vst [vmem:[%s2188_s3 + $0xa0] sm:$0xff] %v385_v24  ;;  %v504_v30 = vadd.f32 %v503_v29, %v1941_v43 }
 0x109   :  { %1083 = vst [vmem:[%s2188_s3 + $0xe0] sm:$0xff] %v502_v27  ;;  %1054 = vst [vmem:[%s2188_s3 + $0xa8] sm:$0xff] %v387_v28  ;;  %v390_v31 = vpop.f32.mrb[14].mxu0 }
 0x10a   :  { %1084 = vst [vmem:[%s2188_s3 + $0xe8] sm:$0xff] %v504_v30  ;;  %v391_v33 = vadd.f32 %v390_v31, %v1962_v58  ;;  %v507_v34 = vpop.f32.mrb[14].mxu1  ;;  %v392_v35 = vpop.f32.mrb[15].mxu0 }
 0x10b   :  { %v508_v19 = vadd.f32 %v507_v34, %v1962_v58  ;;  %v393_v36 = vadd.f32 %v392_v35, %v1962_v58  ;;  %v509_v37 = vpop.f32.mrb[15].mxu1 }
 0x10c   :  { %1055 = vst [vmem:[%s2188_s3 + $0xb0] sm:$0xff] %v391_v33  ;;  %v510_v38 = vadd.f32 %v509_v37, %v1962_v58 }
 0x10d   :  { %1085 = vst [vmem:[%s2188_s3 + $0xf0] sm:$0xff] %v508_v19  ;;  %1056 = vst [vmem:[%s2188_s3 + $0xb8] sm:$0xff] %v393_v36 }
 0x10e   :  { %1086 = vst [vmem:[%s2188_s3 + $0xf8] sm:$0xff] %v510_v38 }
 0x10f   :  { %v606_v39 = vpop.f32.mrb[16].mxu0 }
 0x110   :  { %v607_v32 = vadd.f32 %v606_v39, %v1921_v0  ;;  %v723_v40 = vpop.f32.mrb[16].mxu1  ;;  %v608_v3 = vpop.f32.mrb[17].mxu0 }
 0x111   :  { %v724_v41 = vadd.f32 %v723_v40, %v1921_v0  ;;  %v609_v44 = vadd.f32 %v608_v3, %v1921_v0  ;;  %v725_v45 = vpop.f32.mrb[17].mxu1 }
 0x112   :  { %1109 = vst [vmem:[%s2188_s3 + $0x100] sm:$0xff] %v607_v32  ;;  %v726_v46 = vadd.f32 %v725_v45, %v1921_v0 }
 0x113   :  { %1139 = vst [vmem:[%s2188_s3 + $0x140] sm:$0xff] %v724_v41  ;;  %1110 = vst [vmem:[%s2188_s3 + $0x108] sm:$0xff] %v609_v44 }
 0x114   :  { %1140 = vst [vmem:[%s2188_s3 + $0x148] sm:$0xff] %v726_v46  ;;  %v612_v47 = vpop.f32.mrb[18].mxu0 }
 0x115   :  { %v613_v48 = vadd.f32 %v612_v47, %v1930_v42  ;;  %v729_v49 = vpop.f32.mrb[18].mxu1  ;;  %v614_v50 = vpop.f32.mrb[19].mxu0 }
 0x116   :  { %v730_v51 = vadd.f32 %v729_v49, %v1930_v42  ;;  %v615_v52 = vadd.f32 %v614_v50, %v1930_v42  ;;  %v731_v53 = vpop.f32.mrb[19].mxu1 }
 0x117   :  { %1111 = vst [vmem:[%s2188_s3 + $0x110] sm:$0xff] %v613_v48  ;;  %v732_v54 = vadd.f32 %v731_v53, %v1930_v42 }
 0x118   :  { %1141 = vst [vmem:[%s2188_s3 + $0x150] sm:$0xff] %v730_v51  ;;  %1112 = vst [vmem:[%s2188_s3 + $0x118] sm:$0xff] %v615_v52  ;;  %v618_v55 = vpop.f32.mrb[20].mxu0 }
 0x119   :  { %1142 = vst [vmem:[%s2188_s3 + $0x158] sm:$0xff] %v732_v54  ;;  %v619_v56 = vadd.f32 %v618_v55, %v1941_v43  ;;  %v735_v57 = vpop.f32.mrb[20].mxu1  ;;  %v620_v59 = vpop.f32.mrb[21].mxu0 }
 0x11a   :  { %v736_v60 = vadd.f32 %v735_v57, %v1941_v43  ;;  %v621_v61 = vadd.f32 %v620_v59, %v1941_v43  ;;  %v737_v62 = vpop.f32.mrb[21].mxu1 }
 0x11b   :  { %1113 = vst [vmem:[%s2188_s3 + $0x120] sm:$0xff] %v619_v56  ;;  %v738_v63 = vadd.f32 %v737_v62, %v1941_v43 }
 0x11c   :  { %1143 = vst [vmem:[%s2188_s3 + $0x160] sm:$0xff] %v736_v60  ;;  %1114 = vst [vmem:[%s2188_s3 + $0x128] sm:$0xff] %v621_v61  ;;  %v624_v1 = vpop.f32.mrb[22].mxu0 }
 0x11d   :  { %1144 = vst [vmem:[%s2188_s3 + $0x168] sm:$0xff] %v738_v63  ;;  %v625_v2 = vadd.f32 %v624_v1, %v1962_v58  ;;  %v741_v4 = vpop.f32.mrb[22].mxu1  ;;  %v626_v5 = vpop.f32.mrb[23].mxu0 }
 0x11e   :  { %v742_v6 = vadd.f32 %v741_v4, %v1962_v58  ;;  %v627_v7 = vadd.f32 %v626_v5, %v1962_v58  ;;  %v743_v8 = vpop.f32.mrb[23].mxu1 }
 0x11f   :  { %1115 = vst [vmem:[%s2188_s3 + $0x130] sm:$0xff] %v625_v2  ;;  %v744_v9 = vadd.f32 %v743_v8, %v1962_v58 }
 0x120   :  { %1145 = vst [vmem:[%s2188_s3 + $0x170] sm:$0xff] %v742_v6  ;;  %1116 = vst [vmem:[%s2188_s3 + $0x138] sm:$0xff] %v627_v7 }
 0x121   :  { %1146 = vst [vmem:[%s2188_s3 + $0x178] sm:$0xff] %v744_v9 }
 0x122   :  { %v840_v10 = vpop.f32.mrb[24].mxu0 }
 0x123   :  { %v841_v11 = vadd.f32 %v840_v10, %v1921_v0  ;;  %v957_v12 = vpop.f32.mrb[24].mxu1  ;;  %v842_v13 = vpop.f32.mrb[25].mxu0 }
 0x124   :  { %v958_v14 = vadd.f32 %v957_v12, %v1921_v0  ;;  %v843_v15 = vadd.f32 %v842_v13, %v1921_v0  ;;  %v959_v16 = vpop.f32.mrb[25].mxu1 }
 0x125   :  { %1169 = vst [vmem:[%s2188_s3 + $0x180] sm:$0xff] %v841_v11  ;;  %v960_v17 = vadd.f32 %v959_v16, %v1921_v0 }
 0x126   :  { %1199 = vst [vmem:[%s2188_s3 + $0x1c0] sm:$0xff] %v958_v14  ;;  %1170 = vst [vmem:[%s2188_s3 + $0x188] sm:$0xff] %v843_v15  ;;  %v846_v18 = vpop.f32.mrb[26].mxu0 }
 0x127   :  { %1200 = vst [vmem:[%s2188_s3 + $0x1c8] sm:$0xff] %v960_v17  ;;  %v847_v20 = vadd.f32 %v846_v18, %v1930_v42  ;;  %v963_v21 = vpop.f32.mrb[26].mxu1  ;;  %v848_v22 = vpop.f32.mrb[27].mxu0 }
 0x128   :  { %v964_v23 = vadd.f32 %v963_v21, %v1930_v42  ;;  %v849_v0 = vadd.f32 %v848_v22, %v1930_v42  ;;  %v965_v24 = vpop.f32.mrb[27].mxu1 }
 0x129   :  { %1171 = vst [vmem:[%s2188_s3 + $0x190] sm:$0xff] %v847_v20  ;;  %v966_v25 = vadd.f32 %v965_v24, %v1930_v42 }
 0x12a   :  { %1201 = vst [vmem:[%s2188_s3 + $0x1d0] sm:$0xff] %v964_v23  ;;  %1172 = vst [vmem:[%s2188_s3 + $0x198] sm:$0xff] %v849_v0  ;;  %v852_v26 = vpop.f32.mrb[28].mxu0 }
 0x12b   :  { %1202 = vst [vmem:[%s2188_s3 + $0x1d8] sm:$0xff] %v966_v25  ;;  %v853_v27 = vadd.f32 %v852_v26, %v1941_v43  ;;  %v969_v28 = vpop.f32.mrb[28].mxu1  ;;  %v854_v29 = vpop.f32.mrb[29].mxu0 }
 0x12c   :  { %v970_v30 = vadd.f32 %v969_v28, %v1941_v43  ;;  %v855_v42 = vadd.f32 %v854_v29, %v1941_v43  ;;  %v971_v31 = vpop.f32.mrb[29].mxu1 }
 0x12d   :  { %1173 = vst [vmem:[%s2188_s3 + $0x1a0] sm:$0xff] %v853_v27  ;;  %v972_v33 = vadd.f32 %v971_v31, %v1941_v43 }
 0x12e   :  { %1203 = vst [vmem:[%s2188_s3 + $0x1e0] sm:$0xff] %v970_v30  ;;  %1174 = vst [vmem:[%s2188_s3 + $0x1a8] sm:$0xff] %v855_v42  ;;  %v858_v34 = vpop.f32.mrb[30].mxu0 }
 0x12f   :  { %1204 = vst [vmem:[%s2188_s3 + $0x1e8] sm:$0xff] %v972_v33  ;;  %v859_v35 = vadd.f32 %v858_v34, %v1962_v58  ;;  %v975_v19 = vpop.f32.mrb[30].mxu1  ;;  %v860_v36 = vpop.f32.mrb[31].mxu0 }
 0x130   :  { %v976_v37 = vadd.f32 %v975_v19, %v1962_v58  ;;  %v861_v43 = vadd.f32 %v860_v36, %v1962_v58  ;;  %v977_v38 = vpop.f32.mrb[31].mxu1 }
 0x131   :  { %1175 = vst [vmem:[%s2188_s3 + $0x1b0] sm:$0xff] %v859_v35  ;;  %v978_v39 = vadd.f32 %v977_v38, %v1962_v58 }
 0x132   :  { %1205 = vst [vmem:[%s2188_s3 + $0x1f0] sm:$0xff] %v976_v37  ;;  %1176 = vst [vmem:[%s2188_s3 + $0x1b8] sm:$0xff] %v861_v43 }
 0x133   :  { %1206 = vst [vmem:[%s2188_s3 + $0x1f8] sm:$0xff] %v978_v39 }

// kernel: conv_capsule_forward.3
= control target key start
LH: loop header
LB: loop body
LE: loop exit
PB: predicated region body
PF: predicated region fallthrough
CT: control target
= control target key end

     0   :  { %s2626_s9 = smov 0   ;;  %s2628_s10 = smov 0   ;;  %s4499_s0 = inlined_call_operand.vmem [shape: f32[2,4,4,8,256], index: 0, kind: input, shape index: {}]   ;;  %s4500_s1 = inlined_call_operand.vmem [shape: f32[2,4,8,256], index: 1, kind: output, shape index: {0}]   ;;  %s4501_s2 = inlined_call_operand.vmem [shape: f32[2,1,256], index: 2, kind: output, shape index: {1}]  }
   0x1   :  { %s2630_s11 = smov 0  }
   0x2 LB: > { %s25_s12 = sadd.s32 1, %s2604_s10  ;;  %p2167_p0 = scmp.ge.s32.totalorder %s2608_s11, 1  ;;  %s2608_s11 = sphi %s2630_s11, %s13_s11   ;;  %s2604_s10 = sphi %s2628_s10, %s4738_s10   ;;  %s2600_s9 = sphi %s2626_s9, %s4737_s9  }
   0x3   : > { %p27_p1 = scmp.ge.s32.totalorder %s25_s12, 2  ;;  %p138_p2 = scmp.lt.s32.totalorder %s2608_s11, 3 }
   0x5   : > { %s4740_s12 = smov (%p27_p1, %s25_s12), 0  ;;  %p139_p3 = pnand %p2167_p0, %p138_p2 }
   0x7   : > { %142 = sbr.rel (%p139_p3) target bundleno = 544 (0x220), region = 24 }
   0xe   : > { %p177_p4 = scmp.lt.s32.totalorder %s2600_s9, 1 }
  0x10   : > { %s4742_s9 = smov (!%p177_p4, %s2600_s9), 1 }
  0x11   : > { %s2175_s13 = sshll.u32 %s4742_s9, 8  ;;  %s2176_s17 = sshll.u32 %s4742_s9, 6 }
  0x12   : > { %s2650_s16 = scalar_lea.vmem %s4499_s0, %s2175_s13  ;;  %s4341_s20 = scalar_lea.vmem %s4500_s1, %s2176_s17 }
  0x13   : > { %v2653_v0 = vld [vmem:[%s2650_s16] sm:$0xff]  ;;  %v2656_v1 = vld [vmem:[%s2650_s16 + $0x8] sm:$0xff]  ;;  %v2659_v2 = vld [vmem:[%s2650_s16 + $0x10] sm:$0xff]  ;;  %s2172_s21 = sshll.u32 %s4742_s9, 1 }
  0x14   : > { %v2662_v3 = vld [vmem:[%s2650_s16 + $0x18] sm:$0xff]  ;;  %v2665_v4 = vld [vmem:[%s2650_s16 + $0x20] sm:$0xff]  ;;  %v2668_v5 = vld [vmem:[%s2650_s16 + $0x28] sm:$0xff]  ;;  %v238_v6 = vmul.f32 0.25, %v2653_v0  ;;  %v239_v7 = vmul.f32 0.25, %v2656_v1  ;;  %v240_v8 = vmul.f32 0.25, %v2659_v2  ;;  %s203_s24 = scalar_lea.vmem %s4501_s2, %s2172_s21 }
  0x15   : > { %v2674_v9 = vld [vmem:[%s2650_s16 + $0x30] sm:$0xff]  ;;  %v2677_v10 = vld [vmem:[%s2650_s16 + $0x38] sm:$0xff]  ;;  %v2680_v11 = vld [vmem:[%s2650_s16 + $0x40] sm:$0xff]  ;;  %v241_v12 = vmul.f32 0.25, %v2662_v3  ;;  %v242_v13 = vmul.f32 0.25, %v2665_v4  ;;  %v243_v14 = vmul.f32 0.25, %v2668_v5 }
  0x16   : > { %v2686_v15 = vld [vmem:[%s2650_s16 + $0x48] sm:$0xff]  ;;  %v2689_v16 = vld [vmem:[%s2650_s16 + $0x50] sm:$0xff]  ;;  %v2692_v17 = vld [vmem:[%s2650_s16 + $0x58] sm:$0xff]  ;;  %v244_v18 = vmul.f32 0.25, %v2674_v9  ;;  %v245_v19 = vmul.f32 0.25, %v2677_v10  ;;  %v246_v20 = vmul.f32 0.25, %v2680_v11 }
  0x17   : > { %v2698_v21 = vld [vmem:[%s2650_s16 + $0x60] sm:$0xff]  ;;  %v2701_v22 = vld [vmem:[%s2650_s16 + $0x68] sm:$0xff]  ;;  %v2704_v23 = vld [vmem:[%s2650_s16 + $0x70] sm:$0xff]  ;;  %v247_v24 = vmul.f32 0.25, %v2686_v15  ;;  %v248_v25 = vmul.f32 0.25, %v2689_v16  ;;  %v249_v26 = vmul.f32 0.25, %v2692_v17 }
  0x18   : > { %v2710_v27 = vld [vmem:[%s2650_s16 + $0x78] sm:$0xff]  ;;  %v2713_v28 = vld [vmem:[%s2650_s16 + $0x80] sm:$0xff]  ;;  %v2716_v29 = vld [vmem:[%s2650_s16 + $0x88] sm:$0xff]  ;;  %v250_v30 = vmul.f32 0.25, %v2698_v21  ;;  %v251_v31 = vmul.f32 0.25, %v2701_v22  ;;  %v252_v32 = vmul.f32 0.25, %v2704_v23  ;;  %v270_v33 = vadd.f32 %v246_v20, %v238_v6 }
  0x19   : > { %v2722_v34 = vld [vmem:[%s2650_s16 + $0x90] sm:$0xff]  ;;  %v2725_v35 = vld [vmem:[%s2650_s16 + $0x98] sm:$0xff]  ;;  %v2728_v36 = vld [vmem:[%s2650_s16 + $0xa0] sm:$0xff]  ;;  %v253_v37 = vmul.f32 0.25, %v2710_v27  ;;  %v254_v38 = vmul.f32 0.25, %v2713_v28  ;;  %v255_v39 = vmul.f32 0.25, %v2716_v29  ;;  %v273_v40 = vadd.f32 %v247_v24, %v239_v7 }
  0x1a   : > { %4589 = vst [vmem:[#allocation2_spill] sm:$0xff] %v2728_v36  ;;  %v2734_v41 = vld [vmem:[%s2650_s16 + $0xa8] sm:$0xff]  ;;  %v2737_v42 = vld [vmem:[%s2650_s16 + $0xb0] sm:$0xff]  ;;  %v2740_v43 = vld [vmem:[%s2650_s16 + $0xb8] sm:$0xff]  ;;  %v256_v44 = vmul.f32 0.25, %v2722_v34  ;;  %v257_v45 = vmul.f32 0.25, %v2725_v35  ;;  %v276_v47 = vadd.f32 %v248_v25, %v240_v8 }
  0x1b   : > { %4590 = vst [vmem:[#allocation3_spill] sm:$0xff] %v2734_v41  ;;  %4591 = vst [vmem:[#allocation4_spill] sm:$0xff] %v2737_v42  ;;  %v258_v46 = vmul.f32 0.25, %v2728_v36  ;;  %v2746_v48 = vld [vmem:[%s2650_s16 + $0xc0] sm:$0xff]  ;;  %v2749_v49 = vld [vmem:[%s2650_s16 + $0xc8] sm:$0xff]  ;;  %v259_v51 = vmul.f32 0.25, %v2734_v41  ;;  %v271_v54 = vadd.f32 %v270_v33, %v254_v38  ;;  %v274_v61 = vadd.f32 %v273_v40, %v255_v39 }
  0x1c   : > { %4592 = vst [vmem:[#allocation5_spill] sm:$0xff] %v2740_v43  ;;  %4593 = vst [vmem:[#allocation6_spill] sm:$0xff] %v2746_v48  ;;  %v2752_v50 = vld [vmem:[%s2650_s16 + $0xd0] sm:$0xff]  ;;  %v260_v52 = vmul.f32 0.25, %v2737_v42  ;;  %v261_v53 = vmul.f32 0.25, %v2740_v43  ;;  %v2758_v55 = vld [vmem:[%s2650_s16 + $0xd8] sm:$0xff]  ;;  %v277_v20 = vadd.f32 %v276_v47, %v256_v44  ;;  %v279_v40 = vadd.f32 %v249_v26, %v241_v12 }
  0x1d   : > { %4594 = vst [vmem:[#allocation7_spill] sm:$0xff] %v2749_v49  ;;  %4595 = vst [vmem:[#allocation8_spill] sm:$0xff] %v2752_v50  ;;  %v2761_v56 = vld [vmem:[%s2650_s16 + $0xe0] sm:$0xff]  ;;  %v2764_v57 = vld [vmem:[%s2650_s16 + $0xe8] sm:$0xff]  ;;  %v262_v58 = vmul.f32 0.25, %v2746_v48  ;;  %v263_v59 = vmul.f32 0.25, %v2749_v49  ;;  %v285_v49 = vadd.f32 %v251_v31, %v243_v14  ;;  %v288_v48 = vadd.f32 %v252_v32, %v244_v18 }
  0x1e   : > { %4596 = vst [vmem:[#allocation9_spill] sm:$0xff] %v2758_v55  ;;  %4597 = vst [vmem:[#allocation10_spill] sm:$0xff] %v2761_v56  ;;  %v264_v60 = vmul.f32 0.25, %v2752_v50  ;;  %v2770_v62 = vld [vmem:[%s2650_s16 + $0xf0] sm:$0xff]  ;;  %v2773_v63 = vld [vmem:[%s2650_s16 + $0xf8] sm:$0xff]  ;;  %v265_v6 = vmul.f32 0.25, %v2758_v55  ;;  %v282_v50 = vadd.f32 %v250_v30, %v242_v13  ;;  %v291_v55 = vadd.f32 %v253_v37, %v245_v19 }
  0x1f   : > { %4598 = vst [vmem:[#allocation11_spill] sm:$0xff] %v2764_v57  ;;  %4599 = vst [vmem:[#allocation12_spill] sm:$0xff] %v2770_v62  ;;  %v266_v7 = vmul.f32 0.25, %v2761_v56  ;;  %v267_v8 = vmul.f32 0.25, %v2764_v57  ;;  %v268_v24 = vmul.f32 0.25, %v2770_v62  ;;  %v269_v25 = vmul.f32 0.25, %v2773_v63 }
  0x20   : > { %4600 = vst [vmem:[#allocation13_spill] sm:$0xff] %v2773_v63  ;;  %v2780_v33 = vadd.f32 %v271_v54, %v262_v58  ;;  %v2782_v38 = vadd.f32 %v274_v61, %v263_v59  ;;  %v2784_v39 = vadd.f32 %v277_v20, %v264_v60  ;;  %v280_v47 = vadd.f32 %v279_v40, %v257_v45 }
  0x21   : > { %v283_v62 = vadd.f32 %v282_v50, %v258_v46  ;;  %v286_v63 = vadd.f32 %v285_v49, %v259_v51  ;;  %v289_v58 = vadd.f32 %v288_v48, %v260_v52  ;;  %v292_v59 = vadd.f32 %v291_v55, %v261_v53 }
  0x22   : > { %v294_v56 = vmul.f32 %v2780_v33, %v2780_v33  ;;  %v295_v44 = vmul.f32 %v2782_v38, %v2782_v38  ;;  %v296_v54 = vmul.f32 %v2784_v39, %v2784_v39  ;;  %v2792_v13 = vadd.f32 %v280_v47, %v265_v6 }
  0x23   : > { %v2794_v14 = vadd.f32 %v283_v62, %v266_v7  ;;  %v2796_v18 = vadd.f32 %v286_v63, %v267_v8  ;;  %v2798_v26 = vadd.f32 %v289_v58, %v268_v24  ;;  %v2800_v30 = vadd.f32 %v292_v59, %v269_v25 }
  0x24   : > { %v302_v60 = vrot.slane %v294_v56, 4  ;;  %v308_v12 = vrot.slane %v295_v44, 4  ;;  %v314_v19 = vrot.slane %v296_v54, 4  ;;  %v297_v37 = vmul.f32 %v2792_v13, %v2792_v13 }
  0x25   : > { %v298_v45 = vmul.f32 %v2794_v14, %v2794_v14  ;;  %v299_v46 = vmul.f32 %v2796_v18, %v2796_v18  ;;  %v300_v49 = vmul.f32 %v2798_v26, %v2798_v26  ;;  %v301_v50 = vmul.f32 %v2800_v30, %v2800_v30 }
  0x26   : > { %v303_v31 = vadd.f32 %v302_v60, %v294_v56  ;;  %v309_v32 = vadd.f32 %v308_v12, %v295_v44  ;;  %v315_v48 = vadd.f32 %v314_v19, %v296_v54  ;;  %v320_v55 = vrot.slane %v297_v37, 4 }
  0x27   : > { %v326_v56 = vrot.slane %v298_v45, 4  ;;  %v332_v61 = vrot.slane %v299_v46, 4  ;;  %v338_v6 = vrot.slane %v300_v49, 4  ;;  %v344_v7 = vrot.slane %v301_v50, 4 }
  0x28   : > { %v304_v51 = vrot.slane %v303_v31, 2  ;;  %v310_v52 = vrot.slane %v309_v32, 2  ;;  %v316_v53 = vrot.slane %v315_v48, 2  ;;  %v321_v20 = vadd.f32 %v320_v55, %v297_v37 }
  0x29   : > { %v327_v24 = vadd.f32 %v326_v56, %v298_v45  ;;  %v333_v25 = vadd.f32 %v332_v61, %v299_v46  ;;  %v339_v47 = vadd.f32 %v338_v6, %v300_v49  ;;  %v345_v54 = vadd.f32 %v344_v7, %v301_v50 }
  0x2a   : > { %v305_v62 = vadd.f32 %v304_v51, %v303_v31  ;;  %v311_v63 = vadd.f32 %v310_v52, %v309_v32  ;;  %v317_v8 = vadd.f32 %v316_v53, %v315_v48  ;;  %v322_v59 = vrot.slane %v321_v20, 2 }
  0x2b   : > { %v328_v60 = vrot.slane %v327_v24, 2  ;;  %v334_v12 = vrot.slane %v333_v25, 2  ;;  %v340_v31 = vrot.slane %v339_v47, 2  ;;  %v346_v32 = vrot.slane %v345_v54, 2 }
  0x2c   : > { %v306_v40 = vrot.slane %v305_v62, 1  ;;  %v312_v44 = vrot.slane %v311_v63, 1  ;;  %v318_v58 = vrot.slane %v317_v8, 1  ;;  %v323_v51 = vadd.f32 %v322_v59, %v321_v20 }
  0x2d   : > { %v329_v52 = vadd.f32 %v328_v60, %v327_v24  ;;  %v335_v48 = vadd.f32 %v334_v12, %v333_v25  ;;  %v341_v37 = vadd.f32 %v340_v31, %v339_v47  ;;  %v347_v45 = vadd.f32 %v346_v32, %v345_v54 }
  0x2e   : > { %v2812_v19 = vadd.f32 %v306_v40, %v305_v62  ;;  %v2814_v57 = vadd.f32 %v312_v44, %v311_v63  ;;  %v2817_v46 = vadd.f32 %v318_v58, %v317_v8  ;;  %v324_v49 = vrot.slane %v323_v51, 1 }
  0x2f   : > { %v330_v50 = vrot.slane %v329_v52, 1  ;;  %v336_v53 = vrot.slane %v335_v48, 1  ;;  %v342_v55 = vrot.slane %v341_v37, 1  ;;  %v348_v56 = vrot.slane %v347_v45, 1 }
  0x30   : > { %2202 = vrsqrt.f32 %v2812_v19  ;;  %v2820_v61 = vadd.f32 %v324_v49, %v323_v51  ;;  %vm352_vm0 = vcmp.eq.f32.partialorder %v2812_v19, inf  ;;  %vm354_vm1 = vcmp.eq.f32.partialorder %v2812_v19, 0.0 }
  0x31   : > { %2204 = vrsqrt.f32 %v2814_v57  ;;  %v2822_v62 = vadd.f32 %v330_v50, %v329_v52  ;;  %v2824_v63 = vadd.f32 %v336_v53, %v335_v48  ;;  %v2826_v6 = vadd.f32 %v342_v55, %v341_v37 }
  0x32   : > { %2206 = vrsqrt.f32 %v2817_v46  ;;  %v2829_v7 = vadd.f32 %v348_v56, %v347_v45  ;;  %v355_v8 = vand.u32 2147483648, %v2812_v19  ;;  %vm359_vm2 = vcmp.eq.f32.partialorder %v2814_v57, inf }
  0x33   : > { %2208 = vrsqrt.f32 %v2820_v61  ;;  %vm361_vm3 = vcmp.eq.f32.partialorder %v2814_v57, 0.0  ;;  %v362_v20 = vand.u32 2147483648, %v2814_v57  ;;  %vm366_vm4 = vcmp.eq.f32.partialorder %v2817_v46, inf }
  0x34   : > { %2210 = vrsqrt.f32 %v2822_v62  ;;  %vm368_vm5 = vcmp.eq.f32.partialorder %v2817_v46, 0.0  ;;  %v369_v25 = vand.u32 2147483648, %v2817_v46  ;;  %vm373_vm6 = vcmp.eq.f32.partialorder %v2820_v61, inf }
  0x35   : > { %2212 = vrsqrt.f32 %v2824_v63  ;;  %vm375_vm7 = vcmp.eq.f32.partialorder %v2820_v61, 0.0  ;;  %v376_v44 = vand.u32 2147483648, %v2820_v61  ;;  %vm380_vm8 = vcmp.eq.f32.partialorder %v2822_v62, inf }
  0x36   : > { %2214 = vrsqrt.f32 %v2826_v6  ;;  %vm382_vm9 = vcmp.eq.f32.partialorder %v2822_v62, 0.0  ;;  %v383_v54 = vand.u32 2147483648, %v2822_v62  ;;  %vm387_vm10 = vcmp.eq.f32.partialorder %v2824_v63, inf }
  0x37   : > { %2216 = vrsqrt.f32 %v2829_v7  ;;  %vm389_vm11 = vcmp.eq.f32.partialorder %v2824_v63, 0.0  ;;  %v390_v60 = vand.u32 2147483648, %v2824_v63  ;;  %vm394_vm12 = vcmp.eq.f32.partialorder %v2826_v6, inf }
  0x38   : > { %vm396_vm13 = vcmp.eq.f32.partialorder %v2826_v6, 0.0  ;;  %v397_v12 = vand.u32 2147483648, %v2826_v6  ;;  %vm401_vm14 = vcmp.eq.f32.partialorder %v2829_v7, inf  ;;  %vm403_vm15 = vcmp.eq.f32.partialorder %v2829_v7, 0.0 }
  0x39   : > { %v404_v52 = vand.u32 2147483648, %v2829_v7  ;;  %v406_v49 = vadd.f32 1.0, %v2812_v19  ;;  %v407_v50 = vadd.f32 1.0, %v2814_v57  ;;  %v408_v56 = vadd.f32 1.0, %v2817_v46 }
  0x3a   : > { %v2203_v24 = vpop.eup %2202 }
  0x3b   : > { %v351_v40 = vmul.f32 %v2203_v24, %v2812_v19  ;;  %v2205_v47 = vpop.eup %2204  ;;  %v410_v24 = vadd.f32 1.0, %v2822_v62 }
  0x3c   : > { %v358_v59 = vmul.f32 %v2205_v47, %v2814_v57  ;;  %v2207_v31 = vpop.eup %2206 }
  0x3d   : > { %v353_v58 = vsel %vm352_vm0, %v2812_v19, %v351_v40  ;;  %v2209_v48 = vpop.eup %2208  ;;  %v365_v45 = vmul.f32 %v2207_v31, %v2817_v46 }
  0x3e   : > { %v356_v32 = vsel %vm354_vm1, %v355_v8, %v353_v58  ;;  %v360_v51 = vsel %vm359_vm2, %v2814_v57, %v358_v59  ;;  %v2211_v53 = vpop.eup %2210  ;;  %v372_v55 = vmul.f32 %v2209_v48, %v2820_v61  ;;  %v409_v8 = vadd.f32 1.0, %v2820_v61 }
  0x3f   : > { %v363_v37 = vsel %vm361_vm3, %v362_v20, %v360_v51  ;;  %v2213_v40 = vpop.eup %2212  ;;  %v367_v20 = vsel %vm366_vm4, %v2817_v46, %v365_v45  ;;  %v379_v47 = vmul.f32 %v2211_v53, %v2822_v62  ;;  %v411_v58 = vadd.f32 1.0, %v2824_v63 }
  0x40   : > { %v414_v59 = vadd.f32 1e-08, %v356_v32  ;;  %v2215_v31 = vpop.eup %2214  ;;  %v370_v51 = vsel %vm368_vm5, %v369_v25, %v367_v20  ;;  %v374_v48 = vsel %vm373_vm6, %v2820_v61, %v372_v55  ;;  %v386_v43 = vmul.f32 %v2213_v40, %v2824_v63 }
  0x41   : > { %v415_v42 = vadd.f32 1e-08, %v363_v37  ;;  %v2217_v41 = vpop.eup %2216  ;;  %v377_v45 = vsel %vm375_vm7, %v376_v44, %v374_v48  ;;  %v381_v53 = vsel %vm380_vm8, %v2822_v62, %v379_v47  ;;  %v393_v32 = vmul.f32 %v2215_v31, %v2826_v6 }
  0x42   : > { %v416_v36 = vadd.f32 1e-08, %v370_v51  ;;  %v384_v25 = vsel %vm382_vm9, %v383_v54, %v381_v53  ;;  %v388_v55 = vsel %vm387_vm10, %v2824_v63, %v386_v43  ;;  %v400_v37 = vmul.f32 %v2217_v41, %v2829_v7 }
  0x43   : > { %v417_v40 = vadd.f32 1e-08, %v377_v45  ;;  %v391_v44 = vsel %vm389_vm11, %v390_v60, %v388_v55  ;;  %v395_v20 = vsel %vm394_vm12, %v2826_v6, %v393_v32  ;;  %v418_v47 = vadd.f32 1e-08, %v384_v25 }
  0x44   : > { %v422_v31 = vmul.f32 %v414_v59, %v406_v49  ;;  %v398_v51 = vsel %vm396_vm13, %v397_v12, %v395_v20  ;;  %v402_v54 = vsel %vm401_vm14, %v2829_v7, %v400_v37  ;;  %v419_v43 = vadd.f32 1e-08, %v391_v44 }
  0x45   : > { %v423_v48 = vmul.f32 %v415_v42, %v407_v50  ;;  %v405_v41 = vsel %vm403_vm15, %v404_v52, %v402_v54  ;;  %v412_v60 = vadd.f32 1.0, %v2826_v6  ;;  %v420_v45 = vadd.f32 1e-08, %v398_v51 }
  0x46   : > { %v424_v53 = vmul.f32 %v416_v36, %v408_v56  ;;  %v413_v32 = vadd.f32 1.0, %v2829_v7  ;;  %v421_v25 = vadd.f32 1e-08, %v405_v41  ;;  %v425_v49 = vmul.f32 %v417_v40, %v409_v8 }
  0x47   : > { %v426_v59 = vmul.f32 %v418_v47, %v410_v24  ;;  %2218 = vrcp.f32 %v422_v31  ;;  %v427_v12 = vmul.f32 %v419_v43, %v411_v58  ;;  %v428_v55 = vmul.f32 %v420_v45, %v412_v60 }
  0x48   : > { %2220 = vrcp.f32 %v423_v48  ;;  %v429_v37 = vmul.f32 %v421_v25, %v413_v32 }
  0x49   : > { %2222 = vrcp.f32 %v424_v53 }
  0x4a   : > { %2224 = vrcp.f32 %v425_v49  ;;  %v4602_v49 = vld [vmem:[#allocation3_spill] sm:$0xff] }
  0x4b   : > { %2226 = vrcp.f32 %v426_v59 }
  0x4c   : > { %2228 = vrcp.f32 %v427_v12  ;;  %v4603_v12 = vld [vmem:[#allocation4_spill] sm:$0xff] }
  0x4d   : > { %2230 = vrcp.f32 %v428_v55  ;;  %v4604_v55 = vld [vmem:[#allocation5_spill] sm:$0xff] }
  0x4e   : > { %2232 = vrcp.f32 %v429_v37 }
  0x51   : > { %v2219_v42 = vpop.eup %2218 }
  0x52   : > { %v2221_v52 = vpop.eup %2220  ;;  %v438_v8 = vmul.f32 %v2219_v42, %v2812_v19 }
  0x53   : > { %v2223_v50 = vpop.eup %2222  ;;  %v439_v24 = vmul.f32 %v2221_v52, %v2814_v57  ;;  %v4605_v52 = vld [vmem:[#allocation6_spill] sm:$0xff] }
  0x54   : > { %v2225_v36 = vpop.eup %2224  ;;  %v440_v20 = vmul.f32 %v2223_v50, %v2817_v46  ;;  %v446_v43 = vmul.f32 %v438_v8, %v2780_v33  ;;  %v4607_v8 = vld [vmem:[#allocation8_spill] sm:$0xff] }
  0x55   : > { %v2227_v56 = vpop.eup %2226  ;;  %v441_v47 = vmul.f32 %v2225_v36, %v2820_v61  ;;  %v447_v48 = vmul.f32 %v439_v24, %v2782_v38  ;;  %v4606_v36 = vld [vmem:[#allocation7_spill] sm:$0xff] }
  0x56   : > { %v2229_v44 = vpop.eup %2228  ;;  %v442_v31 = vmul.f32 %v2227_v56, %v2822_v62  ;;  %v448_v57 = vmul.f32 %v440_v20, %v2784_v39  ;;  %v2983_v50 = vmul.f32 %v446_v43, %v4605_v52 }
  0x57   : > { %v2231_v58 = vpop.eup %2230  ;;  %v443_v51 = vmul.f32 %v2229_v44, %v2824_v63  ;;  %v449_v41 = vmul.f32 %v441_v47, %v2792_v13  ;;  %v454_v63 = vmul.f32 %v446_v43, %v2653_v0  ;;  %v4608_v47 = vld [vmem:[#allocation9_spill] sm:$0xff] }
  0x58   : > { %v2233_v40 = vpop.eup %2232  ;;  %v444_v54 = vmul.f32 %v2231_v58, %v2826_v6  ;;  %v450_v46 = vmul.f32 %v442_v31, %v2794_v14  ;;  %v455_v6 = vmul.f32 %v447_v48, %v2656_v1  ;;  %v456_v38 = vmul.f32 %v448_v57, %v2659_v2 }
  0x59   : > { %v445_v19 = vmul.f32 %v2233_v40, %v2829_v7  ;;  %v451_v61 = vmul.f32 %v443_v51, %v2796_v18  ;;  %v457_v7 = vmul.f32 %v449_v41, %v2662_v3  ;;  %v462_v14 = vmul.f32 %v446_v43, %v2680_v11  ;;  %v4609_v51 = vld [vmem:[#allocation10_spill] sm:$0xff] }
  0x5a   : > { %v452_v62 = vmul.f32 %v444_v54, %v2798_v26  ;;  %v458_v39 = vmul.f32 %v450_v46, %v2665_v4  ;;  %v463_v18 = vmul.f32 %v447_v48, %v2686_v15  ;;  %v2942_v0 = vmul.f32 %v448_v57, %v2689_v16 }
  0x5b   : > { %v453_v33 = vmul.f32 %v445_v19, %v2800_v30  ;;  %v459_v13 = vmul.f32 %v451_v61, %v2668_v5  ;;  %v486_v1 = vrot.slane %v454_v63, 4  ;;  %v492_v60 = vrot.slane %v455_v6, 4  ;;  %v4610_v19 = vld [vmem:[#allocation11_spill] sm:$0xff] }
  0x5c   : > { %v460_v26 = vmul.f32 %v452_v62, %v2674_v9  ;;  %v2946_v2 = vmul.f32 %v449_v41, %v2692_v17  ;;  %v2949_v3 = vmul.f32 %v450_v46, %v2698_v21  ;;  %v2952_v4 = vmul.f32 %v446_v43, %v2713_v28 }
  0x5d   : > { %v461_v30 = vmul.f32 %v453_v33, %v2677_v10  ;;  %v2955_v5 = vmul.f32 %v451_v61, %v2701_v22  ;;  %v2958_v9 = vmul.f32 %v447_v48, %v2716_v29  ;;  %v498_v11 = vrot.slane %v456_v38, 4  ;;  %v4601_v29 = vld [vmem:[#allocation2_spill] sm:$0xff] }
  0x5e   : > { %v504_v15 = vrot.slane %v457_v7, 4  ;;  %v2961_v16 = vmul.f32 %v452_v62, %v2704_v23  ;;  %v2964_v10 = vmul.f32 %v448_v57, %v2722_v34  ;;  %v510_v17 = vrot.slane %v458_v39, 4 }
  0x5f   : > { %v516_v21 = vrot.slane %v459_v13, 4  ;;  %v2967_v45 = vmul.f32 %v449_v41, %v2725_v35  ;;  %v487_v28 = vadd.f32 %v486_v1, %v454_v63  ;;  %v493_v53 = vadd.f32 %v492_v60, %v455_v6 }
  0x60   : > { %v522_v22 = vrot.slane %v460_v26, 4  ;;  %v469_v32 = vmul.f32 %v453_v33, %v2710_v27  ;;  %v2971_v25 = vmul.f32 %v450_v46, %v4601_v29  ;;  %v2974_v59 = vmul.f32 %v451_v61, %v4602_v49 }
  0x61   : > { %v528_v23 = vrot.slane %v461_v30, 4  ;;  %v2977_v34 = vmul.f32 %v452_v62, %v4603_v12  ;;  %v2980_v37 = vmul.f32 %v453_v33, %v4604_v55  ;;  %v499_v35 = vadd.f32 %v498_v11, %v456_v38 }
  0x62   : > { %v505_v42 = vadd.f32 %v504_v15, %v457_v7  ;;  %v2986_v27 = vmul.f32 %v447_v48, %v4606_v36  ;;  %v511_v56 = vadd.f32 %v510_v17, %v458_v39  ;;  %v517_v44 = vadd.f32 %v516_v21, %v459_v13  ;;  %v4611_v39 = vld [vmem:[#allocation12_spill] sm:$0xff]  ;;  %v4612_v13 = vld [vmem:[#allocation13_spill] sm:$0xff] }
  0x63   : > { %v2989_v24 = vmul.f32 %v448_v57, %v4607_v8  ;;  %v488_v58 = vrot.slane %v487_v28, 2  ;;  %v494_v40 = vrot.slane %v493_v53, 2  ;;  %v523_v20 = vadd.f32 %v522_v22, %v460_v26 }
  0x64   : > { %v2992_v31 = vmul.f32 %v449_v41, %v4608_v47  ;;  %v2995_v54 = vmul.f32 %v450_v46, %v4609_v51  ;;  %v2998_v43 = vmul.f32 %v451_v61, %v4610_v19  ;;  %v529_v63 = vadd.f32 %v528_v23, %v461_v30 }
  0x65   : > { %v500_v48 = vrot.slane %v499_v35, 2  ;;  %v506_v6 = vrot.slane %v505_v42, 2  ;;  %v534_v38 = vrot.slane %v462_v14, 4  ;;  %v540_v7 = vrot.slane %v463_v18, 4 }
  0x66   : > { %v3001_v57 = vmul.f32 %v452_v62, %v4611_v39  ;;  %v3004_v1 = vmul.f32 %v453_v33, %v4612_v13  ;;  %v512_v26 = vrot.slane %v511_v56, 2  ;;  %v518_v41 = vrot.slane %v517_v44, 2 }
  0x67   : > { %v489_v60 = vadd.f32 %v488_v58, %v487_v28  ;;  %v495_v11 = vadd.f32 %v494_v40, %v493_v53  ;;  %v524_v46 = vrot.slane %v523_v20, 2  ;;  %v546_v15 = vrot.slane %v2942_v0, 4 }
  0x68   : > { %v530_v61 = vrot.slane %v529_v63, 2  ;;  %v552_v30 = vrot.slane %v2946_v2, 4  ;;  %v558_v17 = vrot.slane %v2949_v3, 4  ;;  %v564_v21 = vrot.slane %v2955_v5, 4 }
  0x69   : > { %v501_v22 = vadd.f32 %v500_v48, %v499_v35  ;;  %v507_v62 = vadd.f32 %v506_v6, %v505_v42  ;;  %v535_v29 = vadd.f32 %v534_v38, %v462_v14  ;;  %v541_v49 = vadd.f32 %v540_v7, %v463_v18 }
  0x6a   : > { %v513_v33 = vadd.f32 %v512_v26, %v511_v56  ;;  %v519_v23 = vadd.f32 %v518_v41, %v517_v44  ;;  %v570_v12 = vrot.slane %v2961_v16, 4  ;;  %v576_v28 = vrot.slane %v469_v32, 4 }
  0x6b   : > { %v490_v53 = vrot.slane %v489_v60, 1  ;;  %v496_v55 = vrot.slane %v495_v11, 1  ;;  %v525_v52 = vadd.f32 %v524_v46, %v523_v20  ;;  %v547_v36 = vadd.f32 %v546_v15, %v2942_v0 }
  0x6c   : > { %v531_v8 = vadd.f32 %v530_v61, %v529_v63  ;;  %v553_v58 = vadd.f32 %v552_v30, %v2946_v2  ;;  %v559_v40 = vadd.f32 %v558_v17, %v2949_v3  ;;  %v565_v35 = vadd.f32 %v564_v21, %v2955_v5 }
  0x6d   : > { %v502_v42 = vrot.slane %v501_v22, 1  ;;  %v508_v14 = vrot.slane %v507_v62, 1  ;;  %v536_v18 = vrot.slane %v535_v29, 2  ;;  %v542_v56 = vrot.slane %v541_v49, 2 }
  0x6e   : > { %v514_v44 = vrot.slane %v513_v33, 1  ;;  %v520_v47 = vrot.slane %v519_v23, 1  ;;  %v571_v51 = vadd.f32 %v570_v12, %v2961_v16  ;;  %v577_v19 = vadd.f32 %v576_v28, %v469_v32 }
  0x6f   : > { %v3016_v48 = vadd.f32 %v490_v53, %v489_v60  ;;  %v3018_v20 = vadd.f32 %v496_v55, %v495_v11  ;;  %v526_v0 = vrot.slane %v525_v52, 1  ;;  %v548_v63 = vrot.slane %v547_v36, 2 }
  0x70   : > { %v532_v2 = vrot.slane %v531_v8, 1  ;;  %v554_v6 = vrot.slane %v553_v58, 2  ;;  %v560_v3 = vrot.slane %v559_v40, 2  ;;  %v566_v38 = vrot.slane %v565_v35, 2 }
  0x71   : > { %4613 = vst [vmem:[#allocation2_spill] sm:$0xff] %v3016_v48  ;;  %4614 = vst [vmem:[#allocation3_spill] sm:$0xff] %v3018_v20  ;;  %v3020_v5 = vadd.f32 %v502_v42, %v501_v22  ;;  %v3022_v7 = vadd.f32 %v508_v14, %v507_v62  ;;  %v537_v39 = vadd.f32 %v536_v18, %v535_v29  ;;  %v572_v32 = vrot.slane %v571_v51, 2 }
  0x72   : > { %v543_v13 = vadd.f32 %v542_v56, %v541_v49  ;;  %v3024_v26 = vadd.f32 %v514_v44, %v513_v33  ;;  %v3026_v16 = vadd.f32 %v520_v47, %v519_v23  ;;  %v578_v41 = vrot.slane %v577_v19, 2 }
  0x73   : > { %4615 = vst [vmem:[#allocation4_spill] sm:$0xff] %v3020_v5  ;;  %4616 = vst [vmem:[#allocation5_spill] sm:$0xff] %v3022_v7  ;;  %v3028_v60 = vadd.f32 %v526_v0, %v525_v52  ;;  %v549_v11 = vadd.f32 %v548_v63, %v547_v36  ;;  %v582_v46 = vrot.slane %v2952_v4, 4  ;;  %v588_v15 = vrot.slane %v2958_v9, 4 }
  0x74   : > { %4617 = vst [vmem:[#allocation6_spill] sm:$0xff] %v3024_v26  ;;  %4618 = vst [vmem:[#allocation7_spill] sm:$0xff] %v3026_v16  ;;  %v3032_v61 = vadd.f32 %v532_v2, %v531_v8  ;;  %v555_v30 = vadd.f32 %v554_v6, %v553_v58  ;;  %v561_v17 = vadd.f32 %v560_v3, %v559_v40  ;;  %v538_v22 = vrot.slane %v537_v39, 1 }
  0x75   : > { %4619 = vst [vmem:[#allocation8_spill] sm:$0xff] %v3028_v60  ;;  %v567_v21 = vadd.f32 %v566_v38, %v565_v35  ;;  %v544_v62 = vrot.slane %v543_v13, 1  ;;  %v594_v29 = vrot.slane %v2964_v10, 4  ;;  %v600_v49 = vrot.slane %v2967_v45, 4 }
  0x76   : > { %4620 = vst [vmem:[#allocation9_spill] sm:$0xff] %v3032_v61  ;;  %v573_v33 = vadd.f32 %v572_v32, %v571_v51  ;;  %v579_v23 = vadd.f32 %v578_v41, %v577_v19  ;;  %v606_v12 = vrot.slane %v2971_v25, 4  ;;  %v612_v28 = vrot.slane %v2974_v59, 4 }
  0x77   : > { %v550_v53 = vrot.slane %v549_v11, 1  ;;  %v583_v55 = vadd.f32 %v582_v46, %v2952_v4  ;;  %v589_v52 = vadd.f32 %v588_v15, %v2958_v9  ;;  %v618_v36 = vrot.slane %v2977_v34, 4 }
  0x78   : > { %v556_v8 = vrot.slane %v555_v30, 1  ;;  %v562_v58 = vrot.slane %v561_v17, 1  ;;  %v568_v40 = vrot.slane %v567_v21, 1  ;;  %v624_v35 = vrot.slane %v2980_v37, 4 }
  0x79   : > { %v3042_v42 = vadd.f32 %v538_v22, %v537_v39  ;;  %v3044_v14 = vadd.f32 %v544_v62, %v543_v13  ;;  %v595_v18 = vadd.f32 %v594_v29, %v2964_v10  ;;  %v601_v56 = vadd.f32 %v600_v49, %v2967_v45 }
  0x7a   : > { %v574_v44 = vrot.slane %v573_v33, 1  ;;  %v580_v47 = vrot.slane %v579_v23, 1  ;;  %v607_v4 = vadd.f32 %v606_v12, %v2971_v25  ;;  %v613_v9 = vadd.f32 %v612_v28, %v2974_v59 }
  0x7b   : > { %4621 = vst [vmem:[#allocation10_spill] sm:$0xff] %v3042_v42  ;;  %4622 = vst [vmem:[#allocation11_spill] sm:$0xff] %v3044_v14  ;;  %v3050_v51 = vadd.f32 %v550_v53, %v549_v11  ;;  %v584_v19 = vrot.slane %v583_v55, 2  ;;  %v590_v0 = vrot.slane %v589_v52, 2  ;;  %v619_v63 = vadd.f32 %v618_v36, %v2977_v34 }
  0x7c   : > { %v3053_v2 = vadd.f32 %v556_v8, %v555_v30  ;;  %v3055_v6 = vadd.f32 %v562_v58, %v561_v17  ;;  %v3057_v3 = vadd.f32 %v568_v40, %v567_v21  ;;  %v625_v10 = vadd.f32 %v624_v35, %v2980_v37 }
  0x7d   : > { %4623 = vst [vmem:[#allocation12_spill] sm:$0xff] %v3050_v51  ;;  %v596_v45 = vrot.slane %v595_v18, 2  ;;  %v602_v38 = vrot.slane %v601_v56, 2  ;;  %v630_v25 = vrot.slane %v2983_v50, 4  ;;  %v636_v59 = vrot.slane %v2986_v27, 4 }
  0x7e   : > { %4624 = vst [vmem:[#allocation13_spill] sm:$0xff] %v3053_v2  ;;  %4625 = vst [vmem:[#allocation14_spill] sm:$0xff] %v3055_v6  ;;  %v3062_v39 = vadd.f32 %v574_v44, %v573_v33  ;;  %v3064_v13 = vadd.f32 %v580_v47, %v579_v23  ;;  %v608_v32 = vrot.slane %v607_v4, 2  ;;  %v614_v34 = vrot.slane %v613_v9, 2 }
  0x7f   : > { %4626 = vst [vmem:[#allocation15_spill] sm:$0xff] %v3057_v3  ;;  %v585_v41 = vadd.f32 %v584_v19, %v583_v55  ;;  %v591_v11 = vadd.f32 %v590_v0, %v589_v52  ;;  %v620_v46 = vrot.slane %v619_v63, 2  ;;  %v642_v15 = vrot.slane %v2989_v24, 4 }
  0x80   : > { %4627 = vst [vmem:[#allocation16_spill] sm:$0xff] %v3062_v39  ;;  %4628 = vst [vmem:[#allocation17_spill] sm:$0xff] %v3064_v13  ;;  %v626_v30 = vrot.slane %v625_v10, 2  ;;  %v648_v37 = vrot.slane %v2992_v31, 4  ;;  %v654_v17 = vrot.slane %v2995_v54, 4  ;;  %v660_v21 = vrot.slane %v2998_v43, 4 }
  0x81   : > { %v597_v22 = vadd.f32 %v596_v45, %v595_v18  ;;  %v603_v62 = vadd.f32 %v602_v38, %v601_v56  ;;  %v631_v29 = vadd.f32 %v630_v25, %v2983_v50  ;;  %v637_v49 = vadd.f32 %v636_v59, %v2986_v27 }
  0x82   : > { %v609_v33 = vadd.f32 %v608_v32, %v607_v4  ;;  %v615_v23 = vadd.f32 %v614_v34, %v613_v9  ;;  %v666_v12 = vrot.slane %v3001_v57, 4  ;;  %v672_v28 = vrot.slane %v3004_v1, 4 }
  0x83   : > { %v586_v53 = vrot.slane %v585_v41, 1  ;;  %v592_v55 = vrot.slane %v591_v11, 1  ;;  %v621_v52 = vadd.f32 %v620_v46, %v619_v63  ;;  %v643_v36 = vadd.f32 %v642_v15, %v2989_v24 }
  0x84   : > { %v627_v8 = vadd.f32 %v626_v30, %v625_v10  ;;  %v649_v58 = vadd.f32 %v648_v37, %v2992_v31  ;;  %v655_v40 = vadd.f32 %v654_v17, %v2995_v54  ;;  %v661_v50 = vadd.f32 %v660_v21, %v2998_v43 }
  0x85   : > { %v598_v35 = vrot.slane %v597_v22, 1  ;;  %v604_v27 = vrot.slane %v603_v62, 1  ;;  %v632_v18 = vrot.slane %v631_v29, 2  ;;  %v638_v56 = vrot.slane %v637_v49, 2 }
  0x86   : > { %v610_v44 = vrot.slane %v609_v33, 1  ;;  %v616_v47 = vrot.slane %v615_v23, 1  ;;  %v667_v4 = vadd.f32 %v666_v12, %v3001_v57  ;;  %v673_v9 = vadd.f32 %v672_v28, %v3004_v1 }
  0x87   : > { %v3080_v19 = vadd.f32 %v586_v53, %v585_v41  ;;  %v644_v24 = vrot.slane %v643_v36, 2  ;;  %v710_v31 = vmax.f32 %v3016_v48, %v3020_v5  ;;  %v713_v54 = vmax.f32 %v3018_v20, %v3022_v7 }
  0x88   : > { %v3086_v43 = vadd.f32 %v592_v55, %v591_v11  ;;  %v650_v0 = vrot.slane %v649_v58, 2  ;;  %v656_v63 = vrot.slane %v655_v40, 2  ;;  %v662_v10 = vrot.slane %v661_v50, 2 }
  0x89   : > { %4629 = vst [vmem:[#allocation18_spill] sm:$0xff] %v3080_v19  ;;  %v633_v45 = vadd.f32 %v632_v18, %v631_v29  ;;  %v639_v38 = vadd.f32 %v638_v56, %v637_v49  ;;  %v711_v57 = vmax.f32 %v710_v31, %v3024_v26  ;;  %v714_v1 = vmax.f32 %v713_v54, %v3026_v16 }
  0x8a   : > { %4630 = vst [vmem:[#allocation19_spill] sm:$0xff] %v3086_v43  ;;  %v622_v25 = vrot.slane %v621_v52, 1  ;;  %v628_v59 = vrot.slane %v627_v8, 1  ;;  %v668_v32 = vrot.slane %v667_v4, 2  ;;  %v674_v34 = vrot.slane %v673_v9, 2 }
  0x8b   : > { %v3090_v41 = vadd.f32 %v598_v35, %v597_v22  ;;  %v3092_v46 = vadd.f32 %v604_v27, %v603_v62  ;;  %v645_v15 = vadd.f32 %v644_v24, %v643_v36  ;;  %v716_v11 = vmax.f32 %v3042_v42, %v3050_v51 }
  0x8c   : > { %v651_v30 = vadd.f32 %v650_v0, %v649_v58  ;;  %v657_v37 = vadd.f32 %v656_v63, %v655_v40  ;;  %v663_v17 = vadd.f32 %v662_v10, %v661_v50  ;;  %v719_v21 = vmax.f32 %v3044_v14, %v3053_v2 }
  0x8d   : > { %4631 = vst [vmem:[#allocation20_spill] sm:$0xff] %v3090_v41  ;;  %4632 = vst [vmem:[#allocation21_spill] sm:$0xff] %v3092_v46  ;;  %v634_v29 = vrot.slane %v633_v45, 1  ;;  %v640_v49 = vrot.slane %v639_v38, 1  ;;  %v712_v12 = vmax.f32 %v711_v57, %v3028_v60  ;;  %v715_v28 = vmax.f32 %v714_v1, %v3032_v61 }
  0x8e   : > { %v3100_v22 = vadd.f32 %v610_v44, %v609_v33  ;;  %v3102_v62 = vadd.f32 %v616_v47, %v615_v23  ;;  %v669_v53 = vadd.f32 %v668_v32, %v667_v4  ;;  %v675_v55 = vadd.f32 %v674_v34, %v673_v9 }
  0x8f   : > { %v3104_v36 = vadd.f32 %v622_v25, %v621_v52  ;;  %v3106_v58 = vadd.f32 %v628_v59, %v627_v8  ;;  %v646_v40 = vrot.slane %v645_v15, 1  ;;  %v717_v50 = vmax.f32 %v716_v11, %v3055_v6 }
  0x90   : > { %4633 = vst [vmem:[#allocation22_spill] sm:$0xff] %v3100_v22  ;;  %4634 = vst [vmem:[#allocation23_spill] sm:$0xff] %v3102_v62  ;;  %v652_v35 = vrot.slane %v651_v30, 1  ;;  %v658_v27 = vrot.slane %v657_v37, 1  ;;  %v664_v18 = vrot.slane %v663_v17, 1  ;;  %v720_v56 = vmax.f32 %v719_v21, %v3057_v3 }
  0x91   : > { %4635 = vst [vmem:[#allocation24_spill] sm:$0xff] %v3104_v36  ;;  %4636 = vst [vmem:[#allocation25_spill] sm:$0xff] %v3106_v58  ;;  %v3110_v24 = vadd.f32 %v634_v29, %v633_v45  ;;  %v3112_v33 = vadd.f32 %v640_v49, %v639_v38  ;;  %v734_v23 = vsub.f32 %v3016_v48, %v712_v12  ;;  %v670_v52 = vrot.slane %v669_v53, 1  ;;  %v3415_v48 = vld [vmem:[%s2650_s16 + $0xd0] sm:$0xff] }
  0x92   : > { %v735_v44 = vsub.f32 %v3018_v20, %v715_v28  ;;  %v676_v47 = vrot.slane %v675_v55, 1  ;;  %v736_v8 = vsub.f32 %v3020_v5, %v712_v12  ;;  %v737_v4 = vsub.f32 %v3022_v7, %v715_v28  ;;  %v3383_v7 = vld [vmem:[%s2650_s16 + $0x90] sm:$0xff]  ;;  %4652 = vst [vmem:[#allocation41_spill] sm:$0xff] %v3415_v48 }
  0x93   : > { %4637 = vst [vmem:[#allocation26_spill] sm:$0xff] %v3110_v24  ;;  %4638 = vst [vmem:[#allocation27_spill] sm:$0xff] %v3112_v33  ;;  %v3118_v9 = vadd.f32 %v646_v40, %v645_v15  ;;  %v718_v31 = vmax.f32 %v717_v50, %v3062_v39  ;;  %v722_v54 = vmax.f32 %v3080_v19, %v3090_v41  ;;  %v766_v25 = vmul.f32 1.442695, %v734_v23 }
  0x94   : > { %v738_v0 = vsub.f32 %v3024_v26, %v712_v12  ;;  %v3124_v63 = vadd.f32 %v652_v35, %v651_v30  ;;  %v721_v10 = vmax.f32 %v720_v56, %v3064_v13  ;;  %v725_v45 = vmax.f32 %v3086_v43, %v3092_v46 }
  0x95   : > { %4639 = vst [vmem:[#allocation28_spill] sm:$0xff] %v3118_v9  ;;  %v739_v38 = vsub.f32 %v3026_v16, %v715_v28  ;;  %v3130_v57 = vadd.f32 %v658_v27, %v657_v37  ;;  %v740_v1 = vsub.f32 %v3028_v60, %v712_v12  ;;  %v768_v59 = vmul.f32 1.442695, %v735_v44  ;;  %v3363_v60 = vld [vmem:[%s2650_s16 + $0x78] sm:$0xff] }
  0x96   : > { %4640 = vst [vmem:[#allocation29_spill] sm:$0xff] %v3124_v63  ;;  %v3133_v32 = vadd.f32 %v664_v18, %v663_v17  ;;  %v741_v34 = vsub.f32 %v3032_v61, %v715_v28  ;;  %v770_v15 = vmul.f32 1.442695, %v736_v8  ;;  %v772_v11 = vmul.f32 1.442695, %v737_v4  ;;  %v3359_v61 = vld [vmem:[%s2650_s16 + $0x70] sm:$0xff] }
  0x97   : > { %4641 = vst [vmem:[#allocation30_spill] sm:$0xff] %v3130_v57  ;;  %v723_v30 = vmax.f32 %v722_v54, %v3100_v22  ;;  %v742_v21 = vsub.f32 %v3042_v42, %v718_v31  ;;  %2234 = vpow2.f32 %v766_v25  ;;  %v774_v29 = vmul.f32 1.442695, %v738_v0 }
  0x98   : > { %4642 = vst [vmem:[#allocation31_spill] sm:$0xff] %v3133_v32  ;;  %v726_v49 = vmax.f32 %v725_v45, %v3102_v62  ;;  %v743_v37 = vsub.f32 %v3044_v14, %v721_v10  ;;  %2236 = vpow2.f32 %v768_v59  ;;  %v776_v12 = vmul.f32 1.442695, %v739_v38 }
  0x99   : > { %v728_v17 = vmax.f32 %v3110_v24, %v3118_v9  ;;  %v744_v40 = vsub.f32 %v3050_v51, %v718_v31  ;;  %2238 = vpow2.f32 %v770_v15  ;;  %v778_v28 = vmul.f32 1.442695, %v740_v1 }
  0x9a   : > { %v731_v50 = vmax.f32 %v3112_v33, %v3124_v63  ;;  %v745_v35 = vsub.f32 %v3053_v2, %v721_v10  ;;  %2240 = vpow2.f32 %v772_v11  ;;  %v780_v27 = vmul.f32 1.442695, %v741_v34 }
  0x9b   : > { %v724_v18 = vmax.f32 %v723_v30, %v3104_v36  ;;  %v746_v56 = vsub.f32 %v3055_v6, %v718_v31  ;;  %2242 = vpow2.f32 %v774_v29  ;;  %v782_v23 = vmul.f32 1.442695, %v742_v21 }
  0x9c   : > { %v727_v44 = vmax.f32 %v726_v49, %v3106_v58  ;;  %v747_v8 = vsub.f32 %v3057_v3, %v721_v10  ;;  %2244 = vpow2.f32 %v776_v12  ;;  %v784_v4 = vmul.f32 1.442695, %v743_v37  ;;  %v3355_v3 = vld [vmem:[%s2650_s16 + $0x68] sm:$0xff] }
  0x9d   : > { %v3150_v54 = vadd.f32 %v670_v52, %v669_v53  ;;  %v748_v0 = vsub.f32 %v3062_v39, %v718_v31  ;;  %2246 = vpow2.f32 %v778_v28  ;;  %v786_v45 = vmul.f32 1.442695, %v744_v40 }
  0x9e   : > { %v3153_v38 = vadd.f32 %v676_v47, %v675_v55  ;;  %v749_v1 = vsub.f32 %v3064_v13, %v721_v10  ;;  %2248 = vpow2.f32 %v780_v27  ;;  %v788_v25 = vmul.f32 1.442695, %v745_v35  ;;  %v3351_v13 = vld [vmem:[%s2650_s16 + $0x60] sm:$0xff] }
  0x9f   : > { %4643 = vst [vmem:[#allocation32_spill] sm:$0xff] %v3150_v54  ;;  %v729_v59 = vmax.f32 %v728_v17, %v3130_v57  ;;  %v750_v34 = vsub.f32 %v3080_v19, %v724_v18  ;;  %2250 = vpow2.f32 %v782_v23  ;;  %v790_v15 = vmul.f32 1.442695, %v746_v56  ;;  %v3347_v19 = vld [vmem:[%s2650_s16 + $0x58] sm:$0xff] }
  0xa0   : > { %4644 = vst [vmem:[#allocation33_spill] sm:$0xff] %v3153_v38  ;;  %v732_v11 = vmax.f32 %v731_v50, %v3133_v32  ;;  %v751_v53 = vsub.f32 %v3086_v43, %v727_v44  ;;  %2252 = vpow2.f32 %v784_v4  ;;  %v792_v52 = vmul.f32 1.442695, %v747_v8  ;;  %v3343_v43 = vld [vmem:[%s2650_s16 + $0x50] sm:$0xff] }
  0xa1   : > { %v3160_v31 = vpop.eup %2234  ;;  %v752_v55 = vsub.f32 %v3090_v41, %v724_v18  ;;  %2254 = vpow2.f32 %v786_v45  ;;  %v794_v47 = vmul.f32 1.442695, %v748_v0  ;;  %v753_v30 = vsub.f32 %v3092_v46, %v727_v44 }
  0xa2   : > { %v3163_v10 = vpop.eup %2236  ;;  %2256 = vpow2.f32 %v788_v25  ;;  %v796_v21 = vmul.f32 1.442695, %v749_v1  ;;  %v3169_v49 = vmax.f32 %v729_v59, %v3150_v54  ;;  %v754_v37 = vsub.f32 %v3100_v22, %v724_v18 }
  0xa3   : > { %v3166_v29 = vpop.eup %2238  ;;  %2258 = vpow2.f32 %v790_v15  ;;  %v798_v12 = vmul.f32 1.442695, %v750_v34  ;;  %v733_v40 = vmax.f32 %v732_v11, %v3153_v38  ;;  %v755_v28 = vsub.f32 %v3102_v62, %v727_v44 }
  0xa4   : > { %v3172_v17 = vpop.eup %2240  ;;  %2260 = vpow2.f32 %v792_v52  ;;  %v800_v50 = vmul.f32 1.442695, %v751_v53  ;;  %v756_v27 = vsub.f32 %v3104_v36, %v724_v18  ;;  %v802_v56 = vmul.f32 1.442695, %v752_v55 }
  0xa5   : > { %v3176_v35 = vpop.eup %2242  ;;  %2262 = vpow2.f32 %v794_v47  ;;  %v757_v8 = vsub.f32 %v3106_v58, %v727_v44  ;;  %v804_v4 = vmul.f32 1.442695, %v753_v30  ;;  %v758_v45 = vsub.f32 %v3110_v24, %v3169_v49 }
  0xa6   : > { %v3179_v23 = vpop.eup %2244  ;;  %2264 = vpow2.f32 %v796_v21  ;;  %v806_v1 = vmul.f32 1.442695, %v754_v37  ;;  %v759_v59 = vsub.f32 %v3112_v33, %v733_v40  ;;  %v808_v18 = vmul.f32 1.442695, %v755_v28 }
  0xa7   : > { %v3182_v0 = vpop.eup %2246  ;;  %2266 = vpow2.f32 %v798_v12  ;;  %v760_v44 = vsub.f32 %v3118_v9, %v3169_v49  ;;  %v810_v15 = vmul.f32 1.442695, %v756_v27  ;;  %v761_v53 = vsub.f32 %v3124_v63, %v733_v40 }
  0xa8   : > { %v3186_v25 = vpop.eup %2248  ;;  %2268 = vpow2.f32 %v800_v50  ;;  %v812_v52 = vmul.f32 1.442695, %v757_v8  ;;  %v762_v47 = vsub.f32 %v3130_v57, %v3169_v49  ;;  %v814_v30 = vmul.f32 1.442695, %v758_v45 }
  0xa9   : > { %v3189_v34 = vpop.eup %2250  ;;  %2270 = vpow2.f32 %v802_v56  ;;  %v830_v21 = vadd.f32 %v3166_v29, %v3160_v31  ;;  %v763_v12 = vsub.f32 %v3133_v32, %v733_v40  ;;  %v816_v28 = vmul.f32 1.442695, %v759_v59 }
  0xaa   : > { %v3193_v11 = vpop.eup %2252  ;;  %2272 = vpow2.f32 %v804_v4  ;;  %v833_v50 = vadd.f32 %v3172_v17, %v3163_v10  ;;  %v764_v56 = vsub.f32 %v3150_v54, %v3169_v49  ;;  %v818_v8 = vmul.f32 1.442695, %v760_v44 }
  0xab   : > { %v3196_v55 = vpop.eup %2254  ;;  %2274 = vpow2.f32 %v806_v1  ;;  %v765_v1 = vsub.f32 %v3153_v38, %v733_v40  ;;  %v822_v57 = vmul.f32 1.442695, %v762_v47  ;;  %v831_v49 = vadd.f32 %v3176_v35, %v830_v21 }
  0xac   : > { %v3202_v37 = vpop.eup %2256  ;;  %2276 = vpow2.f32 %v808_v18  ;;  %v836_v4 = vadd.f32 %v3196_v55, %v3189_v34  ;;  %v820_v18 = vmul.f32 1.442695, %v761_v53  ;;  %v824_v44 = vmul.f32 1.442695, %v763_v12 }
  0xad   : > { %v3207_v27 = vpop.eup %2258  ;;  %2278 = vpow2.f32 %v810_v15  ;;  %v839_v59 = vadd.f32 %v3202_v37, %v3193_v11  ;;  %v834_v54 = vadd.f32 %v3179_v23, %v833_v50  ;;  %v826_v40 = vmul.f32 1.442695, %v764_v56 }
  0xae   : > { %v3213_v45 = vpop.eup %2260  ;;  %2280 = vpow2.f32 %v812_v52  ;;  %v837_v53 = vadd.f32 %v3207_v27, %v836_v4  ;;  %v828_v38 = vmul.f32 1.442695, %v765_v1  ;;  %v832_v21 = vadd.f32 %v3182_v0, %v831_v49 }
  0xaf   : > { %v3218_v32 = vpop.eup %2262  ;;  %2282 = vpow2.f32 %v814_v30  ;;  %v840_v47 = vadd.f32 %v3213_v45, %v839_v59 }
  0xb0   : > { %v3221_v15 = vpop.eup %2264  ;;  %2284 = vpow2.f32 %v816_v28  ;;  %v835_v28 = vadd.f32 %v3186_v25, %v834_v54 }
  0xb1   : > { %v3224_v63 = vpop.eup %2266  ;;  %2286 = vpow2.f32 %v818_v8  ;;  %v838_v8 = vadd.f32 %v3218_v32, %v837_v53 }
  0xb2   : > { %v3227_v52 = vpop.eup %2268  ;;  %2288 = vpow2.f32 %v820_v18 }
  0xb3   : > { %v3230_v30 = vpop.eup %2270  ;;  %2290 = vpow2.f32 %v822_v57  ;;  %v841_v57 = vadd.f32 %v3221_v15, %v840_v47 }
  0xb4   : > { %v3233_v12 = vpop.eup %2272  ;;  %2292 = vpow2.f32 %v824_v44  ;;  %v842_v50 = vadd.f32 %v3230_v30, %v3224_v63 }
  0xb5   : > { %v2275_v56 = vpop.eup %2274  ;;  %2294 = vpow2.f32 %v826_v40  ;;  %v845_v4 = vadd.f32 %v3233_v12, %v3227_v52 }
  0xb6   : > { %v2277_v1 = vpop.eup %2276  ;;  %2296 = vpow2.f32 %v828_v38  ;;  %v843_v18 = vadd.f32 %v2275_v56, %v842_v50 }
  0xb7   : > { %v2279_v59 = vpop.eup %2278  ;;  %v846_v49 = vadd.f32 %v2277_v1, %v845_v4  ;;  %2298 = vrcp.f32 %v832_v21 }
  0xb8   : > { %v2281_v44 = vpop.eup %2280  ;;  %v844_v54 = vadd.f32 %v2279_v59, %v843_v18  ;;  %2300 = vrcp.f32 %v835_v28 }
  0xb9   : > { %v3242_v9 = vpop.eup %2282  ;;  %v847_v33 = vadd.f32 %v2281_v44, %v846_v49  ;;  %2302 = vrcp.f32 %v838_v8 }
  0xba   : > { %v3244_v40 = vpop.eup %2284  ;;  %2304 = vrcp.f32 %v841_v57 }
  0xbb   : > { %v3246_v53 = vpop.eup %2286  ;;  %2306 = vrcp.f32 %v844_v54 }
  0xbc   : > { %v3248_v38 = vpop.eup %2288  ;;  %v848_v47 = vadd.f32 %v3246_v53, %v3242_v9  ;;  %2308 = vrcp.f32 %v847_v33 }
  0xbd   : > { %v3252_v21 = vpop.eup %2290  ;;  %v851_v28 = vadd.f32 %v3248_v38, %v3244_v40 }
  0xbe   : > { %v3256_v50 = vpop.eup %2292  ;;  %v849_v8 = vadd.f32 %v3252_v21, %v848_v47 }
  0xbf   : > { %v3259_v4 = vpop.eup %2294  ;;  %v852_v57 = vadd.f32 %v3256_v50, %v851_v28 }
  0xc0   : > { %v3262_v18 = vpop.eup %2296  ;;  %v850_v49 = vadd.f32 %v3259_v4, %v849_v8 }
  0xc1   : > { %v2299_v54 = vpop.eup %2298  ;;  %v853_v33 = vadd.f32 %v3262_v18, %v852_v57 }
  0xc2   : > { %v2301_v24 = vpop.eup %2300  ;;  %2310 = vrcp.f32 %v850_v49  ;;  %v862_v58 = vmul.f32 %v2299_v54, %v3160_v31  ;;  %v864_v36 = vmul.f32 %v2299_v54, %v3166_v29  ;;  %v866_v62 = vmul.f32 %v2299_v54, %v3176_v35 }
  0xc3   : > { %v2303_v47 = vpop.eup %2302  ;;  %2312 = vrcp.f32 %v853_v33  ;;  %v863_v22 = vmul.f32 %v2301_v24, %v3163_v10  ;;  %v865_v28 = vmul.f32 %v2301_v24, %v3172_v17  ;;  %v867_v46 = vmul.f32 %v2301_v24, %v3179_v23 }
  0xc4   : > { %v2305_v8 = vpop.eup %2304  ;;  %v868_v41 = vmul.f32 %v2299_v54, %v3182_v0  ;;  %v869_v57 = vmul.f32 %v2301_v24, %v3186_v25  ;;  %v870_v49 = vmul.f32 %v2303_v47, %v3189_v34  ;;  %v872_v31 = vmul.f32 %v2303_v47, %v3196_v55 }
  0xc5   : > { %v2307_v29 = vpop.eup %2306  ;;  %v871_v35 = vmul.f32 %v2305_v8, %v3193_v11  ;;  %v873_v33 = vmul.f32 %v2305_v8, %v3202_v37  ;;  %v874_v10 = vmul.f32 %v2303_v47, %v3207_v27  ;;  %v875_v17 = vmul.f32 %v2305_v8, %v3213_v45 }
  0xc6   : > { %v2309_v23 = vpop.eup %2308  ;;  %v876_v0 = vmul.f32 %v2303_v47, %v3218_v32  ;;  %v877_v24 = vmul.f32 %v2305_v8, %v3221_v15  ;;  %v878_v25 = vmul.f32 %v2307_v29, %v3224_v63  ;;  %v880_v34 = vmul.f32 %v2307_v29, %v3230_v30  ;;  %v3287_v32 = vld [vmem:[%s2650_s16] sm:$0xff]  ;;  %v3293_v63 = vld [vmem:[%s2650_s16 + $0x8] sm:$0xff]  ;;  %v3299_v30 = vld [vmem:[%s2650_s16 + $0x10] sm:$0xff] }
  0xc7   : > { %v879_v11 = vmul.f32 %v2309_v23, %v3227_v52  ;;  %v881_v55 = vmul.f32 %v2309_v23, %v3233_v12  ;;  %v882_v37 = vmul.f32 %v2307_v29, %v2275_v56  ;;  %v883_v27 = vmul.f32 %v2309_v23, %v2277_v1  ;;  %v3305_v56 = vld [vmem:[%s2650_s16 + $0x18] sm:$0xff] }
  0xc8   : > { %v884_v45 = vmul.f32 %v2307_v29, %v2279_v59  ;;  %v885_v54 = vmul.f32 %v2309_v23, %v2281_v44  ;;  %v3290_v15 = vmul.f32 %v3287_v32, %v862_v58  ;;  %v3296_v52 = vmul.f32 %v3293_v63, %v863_v22  ;;  %v3311_v58 = vld [vmem:[%s2650_s16 + $0x20] sm:$0xff]  ;;  %v3317_v22 = vld [vmem:[%s2650_s16 + $0x28] sm:$0xff] }
  0xc9   : > { %v3302_v12 = vmul.f32 %v3299_v30, %v864_v36  ;;  %v3308_v1 = vmul.f32 %v3305_v56, %v865_v28  ;;  %v3314_v59 = vmul.f32 %v3311_v58, %v866_v62  ;;  %v3320_v44 = vmul.f32 %v3317_v22, %v867_v46  ;;  %v3323_v36 = vld [vmem:[%s2650_s16 + $0x30] sm:$0xff]  ;;  %v3329_v28 = vld [vmem:[%s2650_s16 + $0x38] sm:$0xff]  ;;  %v3335_v62 = vld [vmem:[%s2650_s16 + $0x40] sm:$0xff] }
  0xca   : > { %v3326_v47 = vmul.f32 %v3323_v36, %v868_v41  ;;  %v3332_v8 = vmul.f32 %v3329_v28, %v869_v57  ;;  %v902_v29 = vmul.f32 %v3335_v62, %v870_v49  ;;  %v3339_v23 = vld [vmem:[%s2650_s16 + $0x48] sm:$0xff]  ;;  %v904_v41 = vmul.f32 %v3343_v43, %v872_v31 }
  0xcb   : > { %v903_v46 = vmul.f32 %v3339_v23, %v871_v35  ;;  %v905_v57 = vmul.f32 %v3347_v19, %v873_v33  ;;  %v906_v39 = vmul.f32 %v3351_v13, %v874_v10  ;;  %v907_v49 = vmul.f32 %v3355_v3, %v875_v17  ;;  %v3367_v33 = vld [vmem:[%s2650_s16 + $0x80] sm:$0xff]  ;;  %v3371_v10 = vld [vmem:[%s2650_s16 + $0x88] sm:$0xff] }
  0xcc   : > { %v2311_v6 = vpop.eup %2310  ;;  %v908_v35 = vmul.f32 %v3359_v61, %v876_v0  ;;  %v909_v31 = vmul.f32 %v3363_v60, %v877_v24  ;;  %v910_v2 = vmul.f32 %v3367_v33, %v878_v25  ;;  %v911_v17 = vmul.f32 %v3371_v10, %v879_v11 }
  0xcd   : > { %v2313_v14 = vpop.eup %2312  ;;  %v886_v51 = vmul.f32 %v2311_v6, %v3242_v9  ;;  %v888_v0 = vmul.f32 %v2311_v6, %v3246_v53  ;;  %v890_v42 = vmul.f32 %v2311_v6, %v3252_v21  ;;  %v892_v24 = vmul.f32 %v2311_v6, %v3259_v4  ;;  %v3387_v53 = vld [vmem:[%s2650_s16 + $0x98] sm:$0xff]  ;;  %v3391_v21 = vld [vmem:[%s2650_s16 + $0xa0] sm:$0xff] }
  0xce   : > { %v887_v16 = vmul.f32 %v2313_v14, %v3244_v40  ;;  %v889_v25 = vmul.f32 %v2313_v14, %v3248_v38  ;;  %v891_v26 = vmul.f32 %v2313_v14, %v3256_v50  ;;  %v893_v11 = vmul.f32 %v2313_v14, %v3262_v18  ;;  %4645 = vst [vmem:[#allocation34_spill] sm:$0xff] %v3387_v53  ;;  %v3395_v38 = vld [vmem:[%s2650_s16 + $0xa8] sm:$0xff]  ;;  %v3399_v50 = vld [vmem:[%s2650_s16 + $0xb0] sm:$0xff]  ;;  %v3403_v18 = vld [vmem:[%s2650_s16 + $0xb8] sm:$0xff] }
  0xcf   : > { %v912_v9 = vmul.f32 %v3383_v7, %v880_v34  ;;  %v913_v6 = vmul.f32 %v3387_v53, %v881_v55  ;;  %4646 = vst [vmem:[#allocation35_spill] sm:$0xff] %v3391_v21  ;;  %v914_v40 = vmul.f32 %v3391_v21, %v882_v37  ;;  %4647 = vst [vmem:[#allocation36_spill] sm:$0xff] %v3395_v38  ;;  %v3407_v55 = vld [vmem:[%s2650_s16 + $0xc0] sm:$0xff]  ;;  %v3411_v37 = vld [vmem:[%s2650_s16 + $0xc8] sm:$0xff] }
  0xd0   : > { %v915_v14 = vmul.f32 %v3395_v38, %v883_v27  ;;  %4648 = vst [vmem:[#allocation37_spill] sm:$0xff] %v3399_v50  ;;  %v916_v4 = vmul.f32 %v3399_v50, %v884_v45  ;;  %4649 = vst [vmem:[#allocation38_spill] sm:$0xff] %v3403_v18  ;;  %v917_v34 = vmul.f32 %v3403_v18, %v885_v54  ;;  %v3419_v38 = vld [vmem:[%s2650_s16 + $0xd8] sm:$0xff]  ;;  %v3423_v50 = vld [vmem:[%s2650_s16 + $0xe0] sm:$0xff] }
  0xd1   : > { %4650 = vst [vmem:[#allocation39_spill] sm:$0xff] %v3407_v55  ;;  %v918_v5 = vmul.f32 %v3407_v55, %v886_v51  ;;  %4651 = vst [vmem:[#allocation40_spill] sm:$0xff] %v3411_v37  ;;  %v919_v20 = vmul.f32 %v3411_v37, %v887_v16  ;;  %v920_v27 = vmul.f32 %v3415_v48, %v888_v0  ;;  %v3427_v18 = vld [vmem:[%s2650_s16 + $0xe8] sm:$0xff]  ;;  %v3431_v55 = vld [vmem:[%s2650_s16 + $0xf0] sm:$0xff] }
  0xd2   : > { %4653 = vst [vmem:[#allocation42_spill] sm:$0xff] %v3419_v38  ;;  %v921_v45 = vmul.f32 %v3419_v38, %v889_v25  ;;  %4654 = vst [vmem:[#allocation43_spill] sm:$0xff] %v3423_v50  ;;  %v922_v54 = vmul.f32 %v3423_v50, %v890_v42  ;;  %v923_v51 = vmul.f32 %v3427_v18, %v891_v26  ;;  %v3435_v37 = vld [vmem:[%s2650_s16 + $0xf8] sm:$0xff] }
  0xd3   : > { %4655 = vst [vmem:[#allocation44_spill] sm:$0xff] %v3427_v18  ;;  %4656 = vst [vmem:[#allocation45_spill] sm:$0xff] %v3431_v55  ;;  %v924_v16 = vmul.f32 %v3431_v55, %v892_v24  ;;  %v925_v0 = vmul.f32 %v3435_v37, %v893_v11  ;;  %v926_v48 = vadd.f32 %v902_v29, %v3290_v15 }
  0xd4   : > { %4657 = vst [vmem:[#allocation46_spill] sm:$0xff] %v3435_v37  ;;  %v929_v25 = vadd.f32 %v903_v46, %v3296_v52  ;;  %v932_v38 = vadd.f32 %v904_v41, %v3302_v12  ;;  %v935_v42 = vadd.f32 %v905_v57, %v3308_v1  ;;  %v938_v50 = vadd.f32 %v906_v39, %v3314_v59 }
  0xd5   : > { %v941_v26 = vadd.f32 %v907_v49, %v3320_v44  ;;  %v927_v18 = vadd.f32 %v926_v48, %v910_v2  ;;  %v944_v24 = vadd.f32 %v908_v35, %v3326_v47  ;;  %v947_v55 = vadd.f32 %v909_v31, %v3332_v8 }
  0xd6   : > { %v930_v21 = vadd.f32 %v929_v25, %v911_v17  ;;  %v933_v53 = vadd.f32 %v932_v38, %v912_v9  ;;  %v936_v11 = vadd.f32 %v935_v42, %v913_v6  ;;  %v939_v37 = vadd.f32 %v938_v50, %v914_v40 }
  0xd7   : > { %v942_v15 = vadd.f32 %v941_v26, %v915_v14  ;;  %v3446_v29 = vadd.f32 %v927_v18, %v918_v5  ;;  %v945_v12 = vadd.f32 %v944_v24, %v916_v4  ;;  %v948_v1 = vadd.f32 %v947_v55, %v917_v34 }
  0xd8   : > { %v3448_v52 = vadd.f32 %v930_v21, %v919_v20  ;;  %v3450_v46 = vadd.f32 %v933_v53, %v920_v27  ;;  %v3452_v39 = vadd.f32 %v936_v11, %v921_v45  ;;  %v3454_v48 = vadd.f32 %v939_v37, %v922_v54 }
  0xd9   : > { %v3456_v2 = vadd.f32 %v942_v15, %v923_v51  ;;  %v3458_v59 = vadd.f32 %v945_v12, %v924_v16  ;;  %v3460_v44 = vadd.f32 %v948_v1, %v925_v0  ;;  %v950_v5 = vmul.f32 %v3446_v29, %v3446_v29 }
  0xda   : > { %v951_v20 = vmul.f32 %v3448_v52, %v3448_v52  ;;  %v952_v47 = vmul.f32 %v3450_v46, %v3450_v46  ;;  %v953_v8 = vmul.f32 %v3452_v39, %v3452_v39  ;;  %v954_v41 = vmul.f32 %v3454_v48, %v3454_v48 }
  0xdb   : > { %v955_v57 = vmul.f32 %v3456_v2, %v3456_v2  ;;  %v956_v49 = vmul.f32 %v3458_v59, %v3458_v59  ;;  %v957_v35 = vmul.f32 %v3460_v44, %v3460_v44  ;;  %v958_v31 = vrot.slane %v950_v5, 4 }
  0xdc   : > { %v964_v17 = vrot.slane %v951_v20, 4  ;;  %v970_v9 = vrot.slane %v952_v47, 4  ;;  %v976_v53 = vrot.slane %v953_v8, 4  ;;  %v982_v6 = vrot.slane %v954_v41, 4 }
  0xdd   : > { %v988_v21 = vrot.slane %v955_v57, 4  ;;  %v959_v40 = vadd.f32 %v958_v31, %v950_v5  ;;  %v994_v14 = vrot.slane %v956_v49, 4  ;;  %v1000_v50 = vrot.slane %v957_v35, 4 }
  0xde   : > { %v965_v38 = vadd.f32 %v964_v17, %v951_v20  ;;  %v971_v4 = vadd.f32 %v970_v9, %v952_v47  ;;  %v977_v18 = vadd.f32 %v976_v53, %v953_v8  ;;  %v983_v34 = vadd.f32 %v982_v6, %v954_v41 }
  0xdf   : > { %v989_v55 = vadd.f32 %v988_v21, %v955_v57  ;;  %v960_v37 = vrot.slane %v959_v40, 2  ;;  %v995_v45 = vadd.f32 %v994_v14, %v956_v49  ;;  %v1001_v54 = vadd.f32 %v1000_v50, %v957_v35 }
  0xe0   : > { %v966_v27 = vrot.slane %v965_v38, 2  ;;  %v972_v51 = vrot.slane %v971_v4, 2  ;;  %v978_v16 = vrot.slane %v977_v18, 2  ;;  %v984_v0 = vrot.slane %v983_v34, 2 }
  0xe1   : > { %v990_v25 = vrot.slane %v989_v55, 2  ;;  %v961_v42 = vadd.f32 %v960_v37, %v959_v40  ;;  %v996_v24 = vrot.slane %v995_v45, 2  ;;  %v1002_v11 = vrot.slane %v1001_v54, 2 }
  0xe2   : > { %v967_v26 = vadd.f32 %v966_v27, %v965_v38  ;;  %v973_v15 = vadd.f32 %v972_v51, %v971_v4  ;;  %v979_v12 = vadd.f32 %v978_v16, %v977_v18  ;;  %v985_v1 = vadd.f32 %v984_v0, %v983_v34 }
  0xe3   : > { %v991_v5 = vadd.f32 %v990_v25, %v989_v55  ;;  %v962_v20 = vrot.slane %v961_v42, 1  ;;  %v997_v8 = vadd.f32 %v996_v24, %v995_v45  ;;  %v1003_v41 = vadd.f32 %v1002_v11, %v1001_v54 }
  0xe4   : > { %v968_v47 = vrot.slane %v967_v26, 1  ;;  %v974_v57 = vrot.slane %v973_v15, 1  ;;  %v980_v31 = vrot.slane %v979_v12, 1  ;;  %v986_v49 = vrot.slane %v985_v1, 1 }
  0xe5   : > { %v992_v35 = vrot.slane %v991_v5, 1  ;;  %v3478_v17 = vadd.f32 %v962_v20, %v961_v42  ;;  %v998_v53 = vrot.slane %v997_v8, 1  ;;  %v1004_v40 = vrot.slane %v1003_v41, 1 }
  0xe6   : > { %v3480_v9 = vadd.f32 %v968_v47, %v967_v26  ;;  %v3482_v6 = vadd.f32 %v974_v57, %v973_v15  ;;  %v3484_v21 = vadd.f32 %v980_v31, %v979_v12  ;;  %v3486_v38 = vadd.f32 %v986_v49, %v985_v1 }
  0xe7   : > { %2314 = vrsqrt.f32 %v3478_v17  ;;  %v3489_v14 = vadd.f32 %v992_v35, %v991_v5  ;;  %v3492_v50 = vadd.f32 %v998_v53, %v997_v8  ;;  %v3495_v4 = vadd.f32 %v1004_v40, %v1003_v41 }
  0xe8   : > { %2316 = vrsqrt.f32 %v3480_v9  ;;  %vm1008_vm0 = vcmp.eq.f32.partialorder %v3478_v17, inf  ;;  %vm1010_vm1 = vcmp.eq.f32.partialorder %v3478_v17, 0.0  ;;  %v1011_v18 = vand.u32 2147483648, %v3478_v17 }
  0xe9   : > { %2318 = vrsqrt.f32 %v3482_v6  ;;  %vm1015_vm2 = vcmp.eq.f32.partialorder %v3480_v9, inf  ;;  %vm1017_vm3 = vcmp.eq.f32.partialorder %v3480_v9, 0.0  ;;  %v1018_v34 = vand.u32 2147483648, %v3480_v9 }
  0xea   : > { %2320 = vrsqrt.f32 %v3484_v21  ;;  %vm1022_vm4 = vcmp.eq.f32.partialorder %v3482_v6, inf  ;;  %vm1024_vm5 = vcmp.eq.f32.partialorder %v3482_v6, 0.0  ;;  %v1025_v55 = vand.u32 2147483648, %v3482_v6 }
  0xeb   : > { %2322 = vrsqrt.f32 %v3486_v38  ;;  %vm1029_vm6 = vcmp.eq.f32.partialorder %v3484_v21, inf  ;;  %vm1031_vm7 = vcmp.eq.f32.partialorder %v3484_v21, 0.0  ;;  %v1032_v37 = vand.u32 2147483648, %v3484_v21 }
  0xec   : > { %2324 = vrsqrt.f32 %v3489_v14  ;;  %vm1036_vm8 = vcmp.eq.f32.partialorder %v3486_v38, inf  ;;  %vm1038_vm9 = vcmp.eq.f32.partialorder %v3486_v38, 0.0  ;;  %v1039_v45 = vand.u32 2147483648, %v3486_v38 }
  0xed   : > { %2326 = vrsqrt.f32 %v3492_v50  ;;  %vm1043_vm10 = vcmp.eq.f32.partialorder %v3489_v14, inf  ;;  %vm1045_vm11 = vcmp.eq.f32.partialorder %v3489_v14, 0.0  ;;  %v1046_v54 = vand.u32 2147483648, %v3489_v14 }
  0xee   : > { %2328 = vrsqrt.f32 %v3495_v4  ;;  %vm1050_vm12 = vcmp.eq.f32.partialorder %v3492_v50, inf  ;;  %vm1052_vm13 = vcmp.eq.f32.partialorder %v3492_v50, 0.0  ;;  %v1053_v0 = vand.u32 2147483648, %v3492_v50 }
  0xef   : > { %vm1057_vm14 = vcmp.eq.f32.partialorder %v3495_v4, inf  ;;  %vm1059_vm15 = vcmp.eq.f32.partialorder %v3495_v4, 0.0  ;;  %v1060_v26 = vand.u32 2147483648, %v3495_v4  ;;  %v1062_v12 = vadd.f32 1.0, %v3478_v17 }
  0xf0   : > { %v1063_v1 = vadd.f32 1.0, %v3480_v9  ;;  %v1064_v41 = vadd.f32 1.0, %v3482_v6  ;;  %v1065_v53 = vadd.f32 1.0, %v3484_v21 }
  0xf1   : > { %v2315_v27 = vpop.eup %2314 }
  0xf2   : > { %v2317_v51 = vpop.eup %2316  ;;  %v1007_v16 = vmul.f32 %v2315_v27, %v3478_v17 }
  0xf3   : > { %v2319_v25 = vpop.eup %2318  ;;  %v1014_v42 = vmul.f32 %v2317_v51, %v3480_v9 }
  0xf4   : > { %v2321_v24 = vpop.eup %2320  ;;  %v1009_v11 = vsel %vm1008_vm0, %v3478_v17, %v1007_v16  ;;  %v1021_v15 = vmul.f32 %v2319_v25, %v3482_v6 }
  0xf5   : > { %v2323_v5 = vpop.eup %2322  ;;  %v1012_v20 = vsel %vm1010_vm1, %v1011_v18, %v1009_v11  ;;  %v1016_v47 = vsel %vm1015_vm2, %v3480_v9, %v1014_v42  ;;  %v1028_v8 = vmul.f32 %v2321_v24, %v3484_v21 }
  0xf6   : > { %v2325_v57 = vpop.eup %2324  ;;  %v1019_v31 = vsel %vm1017_vm3, %v1018_v34, %v1016_v47  ;;  %v1023_v49 = vsel %vm1022_vm4, %v3482_v6, %v1021_v15  ;;  %v1035_v35 = vmul.f32 %v2323_v5, %v3486_v38  ;;  %v1070_v16 = vadd.f32 1e-08, %v1012_v20 }
  0xf7   : > { %v2327_v40 = vpop.eup %2326  ;;  %v1026_v18 = vsel %vm1024_vm5, %v1025_v55, %v1023_v49  ;;  %v1030_v27 = vsel %vm1029_vm6, %v3484_v21, %v1028_v8  ;;  %v1042_v51 = vmul.f32 %v2325_v57, %v3489_v14  ;;  %v1071_v11 = vadd.f32 1e-08, %v1019_v31 }
  0xf8   : > { %v2329_v34 = vpop.eup %2328  ;;  %v1033_v25 = vsel %vm1031_vm7, %v1032_v37, %v1030_v27  ;;  %v1037_v42 = vsel %vm1036_vm8, %v3486_v38, %v1035_v35  ;;  %v1049_v24 = vmul.f32 %v2327_v40, %v3492_v50  ;;  %v1072_v20 = vadd.f32 1e-08, %v1026_v18 }
  0xf9   : > { %v1040_v55 = vsel %vm1038_vm9, %v1039_v45, %v1037_v42  ;;  %v1044_v15 = vsel %vm1043_vm10, %v3489_v14, %v1042_v51  ;;  %v1056_v5 = vmul.f32 %v2329_v34, %v3495_v4  ;;  %v1066_v8 = vadd.f32 1.0, %v3486_v38 }
  0xfa   : > { %v1047_v37 = vsel %vm1045_vm11, %v1046_v54, %v1044_v15  ;;  %v1051_v47 = vsel %vm1050_vm12, %v3492_v50, %v1049_v24  ;;  %v1073_v57 = vadd.f32 1e-08, %v1033_v25  ;;  %v1074_v49 = vadd.f32 1e-08, %v1040_v55 }
  0xfb   : > { %v1054_v45 = vsel %vm1052_vm13, %v1053_v0, %v1051_v47  ;;  %v1058_v31 = vsel %vm1057_vm14, %v3495_v4, %v1056_v5  ;;  %v1078_v35 = vmul.f32 %v1070_v16, %v1062_v12  ;;  %v1067_v54 = vadd.f32 1.0, %v3489_v14 }
  0xfc   : > { %v1061_v40 = vsel %vm1059_vm15, %v1060_v26, %v1058_v31  ;;  %v1075_v18 = vadd.f32 1e-08, %v1047_v37  ;;  %v1079_v27 = vmul.f32 %v1071_v11, %v1063_v1  ;;  %v1068_v51 = vadd.f32 1.0, %v3492_v50 }
  0xfd   : > { %v1076_v34 = vadd.f32 1e-08, %v1054_v45  ;;  %v1080_v25 = vmul.f32 %v1072_v20, %v1064_v41  ;;  %v1069_v42 = vadd.f32 1.0, %v3495_v4  ;;  %v1077_v0 = vadd.f32 1e-08, %v1061_v40 }
  0xfe   : > { %v1081_v24 = vmul.f32 %v1073_v57, %v1065_v53  ;;  %v1082_v15 = vmul.f32 %v1074_v49, %v1066_v8  ;;  %2330 = vrcp.f32 %v1078_v35  ;;  %v1083_v5 = vmul.f32 %v1075_v18, %v1067_v54 }
  0xff   : > { %2332 = vrcp.f32 %v1079_v27  ;;  %v1084_v12 = vmul.f32 %v1076_v34, %v1068_v51  ;;  %v1085_v16 = vmul.f32 %v1077_v0, %v1069_v42  ;;  %v4660_v0 = vld [vmem:[#allocation36_spill] sm:$0xff] }
 0x100   : > { %2334 = vrcp.f32 %v1080_v25 }
 0x101   : > { %2336 = vrcp.f32 %v1081_v24 }
 0x102   : > { %2338 = vrcp.f32 %v1082_v15 }
 0x103   : > { %2340 = vrcp.f32 %v1083_v5 }
 0x104   : > { %2342 = vrcp.f32 %v1084_v12 }
 0x105   : > { %2344 = vrcp.f32 %v1085_v16 }
 0x108   : > { %v2331_v26 = vpop.eup %2330 }
 0x109   : > { %v2333_v1 = vpop.eup %2332  ;;  %v1094_v53 = vmul.f32 %v2331_v26, %v3478_v17 }
 0x10a   : > { %v2335_v11 = vpop.eup %2334  ;;  %v1095_v37 = vmul.f32 %v2333_v1, %v3480_v9  ;;  %v4663_v1 = vld [vmem:[#allocation39_spill] sm:$0xff] }
 0x10b   : > { %v2337_v41 = vpop.eup %2336  ;;  %v1096_v57 = vmul.f32 %v2335_v11, %v3482_v6  ;;  %v1102_v35 = vmul.f32 %v1094_v53, %v3446_v29 }
 0x10c   : > { %v2339_v55 = vpop.eup %2338  ;;  %v1097_v45 = vmul.f32 %v2337_v41, %v3484_v21  ;;  %v1103_v40 = vmul.f32 %v1095_v37, %v3448_v52  ;;  %v4664_v41 = vld [vmem:[#allocation40_spill] sm:$0xff]  ;;  %v4666_v37 = vld [vmem:[#allocation42_spill] sm:$0xff] }
 0x10d   : > { %v2341_v20 = vpop.eup %2340  ;;  %v1098_v31 = vmul.f32 %v2339_v55, %v3486_v38  ;;  %v1104_v9 = vmul.f32 %v1096_v57, %v3450_v46  ;;  %v1110_v38 = vmul.f32 %v3287_v32, %v1102_v35  ;;  %v1118_v46 = vmul.f32 %v3335_v62, %v1102_v35 }
 0x10e   : > { %v2343_v47 = vpop.eup %2342  ;;  %v1099_v49 = vmul.f32 %v2341_v20, %v3489_v14  ;;  %v1105_v18 = vmul.f32 %v1097_v45, %v3452_v39  ;;  %v1111_v14 = vmul.f32 %v3293_v63, %v1103_v40  ;;  %v1119_v39 = vmul.f32 %v3339_v23, %v1103_v40  ;;  %v4665_v20 = vld [vmem:[#allocation41_spill] sm:$0xff] }
 0x10f   : > { %v2345_v8 = vpop.eup %2344  ;;  %v1100_v54 = vmul.f32 %v2343_v47, %v3492_v50  ;;  %v1106_v6 = vmul.f32 %v1098_v31, %v3454_v48  ;;  %v1112_v50 = vmul.f32 %v3299_v30, %v1104_v9  ;;  %v1120_v48 = vmul.f32 %v3343_v43, %v1104_v9 }
 0x110   : > { %v1101_v17 = vmul.f32 %v2345_v8, %v3495_v4  ;;  %v1107_v21 = vmul.f32 %v1099_v49, %v3456_v2  ;;  %v1113_v4 = vmul.f32 %v3305_v56, %v1105_v18  ;;  %v1121_v2 = vmul.f32 %v3347_v19, %v1105_v18  ;;  %v4667_v49 = vld [vmem:[#allocation43_spill] sm:$0xff] }
 0x111   : > { %v1108_v29 = vmul.f32 %v1100_v54, %v3458_v59  ;;  %v1114_v32 = vmul.f32 %v3311_v58, %v1106_v6  ;;  %v1142_v27 = vrot.slane %v1110_v38, 4  ;;  %v1148_v59 = vrot.slane %v1111_v14, 4 }
 0x112   : > { %v1109_v52 = vmul.f32 %v1101_v17, %v3460_v44  ;;  %v1115_v63 = vmul.f32 %v3317_v22, %v1107_v21  ;;  %v3611_v56 = vmul.f32 %v3351_v13, %v1106_v6  ;;  %v3614_v62 = vmul.f32 %v3367_v33, %v1102_v35  ;;  %v4668_v17 = vld [vmem:[#allocation44_spill] sm:$0xff] }
 0x113   : > { %v1116_v44 = vmul.f32 %v3323_v36, %v1108_v29  ;;  %v3617_v43 = vmul.f32 %v3355_v3, %v1107_v21  ;;  %v3620_v19 = vmul.f32 %v3371_v10, %v1103_v40  ;;  %v1154_v58 = vrot.slane %v1112_v50, 4  ;;  %v4659_v10 = vld [vmem:[#allocation35_spill] sm:$0xff] }
 0x114   : > { %v1117_v30 = vmul.f32 %v3329_v28, %v1109_v52  ;;  %v1160_v22 = vrot.slane %v1113_v4, 4  ;;  %v3623_v23 = vmul.f32 %v3359_v61, %v1108_v29  ;;  %v3626_v36 = vmul.f32 %v3363_v60, %v1109_v52  ;;  %v4658_v28 = vld [vmem:[#allocation34_spill] sm:$0xff]  ;;  %v4661_v60 = vld [vmem:[#allocation37_spill] sm:$0xff] }
 0x115   : > { %v3629_v13 = vmul.f32 %v3383_v7, %v1104_v9  ;;  %v3632_v33 = vmul.f32 %v4658_v28, %v1105_v18  ;;  %v1143_v51 = vadd.f32 %v1142_v27, %v1110_v38  ;;  %v1149_v3 = vadd.f32 %v1148_v59, %v1111_v14  ;;  %v4662_v7 = vld [vmem:[#allocation38_spill] sm:$0xff]  ;;  %v4669_v27 = vld [vmem:[#allocation45_spill] sm:$0xff] }
 0x116   : > { %v1166_v34 = vrot.slane %v1114_v32, 4  ;;  %v1172_v25 = vrot.slane %v1115_v63, 4  ;;  %v3635_v42 = vmul.f32 %v4659_v10, %v1106_v6  ;;  %v3638_v24 = vmul.f32 %v4660_v0, %v1107_v21 }
 0x117   : > { %v1178_v61 = vrot.slane %v1116_v44, 4  ;;  %v1184_v15 = vrot.slane %v1117_v30, 4  ;;  %v3641_v5 = vmul.f32 %v4661_v60, %v1108_v29  ;;  %v3644_v12 = vmul.f32 %v4662_v7, %v1109_v52 }
 0x118   : > { %v1155_v16 = vadd.f32 %v1154_v58, %v1112_v50  ;;  %v1161_v26 = vadd.f32 %v1160_v22, %v1113_v4  ;;  %v3647_v11 = vmul.f32 %v4663_v1, %v1102_v35  ;;  %v3650_v55 = vmul.f32 %v4664_v41, %v1103_v40 }
 0x119   : > { %v3653_v53 = vmul.f32 %v4665_v20, %v1104_v9  ;;  %v3656_v47 = vmul.f32 %v4666_v37, %v1105_v18  ;;  %v1144_v8 = vrot.slane %v1143_v51, 2  ;;  %v1150_v57 = vrot.slane %v1149_v3, 2  ;;  %v4670_v18 = vld [vmem:[#allocation46_spill] sm:$0xff] }
 0x11a   : > { %v1167_v45 = vadd.f32 %v1166_v34, %v1114_v32  ;;  %v1173_v31 = vadd.f32 %v1172_v25, %v1115_v63  ;;  %v3659_v54 = vmul.f32 %v4667_v49, %v1106_v6  ;;  %v3662_v38 = vmul.f32 %v4668_v17, %v1107_v21 }
 0x11b   : > { %v1179_v35 = vadd.f32 %v1178_v61, %v1116_v44  ;;  %v1185_v14 = vadd.f32 %v1184_v15, %v1117_v30  ;;  %v1156_v40 = vrot.slane %v1155_v16, 2  ;;  %v1162_v50 = vrot.slane %v1161_v26, 2 }
 0x11c   : > { %v1190_v4 = vrot.slane %v1118_v46, 4  ;;  %v1196_v9 = vrot.slane %v1119_v39, 4  ;;  %v3665_v59 = vmul.f32 %v4669_v27, %v1108_v29  ;;  %v3668_v58 = vmul.f32 %v4670_v18, %v1109_v52 }
 0x11d   : > { %v1202_v32 = vrot.slane %v1120_v48, 4  ;;  %v1208_v63 = vrot.slane %v1121_v2, 4  ;;  %v1145_v22 = vadd.f32 %v1144_v8, %v1143_v51  ;;  %v1151_v6 = vadd.f32 %v1150_v57, %v1149_v3 }
 0x11e   : > { %v1168_v28 = vrot.slane %v1167_v45, 2  ;;  %v1174_v34 = vrot.slane %v1173_v31, 2  ;;  %v1180_v21 = vrot.slane %v1179_v35, 2  ;;  %v1186_v25 = vrot.slane %v1185_v14, 2 }
 0x11f   : > { %v1214_v44 = vrot.slane %v3611_v56, 4  ;;  %v1220_v30 = vrot.slane %v3617_v43, 4  ;;  %v1157_v10 = vadd.f32 %v1156_v40, %v1155_v16  ;;  %v1163_v0 = vadd.f32 %v1162_v50, %v1161_v26 }
 0x120   : > { %v1191_v61 = vadd.f32 %v1190_v4, %v1118_v46  ;;  %v1197_v29 = vadd.f32 %v1196_v9, %v1119_v39  ;;  %v1203_v15 = vadd.f32 %v1202_v32, %v1120_v48  ;;  %v1209_v60 = vadd.f32 %v1208_v63, %v1121_v2 }
 0x121   : > { %v1226_v52 = vrot.slane %v3623_v23, 4  ;;  %v1232_v7 = vrot.slane %v3626_v36, 4  ;;  %v1146_v51 = vrot.slane %v1145_v22, 1  ;;  %v1152_v3 = vrot.slane %v1151_v6, 1 }
 0x122   : > { %v1169_v1 = vadd.f32 %v1168_v28, %v1167_v45  ;;  %v1175_v41 = vadd.f32 %v1174_v34, %v1173_v31  ;;  %v1181_v20 = vadd.f32 %v1180_v21, %v1179_v35  ;;  %v1187_v37 = vadd.f32 %v1186_v25, %v1185_v14 }
 0x123   : > { %v1215_v8 = vadd.f32 %v1214_v44, %v3611_v56  ;;  %v1221_v57 = vadd.f32 %v1220_v30, %v3617_v43  ;;  %v1158_v16 = vrot.slane %v1157_v10, 1  ;;  %v1164_v26 = vrot.slane %v1163_v0, 1 }
 0x124   : > { %v1192_v46 = vrot.slane %v1191_v61, 2  ;;  %v1198_v39 = vrot.slane %v1197_v29, 2  ;;  %v1204_v48 = vrot.slane %v1203_v15, 2  ;;  %v1210_v2 = vrot.slane %v1209_v60, 2 }
 0x125   : > { %v1227_v49 = vadd.f32 %v1226_v52, %v3623_v23  ;;  %v1233_v17 = vadd.f32 %v1232_v7, %v3626_v36  ;;  %v3678_v40 = vadd.f32 %v1146_v51, %v1145_v22  ;;  %v3680_v45 = vadd.f32 %v1152_v3, %v1151_v6 }
 0x126   : > { %v1170_v31 = vrot.slane %v1169_v1, 1  ;;  %v1176_v35 = vrot.slane %v1175_v41, 1  ;;  %v1182_v14 = vrot.slane %v1181_v20, 1  ;;  %v1188_v56 = vrot.slane %v1187_v37, 1 }
 0x127   : > { %v1216_v50 = vrot.slane %v1215_v8, 2  ;;  %v1222_v43 = vrot.slane %v1221_v57, 2  ;;  %v3682_v4 = vadd.f32 %v1158_v16, %v1157_v10  ;;  %v3684_v9 = vadd.f32 %v1164_v26, %v1163_v0 }
 0x128   : > { %v1193_v27 = vadd.f32 %v1192_v46, %v1191_v61  ;;  %v1199_v18 = vadd.f32 %v1198_v39, %v1197_v29  ;;  %v1205_v32 = vadd.f32 %v1204_v48, %v1203_v15  ;;  %v1211_v23 = vadd.f32 %v1210_v2, %v1209_v60 }
 0x129   : > { %v1228_v63 = vrot.slane %v1227_v49, 2  ;;  %v1234_v36 = vrot.slane %v1233_v17, 2  ;;  %v3686_v22 = vadd.f32 %v1170_v31, %v1169_v1  ;;  %v3688_v6 = vadd.f32 %v1176_v35, %v1175_v41 }
 0x12a   : > { %v1238_v28 = vrot.slane %v3614_v62, 4  ;;  %v1244_v34 = vrot.slane %v3620_v19, 4  ;;  %v3692_v21 = vadd.f32 %v1182_v14, %v1181_v20  ;;  %v3694_v25 = vadd.f32 %v1188_v56, %v1187_v37 }
 0x12b   : > { %v1217_v44 = vadd.f32 %v1216_v50, %v1215_v8  ;;  %v1223_v30 = vadd.f32 %v1222_v43, %v1221_v57  ;;  %v1194_v10 = vrot.slane %v1193_v27, 1  ;;  %v1200_v0 = vrot.slane %v1199_v18, 1 }
 0x12c   : > { %v1250_v61 = vrot.slane %v3629_v13, 4  ;;  %v1256_v29 = vrot.slane %v3632_v33, 4  ;;  %v1206_v15 = vrot.slane %v1205_v32, 1  ;;  %v1212_v60 = vrot.slane %v1211_v23, 1 }
 0x12d   : > { %v1229_v52 = vadd.f32 %v1228_v63, %v1227_v49  ;;  %v1235_v7 = vadd.f32 %v1234_v36, %v1233_v17  ;;  %v1239_v51 = vadd.f32 %v1238_v28, %v3614_v62  ;;  %v1245_v3 = vadd.f32 %v1244_v34, %v3620_v19 }
 0x12e   : > { %v1262_v1 = vrot.slane %v3635_v42, 4  ;;  %v1268_v41 = vrot.slane %v3638_v24, 4  ;;  %v1218_v20 = vrot.slane %v1217_v44, 1  ;;  %v1224_v37 = vrot.slane %v1223_v30, 1 }
 0x12f   : > { %v1274_v8 = vrot.slane %v3641_v5, 4  ;;  %v1280_v57 = vrot.slane %v3644_v12, 4  ;;  %v3704_v16 = vadd.f32 %v1194_v10, %v1193_v27  ;;  %v3706_v26 = vadd.f32 %v1200_v0, %v1199_v18 }
 0x130   : > { %v1251_v46 = vadd.f32 %v1250_v61, %v3629_v13  ;;  %v1257_v62 = vadd.f32 %v1256_v29, %v3632_v33  ;;  %v3710_v39 = vadd.f32 %v1206_v15, %v1205_v32  ;;  %v3712_v19 = vadd.f32 %v1212_v60, %v1211_v23 }
 0x131   : > { %v1230_v48 = vrot.slane %v1229_v52, 1  ;;  %v1236_v2 = vrot.slane %v1235_v7, 1  ;;  %v1240_v49 = vrot.slane %v1239_v51, 2  ;;  %v1246_v17 = vrot.slane %v1245_v3, 2 }
 0x132   : > { %v1263_v31 = vadd.f32 %v1262_v1, %v3635_v42  ;;  %v1269_v35 = vadd.f32 %v1268_v41, %v3638_v24  ;;  %v3716_v14 = vadd.f32 %v1218_v20, %v1217_v44  ;;  %v3718_v56 = vadd.f32 %v1224_v37, %v1223_v30 }
 0x133   : > { %v1275_v13 = vadd.f32 %v1274_v8, %v3641_v5  ;;  %v1281_v33 = vadd.f32 %v1280_v57, %v3644_v12  ;;  %v1252_v50 = vrot.slane %v1251_v46, 2  ;;  %v1258_v43 = vrot.slane %v1257_v62, 2 }
 0x134   : > { %v1286_v27 = vrot.slane %v3647_v11, 4  ;;  %v1292_v18 = vrot.slane %v3650_v55, 4  ;;  %v3724_v32 = vadd.f32 %v1230_v48, %v1229_v52  ;;  %v3726_v23 = vadd.f32 %v1236_v2, %v1235_v7 }
 0x135   : > { %v1298_v42 = vrot.slane %v3653_v53, 4  ;;  %v1304_v24 = vrot.slane %v3656_v47, 4  ;;  %v1241_v63 = vadd.f32 %v1240_v49, %v1239_v51  ;;  %v1247_v36 = vadd.f32 %v1246_v17, %v1245_v3 }
 0x136   : > { %v1264_v28 = vrot.slane %v1263_v31, 2  ;;  %v1270_v5 = vrot.slane %v1269_v35, 2  ;;  %v1276_v34 = vrot.slane %v1275_v13, 2  ;;  %v1282_v12 = vrot.slane %v1281_v33, 2 }
 0x137   : > { %v1310_v44 = vrot.slane %v3659_v54, 4  ;;  %v1316_v30 = vrot.slane %v3662_v38, 4  ;;  %v1253_v10 = vadd.f32 %v1252_v50, %v1251_v46  ;;  %v1259_v0 = vadd.f32 %v1258_v43, %v1257_v62 }
 0x138   : > { %v1287_v61 = vadd.f32 %v1286_v27, %v3647_v11  ;;  %v1293_v29 = vadd.f32 %v1292_v18, %v3650_v55  ;;  %v1299_v15 = vadd.f32 %v1298_v42, %v3653_v53  ;;  %v1305_v60 = vadd.f32 %v1304_v24, %v3656_v47 }
 0x139   : > { %v1322_v52 = vrot.slane %v3665_v59, 4  ;;  %v1328_v7 = vrot.slane %v3668_v58, 4  ;;  %v1242_v51 = vrot.slane %v1241_v63, 1  ;;  %v1248_v3 = vrot.slane %v1247_v36, 1 }
 0x13a   : > { %v1265_v1 = vadd.f32 %v1264_v28, %v1263_v31  ;;  %v1271_v41 = vadd.f32 %v1270_v5, %v1269_v35  ;;  %v1277_v20 = vadd.f32 %v1276_v34, %v1275_v13  ;;  %v1283_v37 = vadd.f32 %v1282_v12, %v1281_v33  ;;  %v4671_v5 = vld [vmem:[#allocation2_spill] sm:$0xff]  ;;  %v4673_v34 = vld [vmem:[#allocation4_spill] sm:$0xff] }
 0x13b   : > { %v1311_v8 = vadd.f32 %v1310_v44, %v3659_v54  ;;  %v1317_v11 = vadd.f32 %v1316_v30, %v3662_v38  ;;  %v1254_v57 = vrot.slane %v1253_v10, 1  ;;  %v1260_v55 = vrot.slane %v1259_v0, 1  ;;  %v4674_v44 = vld [vmem:[#allocation5_spill] sm:$0xff] }
 0x13c   : > { %v1288_v46 = vrot.slane %v1287_v61, 2  ;;  %v1294_v53 = vrot.slane %v1293_v29, 2  ;;  %v1300_v62 = vrot.slane %v1299_v15, 2  ;;  %v1306_v47 = vrot.slane %v1305_v60, 2 }
 0x13d   : > { %v1323_v48 = vadd.f32 %v1322_v52, %v3665_v59  ;;  %v1329_v2 = vadd.f32 %v1328_v7, %v3668_v58  ;;  %v3742_v49 = vadd.f32 %v1242_v51, %v1241_v63  ;;  %v3744_v17 = vadd.f32 %v1248_v3, %v1247_v36  ;;  %v4672_v63 = vld [vmem:[#allocation3_spill] sm:$0xff] }
 0x13e   : > { %v1266_v31 = vrot.slane %v1265_v1, 1  ;;  %v1272_v35 = vrot.slane %v1271_v41, 1  ;;  %v1278_v13 = vrot.slane %v1277_v20, 1  ;;  %v1284_v54 = vrot.slane %v1283_v37, 1 }
 0x13f   : > { %v1312_v33 = vrot.slane %v1311_v8, 2  ;;  %v1318_v38 = vrot.slane %v1317_v11, 2  ;;  %v1255_v50 = vadd.f32 %v1254_v57, %v1253_v10  ;;  %v1261_v43 = vadd.f32 %v1260_v55, %v1259_v0 }
 0x140   : > { %v1289_v27 = vadd.f32 %v1288_v46, %v1287_v61  ;;  %v1295_v18 = vadd.f32 %v1294_v53, %v1293_v29  ;;  %v1301_v42 = vadd.f32 %v1300_v62, %v1299_v15  ;;  %v1307_v24 = vadd.f32 %v1306_v47, %v1305_v60  ;;  %v4679_v46 = vld [vmem:[#allocation11_spill] sm:$0xff]  ;;  %v4680_v62 = vld [vmem:[#allocation13_spill] sm:$0xff]  ;;  %v4681_v47 = vld [vmem:[#allocation8_spill] sm:$0xff] }
 0x141   : > { %v1324_v28 = vrot.slane %v1323_v48, 2  ;;  %v1330_v59 = vrot.slane %v1329_v2, 2  ;;  %v3748_v58 = vadd.f32 %v3678_v40, %v4671_v5  ;;  %v3752_v36 = vadd.f32 %v3680_v45, %v4672_v63  ;;  %v4675_v40 = vld [vmem:[#allocation6_spill] sm:$0xff]  ;;  %v4676_v45 = vld [vmem:[#allocation7_spill] sm:$0xff] }
 0x142   : > { %v3756_v12 = vadd.f32 %v3682_v4, %v4673_v34  ;;  %v3760_v30 = vadd.f32 %v3684_v9, %v4674_v44  ;;  %v1267_v10 = vadd.f32 %v1266_v31, %v1265_v1  ;;  %v1273_v0 = vadd.f32 %v1272_v35, %v1271_v41  ;;  %v4677_v9 = vld [vmem:[#allocation10_spill] sm:$0xff]  ;;  %v4678_v41 = vld [vmem:[#allocation12_spill] sm:$0xff]  ;;  %v4684_v44 = vld [vmem:[#allocation15_spill] sm:$0xff] }
 0x143   : > { %v1313_v61 = vadd.f32 %v1312_v33, %v1311_v8  ;;  %v1319_v29 = vadd.f32 %v1318_v38, %v1317_v11  ;;  %v1290_v15 = vrot.slane %v1289_v27, 1  ;;  %v1296_v60 = vrot.slane %v1295_v18, 1 }
 0x144   : > { %v3764_v52 = vadd.f32 %v3686_v22, %v4675_v40  ;;  %v3768_v7 = vadd.f32 %v3688_v6, %v4676_v45  ;;  %v1302_v4 = vrot.slane %v1301_v42, 1  ;;  %v1308_v51 = vrot.slane %v1307_v24, 1 }
 0x145   : > { %v1325_v3 = vadd.f32 %v1324_v28, %v1323_v48  ;;  %v1331_v57 = vadd.f32 %v1330_v59, %v1329_v2  ;;  %v3772_v1 = vadd.f32 %v3704_v16, %v4677_v9  ;;  %v3776_v8 = vadd.f32 %v3710_v39, %v4678_v41  ;;  %v4682_v48 = vld [vmem:[#allocation9_spill] sm:$0xff]  ;;  %v4691_v9 = vld [vmem:[#allocation22_spill] sm:$0xff] }
 0x146   : > { %v1366_v22 = vmax.f32 %v3748_v58, %v3756_v12  ;;  %v1369_v11 = vmax.f32 %v3752_v36, %v3760_v30  ;;  %v1314_v6 = vrot.slane %v1313_v61, 1  ;;  %v1320_v55 = vrot.slane %v1319_v29, 1 }
 0x147   : > { %v3784_v53 = vadd.f32 %v3706_v26, %v4679_v46  ;;  %v3788_v16 = vadd.f32 %v3712_v19, %v4680_v62  ;;  %v3792_v39 = vadd.f32 %v3692_v21, %v4681_v47  ;;  %v3796_v2 = vadd.f32 %v3694_v25, %v4682_v48  ;;  %v4683_v19 = vld [vmem:[#allocation14_spill] sm:$0xff] }
 0x148   : > { %v1367_v31 = vmax.f32 %v1366_v22, %v3764_v52  ;;  %v1370_v35 = vmax.f32 %v1369_v11, %v3768_v7  ;;  %v1279_v33 = vadd.f32 %v1278_v13, %v1277_v20  ;;  %v1285_v38 = vadd.f32 %v1284_v54, %v1283_v37  ;;  %v4693_v11 = vld [vmem:[#allocation24_spill] sm:$0xff] }
 0x149   : > { %v1326_v26 = vrot.slane %v1325_v3, 1  ;;  %v1332_v28 = vrot.slane %v1331_v57, 1  ;;  %v1291_v59 = vadd.f32 %v1290_v15, %v1289_v27  ;;  %v1297_v5 = vadd.f32 %v1296_v60, %v1295_v18  ;;  %v4685_v15 = vld [vmem:[#allocation16_spill] sm:$0xff]  ;;  %v4687_v60 = vld [vmem:[#allocation18_spill] sm:$0xff] }
 0x14a   : > { %v3802_v63 = vadd.f32 %v3716_v14, %v4683_v19  ;;  %v1372_v21 = vmax.f32 %v3772_v1, %v3776_v8  ;;  %v1303_v34 = vadd.f32 %v1302_v4, %v1301_v42  ;;  %v1309_v25 = vadd.f32 %v1308_v51, %v1307_v24  ;;  %v4686_v24 = vld [vmem:[#allocation17_spill] sm:$0xff]  ;;  %v4689_v4 = vld [vmem:[#allocation20_spill] sm:$0xff] }
 0x14b   : > { %v3808_v40 = vadd.f32 %v3718_v56, %v4684_v44  ;;  %v1375_v20 = vmax.f32 %v3784_v53, %v3788_v16  ;;  %v1315_v37 = vadd.f32 %v1314_v6, %v1313_v61  ;;  %v1321_v13 = vadd.f32 %v1320_v55, %v1319_v29  ;;  %v4688_v61 = vld [vmem:[#allocation19_spill] sm:$0xff] }
 0x14c   : > { %v1368_v54 = vmax.f32 %v1367_v31, %v3792_v39  ;;  %v1371_v27 = vmax.f32 %v1370_v35, %v3796_v2  ;;  %v1327_v14 = vadd.f32 %v1326_v26, %v1325_v3  ;;  %v3814_v18 = vadd.f32 %v1332_v28, %v1331_v57  ;;  %v4690_v57 = vld [vmem:[#allocation21_spill] sm:$0xff]  ;;  %v4697_v31 = vld [vmem:[#allocation28_spill] sm:$0xff]  ;;  %v4700_v44 = vld [vmem:[#allocation31_spill] sm:$0xff] }
 0x14d   : > { %v3818_v42 = vadd.f32 %v3724_v32, %v4685_v15  ;;  %v3822_v56 = vadd.f32 %v3726_v23, %v4686_v24  ;;  %v3826_v45 = vadd.f32 %v3742_v49, %v4687_v60  ;;  %v3830_v29 = vadd.f32 %v3744_v17, %v4688_v61  ;;  %v4692_v23 = vld [vmem:[#allocation23_spill] sm:$0xff]  ;;  %v4694_v17 = vld [vmem:[#allocation25_spill] sm:$0xff] }
 0x14e   : > { %v3833_v51 = vadd.f32 %v1255_v50, %v4689_v4  ;;  %v1373_v3 = vmax.f32 %v1372_v21, %v3802_v63  ;;  %v3837_v32 = vadd.f32 %v1261_v43, %v4690_v57  ;;  %v3840_v41 = vadd.f32 %v1267_v10, %v4691_v9  ;;  %v4695_v43 = vld [vmem:[#allocation26_spill] sm:$0xff]  ;;  %v4696_v10 = vld [vmem:[#allocation27_spill] sm:$0xff] }
 0x14f   : > { %v3843_v22 = vadd.f32 %v1273_v0, %v4692_v23  ;;  %v1376_v49 = vmax.f32 %v1375_v20, %v3808_v40  ;;  %v3847_v6 = vadd.f32 %v1279_v33, %v4693_v11  ;;  %v3850_v55 = vadd.f32 %v1285_v38, %v4694_v17  ;;  %v4698_v38 = vld [vmem:[#allocation29_spill] sm:$0xff] }
 0x150   : > { %v1390_v50 = vsub.f32 %v3748_v58, %v1368_v54  ;;  %v1391_v46 = vsub.f32 %v3752_v36, %v1371_v27  ;;  %v3855_v62 = vadd.f32 %v1291_v59, %v4695_v43  ;;  %v3858_v47 = vadd.f32 %v1297_v5, %v4696_v10  ;;  %v4699_v59 = vld [vmem:[#allocation30_spill] sm:$0xff] }
 0x151   : > { %v1392_v0 = vsub.f32 %v3756_v12, %v1368_v54  ;;  %v1393_v48 = vsub.f32 %v3760_v30, %v1371_v27  ;;  %v3863_v35 = vadd.f32 %v1303_v34, %v4697_v31  ;;  %v1374_v33 = vmax.f32 %v1373_v3, %v3818_v42 }
 0x152   : > { %v1378_v58 = vmax.f32 %v3826_v45, %v3833_v51  ;;  %v1394_v36 = vsub.f32 %v3764_v52, %v1368_v54  ;;  %v3870_v26 = vadd.f32 %v1309_v25, %v4698_v38  ;;  %v1377_v28 = vmax.f32 %v1376_v49, %v3822_v56  ;;  %v4701_v49 = vld [vmem:[#allocation32_spill] sm:$0xff] }
 0x153   : > { %v1381_v12 = vmax.f32 %v3830_v29, %v3837_v32  ;;  %v1395_v30 = vsub.f32 %v3768_v7, %v1371_v27  ;;  %v3877_v5 = vadd.f32 %v1315_v37, %v4699_v59  ;;  %v1396_v19 = vsub.f32 %v3792_v39, %v1368_v54 }
 0x154   : > { %v1422_v21 = vmul.f32 1.442695, %v1390_v50  ;;  %v1424_v34 = vmul.f32 1.442695, %v1391_v46  ;;  %v3881_v20 = vadd.f32 %v1321_v13, %v4700_v44  ;;  %v1397_v52 = vsub.f32 %v3796_v2, %v1371_v27  ;;  %v4702_v50 = vld [vmem:[#allocation33_spill] sm:$0xff] }
 0x155   : > { %v1426_v25 = vmul.f32 1.442695, %v1392_v0  ;;  %v1428_v15 = vmul.f32 1.442695, %v1393_v48  ;;  %v1379_v24 = vmax.f32 %v1378_v58, %v3840_v41  ;;  %v1398_v60 = vsub.f32 %v3772_v1, %v1374_v33 }
 0x156   : > { %2346 = vpow2.f32 %v1422_v21  ;;  %v1430_v7 = vmul.f32 1.442695, %v1394_v36  ;;  %v1382_v37 = vmax.f32 %v1381_v12, %v3843_v22  ;;  %v1399_v61 = vsub.f32 %v3784_v53, %v1377_v28 }
 0x157   : > { %2348 = vpow2.f32 %v1424_v34  ;;  %v1432_v39 = vmul.f32 1.442695, %v1395_v30  ;;  %v1384_v13 = vmax.f32 %v3855_v62, %v3863_v35  ;;  %v1400_v54 = vsub.f32 %v3776_v8, %v1374_v33 }
 0x158   : > { %2350 = vpow2.f32 %v1426_v25  ;;  %v1434_v2 = vmul.f32 1.442695, %v1396_v19  ;;  %v1387_v27 = vmax.f32 %v3858_v47, %v3870_v26  ;;  %v1401_v1 = vsub.f32 %v3788_v16, %v1377_v28 }
 0x159   : > { %2352 = vpow2.f32 %v1428_v15  ;;  %v1436_v4 = vmul.f32 1.442695, %v1397_v52  ;;  %v1380_v3 = vmax.f32 %v1379_v24, %v3847_v6  ;;  %v1402_v53 = vsub.f32 %v3802_v63, %v1374_v33 }
 0x15a   : > { %2354 = vpow2.f32 %v1430_v7  ;;  %v1438_v57 = vmul.f32 1.442695, %v1398_v60  ;;  %v1383_v9 = vmax.f32 %v1382_v37, %v3850_v55  ;;  %v1403_v23 = vsub.f32 %v3808_v40, %v1377_v28 }
 0x15b   : > { %2356 = vpow2.f32 %v1432_v39  ;;  %v1440_v8 = vmul.f32 1.442695, %v1399_v61  ;;  %v3899_v11 = vadd.f32 %v1327_v14, %v4701_v49  ;;  %v1404_v17 = vsub.f32 %v3818_v42, %v1374_v33 }
 0x15c   : > { %2358 = vpow2.f32 %v1434_v2  ;;  %v1442_v16 = vmul.f32 1.442695, %v1400_v54  ;;  %v3904_v46 = vadd.f32 %v3814_v18, %v4702_v50  ;;  %v1405_v63 = vsub.f32 %v3822_v56, %v1377_v28 }
 0x15d   : > { %2360 = vpow2.f32 %v1436_v4  ;;  %v1444_v43 = vmul.f32 1.442695, %v1401_v1  ;;  %v1385_v10 = vmax.f32 %v1384_v13, %v3877_v5  ;;  %v1406_v40 = vsub.f32 %v3826_v45, %v1380_v3 }
 0x15e   : > { %2362 = vpow2.f32 %v1438_v57  ;;  %v1446_v0 = vmul.f32 1.442695, %v1402_v53  ;;  %v1388_v14 = vmax.f32 %v1387_v27, %v3881_v20  ;;  %v1407_v42 = vsub.f32 %v3830_v29, %v1383_v9 }
 0x15f   : > { %2364 = vpow2.f32 %v1440_v8  ;;  %v1448_v48 = vmul.f32 1.442695, %v1403_v23  ;;  %v1408_v18 = vsub.f32 %v3833_v51, %v1380_v3  ;;  %v1450_v56 = vmul.f32 1.442695, %v1404_v17 }
 0x160   : > { %v3911_v31 = vpop.eup %2346  ;;  %2366 = vpow2.f32 %v1442_v16  ;;  %v1409_v58 = vsub.f32 %v3837_v32, %v1383_v9  ;;  %v1452_v45 = vmul.f32 1.442695, %v1405_v63  ;;  %v3920_v38 = vmax.f32 %v1385_v10, %v3899_v11 }
 0x161   : > { %v3914_v33 = vpop.eup %2348  ;;  %2368 = vpow2.f32 %v1444_v43  ;;  %v1410_v29 = vsub.f32 %v3840_v41, %v1380_v3  ;;  %v1454_v28 = vmul.f32 1.442695, %v1406_v40  ;;  %v1389_v51 = vmax.f32 %v1388_v14, %v3904_v46 }
 0x162   : > { %v3917_v36 = vpop.eup %2350  ;;  %2370 = vpow2.f32 %v1446_v0  ;;  %v1411_v30 = vsub.f32 %v3843_v22, %v1383_v9  ;;  %v1456_v59 = vmul.f32 1.442695, %v1407_v42  ;;  %v1412_v19 = vsub.f32 %v3847_v6, %v1380_v3 }
 0x163   : > { %v3923_v12 = vpop.eup %2352  ;;  %2372 = vpow2.f32 %v1448_v48  ;;  %v1458_v21 = vmul.f32 1.442695, %v1408_v18  ;;  %v1413_v41 = vsub.f32 %v3850_v55, %v1383_v9  ;;  %v1460_v44 = vmul.f32 1.442695, %v1409_v58 }
 0x164   : > { %v3927_v32 = vpop.eup %2354  ;;  %2374 = vpow2.f32 %v1450_v56  ;;  %v1414_v25 = vsub.f32 %v3855_v62, %v3920_v38  ;;  %v1462_v22 = vmul.f32 1.442695, %v1410_v29  ;;  %v1415_v24 = vsub.f32 %v3858_v47, %v1389_v51 }
 0x165   : > { %v3930_v34 = vpop.eup %2356  ;;  %2376 = vpow2.f32 %v1452_v45  ;;  %v1464_v6 = vmul.f32 1.442695, %v1411_v30  ;;  %v1416_v55 = vsub.f32 %v3863_v35, %v3920_v38  ;;  %v1466_v7 = vmul.f32 1.442695, %v1412_v19 }
 0x166   : > { %v3933_v52 = vpop.eup %2358  ;;  %2378 = vpow2.f32 %v1454_v28  ;;  %v1417_v61 = vsub.f32 %v3870_v26, %v1389_v51  ;;  %v1468_v62 = vmul.f32 1.442695, %v1413_v41  ;;  %v1418_v47 = vsub.f32 %v3877_v5, %v3920_v38 }
 0x167   : > { %v3937_v15 = vpop.eup %2360  ;;  %2380 = vpow2.f32 %v1456_v59  ;;  %v1470_v13 = vmul.f32 1.442695, %v1414_v25  ;;  %v1486_v54 = vadd.f32 %v3917_v36, %v3911_v31  ;;  %v1419_v35 = vsub.f32 %v3881_v20, %v1389_v51 }
 0x168   : > { %v3940_v60 = vpop.eup %2362  ;;  %2382 = vpow2.f32 %v1458_v21  ;;  %v1472_v27 = vmul.f32 1.442695, %v1415_v24  ;;  %v1489_v26 = vadd.f32 %v3923_v12, %v3914_v33  ;;  %v1420_v4 = vsub.f32 %v3899_v11, %v3920_v38 }
 0x169   : > { %v3944_v37 = vpop.eup %2364  ;;  %2384 = vpow2.f32 %v1460_v44  ;;  %v1474_v5 = vmul.f32 1.442695, %v1416_v55  ;;  %v1421_v57 = vsub.f32 %v3904_v46, %v1389_v51  ;;  %v1476_v20 = vmul.f32 1.442695, %v1417_v61 }
 0x16a   : > { %v3947_v39 = vpop.eup %2366  ;;  %2386 = vpow2.f32 %v1462_v22  ;;  %v1478_v8 = vmul.f32 1.442695, %v1418_v47  ;;  %v1487_v49 = vadd.f32 %v3927_v32, %v1486_v54  ;;  %v1480_v17 = vmul.f32 1.442695, %v1419_v35 }
 0x16b   : > { %v3953_v2 = vpop.eup %2368  ;;  %2388 = vpow2.f32 %v1464_v6  ;;  %v1492_v3 = vadd.f32 %v3947_v39, %v3940_v60  ;;  %v1490_v16 = vadd.f32 %v3930_v34, %v1489_v26  ;;  %v1482_v46 = vmul.f32 1.442695, %v1420_v4 }
 0x16c   : > { %v3958_v1 = vpop.eup %2370  ;;  %2390 = vpow2.f32 %v1466_v7  ;;  %v1495_v9 = vadd.f32 %v3953_v2, %v3944_v37  ;;  %v1484_v10 = vmul.f32 1.442695, %v1421_v57  ;;  %v1488_v14 = vadd.f32 %v3933_v52, %v1487_v49 }
 0x16d   : > { %v3964_v53 = vpop.eup %2372  ;;  %2392 = vpow2.f32 %v1468_v62  ;;  %v1493_v63 = vadd.f32 %v3958_v1, %v1492_v3  ;;  %v1491_v48 = vadd.f32 %v3937_v15, %v1490_v16 }
 0x16e   : > { %v3969_v23 = vpop.eup %2374  ;;  %2394 = vpow2.f32 %v1470_v13  ;;  %v1496_v40 = vadd.f32 %v3964_v53, %v1495_v9 }
 0x16f   : > { %v3972_v11 = vpop.eup %2376  ;;  %2396 = vpow2.f32 %v1472_v27  ;;  %v1494_v58 = vadd.f32 %v3969_v23, %v1493_v63  ;;  %v2554_v63 = vld [vmem:[%s2650_s16] sm:$0xff] }
 0x170   : > { %v3975_v50 = vpop.eup %2378  ;;  %2398 = vpow2.f32 %v1474_v5  ;;  %v1497_v29 = vadd.f32 %v3972_v11, %v1496_v40 }
 0x171   : > { %v3978_v43 = vpop.eup %2380  ;;  %2400 = vpow2.f32 %v1476_v20 }
 0x172   : > { %v3981_v0 = vpop.eup %2382  ;;  %2402 = vpow2.f32 %v1478_v8 }
 0x173   : > { %v3984_v42 = vpop.eup %2384  ;;  %2404 = vpow2.f32 %v1480_v17  ;;  %v1498_v18 = vadd.f32 %v3981_v0, %v3975_v50 }
 0x174   : > { %v2387_v56 = vpop.eup %2386  ;;  %2406 = vpow2.f32 %v1482_v46  ;;  %v1501_v45 = vadd.f32 %v3984_v42, %v3978_v43 }
 0x175   : > { %v2389_v38 = vpop.eup %2388  ;;  %2408 = vpow2.f32 %v1484_v10  ;;  %v1499_v28 = vadd.f32 %v2387_v56, %v1498_v18  ;;  %v2558_v18 = vld [vmem:[%s2650_s16 + $0x20] sm:$0xff] }
 0x176   : > { %v2391_v51 = vpop.eup %2390  ;;  %v1502_v30 = vadd.f32 %v2389_v38, %v1501_v45  ;;  %2410 = vrcp.f32 %v1488_v14 }
 0x177   : > { %v2393_v59 = vpop.eup %2392  ;;  %v1500_v19 = vadd.f32 %v2391_v51, %v1499_v28  ;;  %2412 = vrcp.f32 %v1491_v48  ;;  %v2561_v28 = vld [vmem:[%s2650_s16 + $0x38] sm:$0xff] }
 0x178   : > { %v3993_v21 = vpop.eup %2394  ;;  %v1503_v41 = vadd.f32 %v2393_v59, %v1502_v30  ;;  %2414 = vrcp.f32 %v1494_v58  ;;  %v2559_v58 = vld [vmem:[%s2650_s16 + $0x28] sm:$0xff]  ;;  %v2562_v30 = vld [vmem:[%s2650_s16 + $0x40] sm:$0xff] }
 0x179   : > { %v3995_v44 = vpop.eup %2396  ;;  %2416 = vrcp.f32 %v1497_v29 }
 0x17a   : > { %v3997_v25 = vpop.eup %2398  ;;  %2418 = vrcp.f32 %v1500_v19  ;;  %v2563_v19 = vld [vmem:[%s2650_s16 + $0x48] sm:$0xff] }
 0x17b   : > { %v3999_v22 = vpop.eup %2400  ;;  %v1504_v24 = vadd.f32 %v3997_v25, %v3993_v21  ;;  %2420 = vrcp.f32 %v1503_v41 }
 0x17c   : > { %v4003_v6 = vpop.eup %2402  ;;  %v1507_v55 = vadd.f32 %v3999_v22, %v3995_v44 }
 0x17d   : > { %v4007_v7 = vpop.eup %2404  ;;  %v1505_v61 = vadd.f32 %v4003_v6, %v1504_v24  ;;  %v2564_v24 = vld [vmem:[%s2650_s16 + $0x50] sm:$0xff] }
 0x17e   : > { %v4010_v62 = vpop.eup %2406  ;;  %v1508_v47 = vadd.f32 %v4007_v7, %v1507_v55 }
 0x17f   : > { %v4013_v13 = vpop.eup %2408  ;;  %v1506_v54 = vadd.f32 %v4010_v62, %v1505_v61  ;;  %v2565_v61 = vld [vmem:[%s2650_s16 + $0x58] sm:$0xff] }
 0x180   : > { %v2411_v35 = vpop.eup %2410  ;;  %v1509_v27 = vadd.f32 %v4013_v13, %v1508_v47 }
 0x181   : > { %v2413_v26 = vpop.eup %2412  ;;  %2422 = vrcp.f32 %v1506_v54  ;;  %v4018_v4 = vmul.f32 %v2411_v35, %v3911_v31  ;;  %v4021_v5 = vmul.f32 %v2411_v35, %v3917_v36  ;;  %v4024_v3 = vmul.f32 %v2411_v35, %v3927_v32  ;;  %v2566_v54 = vld [vmem:[%s2650_s16 + $0x60] sm:$0xff] }
 0x182   : > { %v2415_v57 = vpop.eup %2414  ;;  %2424 = vrcp.f32 %v1509_v27  ;;  %v4027_v20 = vmul.f32 %v2413_v26, %v3914_v33  ;;  %v4030_v9 = vmul.f32 %v2413_v26, %v3923_v12  ;;  %v4033_v8 = vmul.f32 %v2413_v26, %v3930_v34  ;;  %v2567_v27 = vld [vmem:[%s2650_s16 + $0x68] sm:$0xff] }
 0x183   : > { %v2417_v49 = vpop.eup %2416  ;;  %v4036_v31 = vmul.f32 %v2411_v35, %v3933_v52  ;;  %v4039_v36 = vmul.f32 %v2413_v26, %v3937_v15  ;;  %v4042_v32 = vmul.f32 %v2415_v57, %v3940_v60  ;;  %v4045_v17 = vmul.f32 %v2415_v57, %v3947_v39 }
 0x184   : > { %v2419_v33 = vpop.eup %2418  ;;  %v4048_v12 = vmul.f32 %v2417_v49, %v3944_v37  ;;  %v4051_v34 = vmul.f32 %v2417_v49, %v3953_v2  ;;  %v4054_v52 = vmul.f32 %v2415_v57, %v3958_v1  ;;  %v4057_v15 = vmul.f32 %v2417_v49, %v3964_v53 }
 0x185   : > { %v2421_v60 = vpop.eup %2420  ;;  %v4060_v39 = vmul.f32 %v2415_v57, %v3969_v23  ;;  %v4063_v16 = vmul.f32 %v2417_v49, %v3972_v11  ;;  %v4066_v37 = vmul.f32 %v2419_v33, %v3975_v50  ;;  %v4069_v2 = vmul.f32 %v2419_v33, %v3981_v0  ;;  %v2556_v0 = vld [vmem:[%s2650_s16 + $0x10] sm:$0xff] }
 0x186   : > { %v4072_v1 = vmul.f32 %v2421_v60, %v3978_v43  ;;  %v4075_v53 = vmul.f32 %v2421_v60, %v3984_v42  ;;  %v4077_v23 = vmul.f32 %v2419_v33, %v2387_v56  ;;  %v4079_v46 = vmul.f32 %v2421_v60, %v2389_v38  ;;  %v2555_v43 = vld [vmem:[%s2650_s16 + $0x8] sm:$0xff]  ;;  %v2557_v42 = vld [vmem:[%s2650_s16 + $0x18] sm:$0xff]  ;;  %v2560_v38 = vld [vmem:[%s2650_s16 + $0x30] sm:$0xff] }
 0x187   : > { %4703 = vst [vmem:[#allocation34_spill] sm:$0xff] %v4069_v2  ;;  %v4081_v11 = vmul.f32 %v2419_v33, %v2391_v51  ;;  %v4083_v50 = vmul.f32 %v2421_v60, %v2393_v59  ;;  %v4087_v10 = vmul.f32 %v2554_v63, %v4018_v4  ;;  %v4091_v40 = vmul.f32 %v2555_v43, %v4027_v20  ;;  %v2568_v49 = vld [vmem:[%s2650_s16 + $0x70] sm:$0xff]  ;;  %v2569_v60 = vld [vmem:[%s2650_s16 + $0x78] sm:$0xff]  ;;  %v2570_v43 = vld [vmem:[%s2650_s16 + $0x80] sm:$0xff] }
 0x188   : > { %4704 = vst [vmem:[#allocation35_spill] sm:$0xff] %v4072_v1  ;;  %4705 = vst [vmem:[#allocation36_spill] sm:$0xff] %v4075_v53  ;;  %v4095_v14 = vmul.f32 %v2556_v0, %v4021_v5  ;;  %v4099_v48 = vmul.f32 %v2557_v42, %v4030_v9  ;;  %v4103_v56 = vmul.f32 %v2558_v18, %v4024_v3  ;;  %v2571_v42 = vld [vmem:[%s2650_s16 + $0x88] sm:$0xff] }
 0x189   : > { %4706 = vst [vmem:[#allocation37_spill] sm:$0xff] %v4077_v23  ;;  %4707 = vst [vmem:[#allocation38_spill] sm:$0xff] %v4079_v46  ;;  %v4107_v45 = vmul.f32 %v2559_v58, %v4033_v8  ;;  %v4111_v29 = vmul.f32 %v2560_v38, %v4036_v31  ;;  %v4115_v51 = vmul.f32 %v2561_v28, %v4039_v36 }
 0x18a   : > { %4708 = vst [vmem:[#allocation39_spill] sm:$0xff] %v4081_v11  ;;  %4709 = vst [vmem:[#allocation40_spill] sm:$0xff] %v4083_v50  ;;  %v1558_v59 = vmul.f32 %v2562_v30, %v4042_v32  ;;  %v1559_v41 = vmul.f32 %v2563_v19, %v4048_v12  ;;  %v1560_v55 = vmul.f32 %v2564_v24, %v4045_v17 }
 0x18b   : > { %v1561_v47 = vmul.f32 %v2565_v61, %v4051_v34  ;;  %v1562_v35 = vmul.f32 %v2566_v54, %v4054_v52  ;;  %v1563_v26 = vmul.f32 %v2567_v27, %v4057_v15  ;;  %v2423_v57 = vpop.eup %2422  ;;  %v1564_v33 = vmul.f32 %v2568_v49, %v4060_v39  ;;  %v2574_v27 = vld [vmem:[%s2650_s16 + $0xa0] sm:$0xff]  ;;  %v2576_v49 = vld [vmem:[%s2650_s16 + $0xb0] sm:$0xff] }
 0x18c   : > { %v1565_v63 = vmul.f32 %v2569_v60, %v4063_v16  ;;  %v1566_v0 = vmul.f32 %v2570_v43, %v4066_v37  ;;  %v1567_v18 = vmul.f32 %v2571_v42, %v4072_v1  ;;  %v2425_v58 = vpop.eup %2424  ;;  %v4138_v38 = vmul.f32 %v2423_v57, %v3993_v21  ;;  %v2577_v60 = vld [vmem:[%s2650_s16 + $0xb8] sm:$0xff]  ;;  %v2578_v42 = vld [vmem:[%s2650_s16 + $0xc0] sm:$0xff]  ;;  %v2584_v1 = vld [vmem:[%s2650_s16 + $0xf0] sm:$0xff] }
 0x18d   : > { %v4141_v28 = vmul.f32 %v2423_v57, %v3997_v25  ;;  %v4144_v30 = vmul.f32 %v2423_v57, %v4003_v6  ;;  %v4147_v19 = vmul.f32 %v2423_v57, %v4010_v62  ;;  %v4150_v24 = vmul.f32 %v2425_v58, %v3995_v44  ;;  %v2572_v6 = vld [vmem:[%s2650_s16 + $0x90] sm:$0xff]  ;;  %v2573_v62 = vld [vmem:[%s2650_s16 + $0x98] sm:$0xff]  ;;  %v2575_v57 = vld [vmem:[%s2650_s16 + $0xa8] sm:$0xff] }
 0x18e   : > { %4710 = vst [vmem:[#allocation41_spill] sm:$0xff] %v4138_v38  ;;  %v4153_v61 = vmul.f32 %v2425_v58, %v3999_v22  ;;  %v4156_v21 = vmul.f32 %v2425_v58, %v4007_v7  ;;  %v4159_v25 = vmul.f32 %v2425_v58, %v4013_v13  ;;  %v1568_v54 = vmul.f32 %v2572_v6, %v4069_v2  ;;  %v2579_v6 = vld [vmem:[%s2650_s16 + $0xc8] sm:$0xff] }
 0x18f   : > { %4711 = vst [vmem:[#allocation42_spill] sm:$0xff] %v4141_v28  ;;  %4712 = vst [vmem:[#allocation43_spill] sm:$0xff] %v4144_v30  ;;  %v1569_v44 = vmul.f32 %v2573_v62, %v4075_v53  ;;  %v1570_v22 = vmul.f32 %v2574_v27, %v4077_v23  ;;  %v1571_v7 = vmul.f32 %v2575_v57, %v4079_v46  ;;  %v2580_v53 = vld [vmem:[%s2650_s16 + $0xd0] sm:$0xff]  ;;  %v2581_v23 = vld [vmem:[%s2650_s16 + $0xd8] sm:$0xff] }
 0x190   : > { %4713 = vst [vmem:[#allocation44_spill] sm:$0xff] %v4147_v19  ;;  %4714 = vst [vmem:[#allocation45_spill] sm:$0xff] %v4150_v24  ;;  %v1572_v13 = vmul.f32 %v2576_v49, %v4081_v11  ;;  %v1573_v43 = vmul.f32 %v2577_v60, %v4083_v50  ;;  %v1574_v58 = vmul.f32 %v2578_v42, %v4138_v38  ;;  %v2582_v46 = vld [vmem:[%s2650_s16 + $0xe0] sm:$0xff]  ;;  %v2583_v49 = vld [vmem:[%s2650_s16 + $0xe8] sm:$0xff] }
 0x191   : > { %4715 = vst [vmem:[#allocation46_spill] sm:$0xff] %v4153_v61  ;;  %4716 = vst [vmem:[#allocation2_spill] sm:$0xff] %v4156_v21  ;;  %v1575_v62 = vmul.f32 %v2579_v6, %v4150_v24  ;;  %v1576_v27 = vmul.f32 %v2580_v53, %v4141_v28  ;;  %v1577_v57 = vmul.f32 %v2581_v23, %v4153_v61  ;;  %v2585_v50 = vld [vmem:[%s2650_s16 + $0xf8] sm:$0xff] }
 0x192   : > { %4717 = vst [vmem:[#allocation3_spill] sm:$0xff] %v4159_v25  ;;  %v1578_v2 = vmul.f32 %v2582_v46, %v4144_v30  ;;  %v1579_v11 = vmul.f32 %v2583_v49, %v4156_v21  ;;  %v1580_v60 = vmul.f32 %v2584_v1, %v4147_v19  ;;  %v1581_v42 = vmul.f32 %v2585_v50, %v4159_v25 }
 0x193   : > { %v1582_v6 = vadd.f32 %v1558_v59, %v4087_v10  ;;  %v1585_v24 = vadd.f32 %v1559_v41, %v4091_v40  ;;  %v1588_v53 = vadd.f32 %v1560_v55, %v4095_v14  ;;  %v1591_v23 = vadd.f32 %v1561_v47, %v4099_v48 }
 0x194   : > { %v1594_v61 = vadd.f32 %v1562_v35, %v4103_v56  ;;  %v1597_v46 = vadd.f32 %v1563_v26, %v4107_v45  ;;  %v1600_v21 = vadd.f32 %v1564_v33, %v4111_v29  ;;  %v1603_v1 = vadd.f32 %v1565_v63, %v4115_v51 }
 0x195   : > { %v1583_v30 = vadd.f32 %v1582_v6, %v1566_v0  ;;  %v1586_v49 = vadd.f32 %v1585_v24, %v1567_v18  ;;  %v1589_v19 = vadd.f32 %v1588_v53, %v1568_v54  ;;  %v1592_v50 = vadd.f32 %v1591_v23, %v1569_v44 }
 0x196   : > { %v1595_v25 = vadd.f32 %v1594_v61, %v1570_v22  ;;  %v1598_v10 = vadd.f32 %v1597_v46, %v1571_v7  ;;  %v1601_v14 = vadd.f32 %v1600_v21, %v1572_v13  ;;  %v1604_v48 = vadd.f32 %v1603_v1, %v1573_v43 }
 0x197   : > { %v4197_v59 = vadd.f32 %v1583_v30, %v1574_v58  ;;  %v4199_v40 = vadd.f32 %v1586_v49, %v1575_v62  ;;  %v4201_v41 = vadd.f32 %v1589_v19, %v1576_v27  ;;  %v4203_v56 = vadd.f32 %v1592_v50, %v1577_v57 }
 0x198   : > { %v4205_v45 = vadd.f32 %v1595_v25, %v1578_v2  ;;  %v4207_v55 = vadd.f32 %v1598_v10, %v1579_v11  ;;  %v4209_v29 = vadd.f32 %v1601_v14, %v1580_v60  ;;  %v4211_v51 = vadd.f32 %v1604_v48, %v1581_v42 }
 0x199   : > { %v1606_v47 = vmul.f32 %v4197_v59, %v4197_v59  ;;  %v1607_v35 = vmul.f32 %v4199_v40, %v4199_v40  ;;  %v1608_v26 = vmul.f32 %v4201_v41, %v4201_v41  ;;  %v1609_v33 = vmul.f32 %v4203_v56, %v4203_v56 }
 0x19a   : > { %v1610_v2 = vmul.f32 %v4205_v45, %v4205_v45  ;;  %v1611_v11 = vmul.f32 %v4207_v55, %v4207_v55  ;;  %v1612_v63 = vmul.f32 %v4209_v29, %v4209_v29  ;;  %v1613_v0 = vmul.f32 %v4211_v51, %v4211_v51 }
 0x19b   : > { %v1614_v18 = vrot.slane %v1606_v47, 4  ;;  %v1620_v30 = vrot.slane %v1607_v35, 4  ;;  %v1626_v19 = vrot.slane %v1608_v26, 4  ;;  %v1632_v24 = vrot.slane %v1609_v33, 4 }
 0x19c   : > { %v1638_v61 = vrot.slane %v1610_v2, 4  ;;  %v1644_v21 = vrot.slane %v1611_v11, 4  ;;  %v1650_v44 = vrot.slane %v1612_v63, 4  ;;  %v1656_v22 = vrot.slane %v1613_v0, 4 }
 0x19d   : > { %v1615_v25 = vadd.f32 %v1614_v18, %v1606_v47  ;;  %v1621_v54 = vadd.f32 %v1620_v30, %v1607_v35  ;;  %v1627_v7 = vadd.f32 %v1626_v19, %v1608_v26  ;;  %v1633_v13 = vadd.f32 %v1632_v24, %v1609_v33 }
 0x19e   : > { %v1639_v43 = vadd.f32 %v1638_v61, %v1610_v2  ;;  %v1645_v58 = vadd.f32 %v1644_v21, %v1611_v11  ;;  %v1651_v57 = vadd.f32 %v1650_v44, %v1612_v63  ;;  %v1657_v60 = vadd.f32 %v1656_v22, %v1613_v0 }
 0x19f   : > { %v1616_v62 = vrot.slane %v1615_v25, 2  ;;  %v1622_v27 = vrot.slane %v1621_v54, 2  ;;  %v1628_v42 = vrot.slane %v1627_v7, 2  ;;  %v1634_v6 = vrot.slane %v1633_v13, 2 }
 0x1a0   : > { %v1640_v53 = vrot.slane %v1639_v43, 2  ;;  %v1646_v23 = vrot.slane %v1645_v58, 2  ;;  %v1652_v1 = vrot.slane %v1651_v57, 2  ;;  %v1658_v50 = vrot.slane %v1657_v60, 2 }
 0x1a1   : > { %v1617_v46 = vadd.f32 %v1616_v62, %v1615_v25  ;;  %v1623_v49 = vadd.f32 %v1622_v27, %v1621_v54  ;;  %v1629_v10 = vadd.f32 %v1628_v42, %v1627_v7  ;;  %v1635_v14 = vadd.f32 %v1634_v6, %v1633_v13 }
 0x1a2   : > { %v1641_v48 = vadd.f32 %v1640_v53, %v1639_v43  ;;  %v1647_v47 = vadd.f32 %v1646_v23, %v1645_v58  ;;  %v1653_v33 = vadd.f32 %v1652_v1, %v1651_v57  ;;  %v1659_v2 = vadd.f32 %v1658_v50, %v1657_v60 }
 0x1a3   : > { %v1618_v35 = vrot.slane %v1617_v46, 1  ;;  %v1624_v26 = vrot.slane %v1623_v49, 1  ;;  %v1630_v11 = vrot.slane %v1629_v10, 1  ;;  %v1636_v18 = vrot.slane %v1635_v14, 1 }
 0x1a4   : > { %v1642_v63 = vrot.slane %v1641_v48, 1  ;;  %v1648_v0 = vrot.slane %v1647_v47, 1  ;;  %v1654_v24 = vrot.slane %v1653_v33, 1  ;;  %v1660_v25 = vrot.slane %v1659_v2, 1 }
 0x1a5   : > { %v4229_v30 = vadd.f32 %v1618_v35, %v1617_v46  ;;  %v4231_v19 = vadd.f32 %v1624_v26, %v1623_v49  ;;  %v4233_v61 = vadd.f32 %v1630_v11, %v1629_v10  ;;  %v4235_v21 = vadd.f32 %v1636_v18, %v1635_v14 }
 0x1a6   : > { %v4237_v54 = vadd.f32 %v1642_v63, %v1641_v48  ;;  %v4240_v44 = vadd.f32 %v1648_v0, %v1647_v47  ;;  %v4243_v22 = vadd.f32 %v1654_v24, %v1653_v33  ;;  %v4246_v7 = vadd.f32 %v1660_v25, %v1659_v2 }
 0x1a7   : > { %2426 = vrsqrt.f32 %v4229_v30  ;;  %vm1664_vm0 = vcmp.eq.f32.partialorder %v4229_v30, inf  ;;  %vm1666_vm1 = vcmp.eq.f32.partialorder %v4229_v30, 0.0  ;;  %v1667_v13 = vand.u32 2147483648, %v4229_v30 }
 0x1a8   : > { %2428 = vrsqrt.f32 %v4231_v19  ;;  %vm1671_vm2 = vcmp.eq.f32.partialorder %v4231_v19, inf  ;;  %vm1673_vm3 = vcmp.eq.f32.partialorder %v4231_v19, 0.0  ;;  %v1674_v43 = vand.u32 2147483648, %v4231_v19 }
 0x1a9   : > { %2430 = vrsqrt.f32 %v4233_v61  ;;  %vm1678_vm4 = vcmp.eq.f32.partialorder %v4233_v61, inf  ;;  %vm1680_vm5 = vcmp.eq.f32.partialorder %v4233_v61, 0.0  ;;  %v1681_v58 = vand.u32 2147483648, %v4233_v61 }
 0x1aa   : > { %2432 = vrsqrt.f32 %v4235_v21  ;;  %vm1685_vm6 = vcmp.eq.f32.partialorder %v4235_v21, inf  ;;  %vm1687_vm7 = vcmp.eq.f32.partialorder %v4235_v21, 0.0  ;;  %v1688_v62 = vand.u32 2147483648, %v4235_v21 }
 0x1ab   : > { %2434 = vrsqrt.f32 %v4237_v54  ;;  %vm1692_vm8 = vcmp.eq.f32.partialorder %v4237_v54, inf  ;;  %vm1694_vm9 = vcmp.eq.f32.partialorder %v4237_v54, 0.0  ;;  %v1695_v27 = vand.u32 2147483648, %v4237_v54 }
 0x1ac   : > { %2436 = vrsqrt.f32 %v4240_v44  ;;  %vm1699_vm10 = vcmp.eq.f32.partialorder %v4240_v44, inf  ;;  %vm1701_vm11 = vcmp.eq.f32.partialorder %v4240_v44, 0.0  ;;  %v1702_v57 = vand.u32 2147483648, %v4240_v44 }
 0x1ad   : > { %2438 = vrsqrt.f32 %v4243_v22  ;;  %vm1706_vm12 = vcmp.eq.f32.partialorder %v4243_v22, inf  ;;  %vm1708_vm13 = vcmp.eq.f32.partialorder %v4243_v22, 0.0  ;;  %v1709_v42 = vand.u32 2147483648, %v4243_v22 }
 0x1ae   : > { %2440 = vrsqrt.f32 %v4246_v7  ;;  %vm1713_vm14 = vcmp.eq.f32.partialorder %v4246_v7, inf  ;;  %vm1715_vm15 = vcmp.eq.f32.partialorder %v4246_v7, 0.0  ;;  %v1716_v23 = vand.u32 2147483648, %v4246_v7 }
 0x1af   : > { %v1718_v46 = vadd.f32 1.0, %v4229_v30  ;;  %v1719_v49 = vadd.f32 1.0, %v4231_v19  ;;  %v1720_v10 = vadd.f32 1.0, %v4233_v61  ;;  %v1721_v14 = vadd.f32 1.0, %v4235_v21 }
 0x1b0   : > { %v1722_v48 = vadd.f32 1.0, %v4237_v54  ;;  %v1723_v33 = vadd.f32 1.0, %v4240_v44  ;;  %v1724_v2 = vadd.f32 1.0, %v4243_v22  ;;  %v1725_v24 = vadd.f32 1.0, %v4246_v7 }
 0x1b1   : > { %v2427_v60 = vpop.eup %2426 }
 0x1b2   : > { %v2429_v6 = vpop.eup %2428  ;;  %v1663_v53 = vmul.f32 %v2427_v60, %v4229_v30 }
 0x1b3   : > { %v2431_v1 = vpop.eup %2430  ;;  %v1670_v50 = vmul.f32 %v2429_v6, %v4231_v19 }
 0x1b4   : > { %v2433_v47 = vpop.eup %2432  ;;  %v1665_v35 = vsel %vm1664_vm0, %v4229_v30, %v1663_v53  ;;  %v1677_v26 = vmul.f32 %v2431_v1, %v4233_v61  ;;  %vm1934_vm0 = vcmask 1040384  }
 0x1b5   : > { %v2435_v11 = vpop.eup %2434  ;;  %v1668_v18 = vsel %vm1666_vm1, %v1667_v13, %v1665_v35  ;;  %v1672_v63 = vsel %vm1671_vm2, %v4231_v19, %v1670_v50  ;;  %v1684_v0 = vmul.f32 %v2433_v47, %v4235_v21 }
 0x1b6   : > { %v2437_v25 = vpop.eup %2436  ;;  %v1675_v60 = vsel %vm1673_vm3, %v1674_v43, %v1672_v63  ;;  %v1679_v6 = vsel %vm1678_vm4, %v4233_v61, %v1677_v26  ;;  %v1691_v53 = vmul.f32 %v2435_v11, %v4237_v54  ;;  %v1726_v1 = vadd.f32 1e-08, %v1668_v18 }
 0x1b7   : > { %v2439_v13 = vpop.eup %2438  ;;  %v1682_v35 = vsel %vm1680_vm5, %v1681_v58, %v1679_v6  ;;  %v1686_v50 = vsel %vm1685_vm6, %v4235_v21, %v1684_v0  ;;  %v1698_v47 = vmul.f32 %v2437_v25, %v4240_v44  ;;  %v1727_v28 = vadd.f32 1e-08, %v1675_v60 }
 0x1b8   : > { %v2441_v38 = vpop.eup %2440  ;;  %v1689_v43 = vsel %vm1687_vm7, %v1688_v62, %v1686_v50  ;;  %v1693_v26 = vsel %vm1692_vm8, %v4237_v54, %v1691_v53  ;;  %v1705_v11 = vmul.f32 %v2439_v13, %v4243_v22  ;;  %v1728_v18 = vadd.f32 1e-08, %v1682_v35 }
 0x1b9   : > { %v1696_v58 = vsel %vm1694_vm9, %v1695_v27, %v1693_v26  ;;  %v1700_v63 = vsel %vm1699_vm10, %v4240_v44, %v1698_v47  ;;  %v1712_v0 = vmul.f32 %v2441_v38, %v4246_v7  ;;  %v1729_v25 = vadd.f32 1e-08, %v1689_v43 }
 0x1ba   : > { %v1703_v62 = vsel %vm1701_vm11, %v1702_v57, %v1700_v63  ;;  %v1707_v60 = vsel %vm1706_vm12, %v4243_v22, %v1705_v11  ;;  %v1730_v6 = vadd.f32 1e-08, %v1696_v58  ;;  %v1734_v53 = vmul.f32 %v1726_v1, %v1718_v46 }
 0x1bb   : > { %v1710_v13 = vsel %vm1708_vm13, %v1709_v42, %v1707_v60  ;;  %v1714_v27 = vsel %vm1713_vm14, %v4246_v7, %v1712_v0  ;;  %v1731_v35 = vadd.f32 1e-08, %v1703_v62  ;;  %v1735_v50 = vmul.f32 %v1727_v28, %v1719_v49 }
 0x1bc   : > { %v1717_v38 = vsel %vm1715_vm15, %v1716_v23, %v1714_v27  ;;  %v1732_v47 = vadd.f32 1e-08, %v1710_v13  ;;  %v1736_v57 = vmul.f32 %v1728_v18, %v1720_v10  ;;  %v1737_v43 = vmul.f32 %v1729_v25, %v1721_v14 }
 0x1bd   : > { %v1733_v26 = vadd.f32 1e-08, %v1717_v38  ;;  %v1738_v11 = vmul.f32 %v1730_v6, %v1722_v48  ;;  %2442 = vrcp.f32 %v1734_v53  ;;  %v1739_v46 = vmul.f32 %v1731_v35, %v1723_v33 }
 0x1be   : > { %2444 = vrcp.f32 %v1735_v50  ;;  %v1740_v1 = vmul.f32 %v1732_v47, %v1724_v2  ;;  %v1774_v28 = vadd.f32 1e-08, %v4018_v4  ;;  %v1775_v49 = vadd.f32 1e-08, %v4027_v20 }
 0x1bf   : > { %2446 = vrcp.f32 %v1736_v57  ;;  %v1741_v42 = vmul.f32 %v1733_v26, %v1725_v24  ;;  %v1776_v48 = vadd.f32 1e-08, %v4021_v5  ;;  %v1777_v24 = vadd.f32 1e-08, %v4030_v9 }
 0x1c0   : > { %2448 = vrcp.f32 %v1737_v43  ;;  %v1779_v60 = vadd.f32 1e-08, %v4033_v8  ;;  %v1782_v35 = vadd.f32 1e-08, %v4042_v32  ;;  %v1784_v38 = vadd.f32 1e-08, %v4045_v17 }
 0x1c1   : > { %2450 = vrcp.f32 %v1738_v11  ;;  %v1790_v43 = vadd.f32 1e-08, %v4066_v37  ;;  %v1787_v26 = vadd.f32 1e-08, %v4057_v15  ;;  %v1789_v11 = vadd.f32 1e-08, %v4063_v16 }
 0x1c2   : > { %2452 = vrcp.f32 %v1739_v46  ;;  %v4718_v46 = vld [vmem:[#allocation35_spill] sm:$0xff] }
 0x1c3   : > { %2454 = vrcp.f32 %v1740_v1  ;;  %v1791_v1 = vadd.f32 1e-08, %v4718_v46 }
 0x1c4   : > { %2456 = vrcp.f32 %v1741_v42 }
 0x1c5   : > { %2458 = vlog2.f32 %v1774_v28  ;;  %v4719_v28 = vld [vmem:[#allocation34_spill] sm:$0xff] }
 0x1c6   : > { %2460 = vlog2.f32 %v1775_v49  ;;  %v4720_v49 = vld [vmem:[#allocation36_spill] sm:$0xff] }
 0x1c7   : > { %v2443_v23 = vpop.eup %2442  ;;  %2462 = vlog2.f32 %v1776_v48 }
 0x1c8   : > { %v2445_v10 = vpop.eup %2444  ;;  %v1750_v14 = vmul.f32 %v2443_v23, %v4229_v30  ;;  %v1778_v30 = vadd.f32 1e-08, %v4024_v3  ;;  %2464 = vlog2.f32 %v1777_v24  ;;  %v1792_v23 = vadd.f32 1e-08, %v4719_v28 }
 0x1c9   : > { %v2447_v33 = vpop.eup %2446  ;;  %v1751_v2 = vmul.f32 %v2445_v10, %v4231_v19  ;;  %v1793_v10 = vadd.f32 1e-08, %v4720_v49 }
 0x1ca   : > { %v2449_v18 = vpop.eup %2448  ;;  %v1752_v58 = vmul.f32 %v2447_v33, %v4233_v61  ;;  %v1758_v63 = vmul.f32 %v1750_v14, %v4197_v59  ;;  %2466 = vlog2.f32 %v1778_v30  ;;  %v4721_v14 = vld [vmem:[#allocation37_spill] sm:$0xff] }
 0x1cb   : > { %v2451_v0 = vpop.eup %2450  ;;  %v1753_v25 = vmul.f32 %v2449_v18, %v4235_v21  ;;  %v1759_v62 = vmul.f32 %v1751_v2, %v4199_v40  ;;  %v1780_v40 = vadd.f32 1e-08, %v4036_v31  ;;  %2468 = vlog2.f32 %v1779_v60  ;;  %v4722_v2 = vld [vmem:[#allocation38_spill] sm:$0xff]  ;;  %v4723_v18 = vld [vmem:[#allocation39_spill] sm:$0xff] }
 0x1cc   : > { %v2453_v19 = vpop.eup %2452  ;;  %v1754_v6 = vmul.f32 %v2451_v0, %v4237_v54  ;;  %v1760_v61 = vmul.f32 %v1752_v58, %v4201_v41  ;;  %1766 = vst [vmem:[%s4341_s20] sm:$0xff] %v1758_v63  ;;  %v1781_v41 = vadd.f32 1e-08, %v4039_v36  ;;  %v1794_v48 = vadd.f32 1e-08, %v4721_v14  ;;  %v4724_v0 = vld [vmem:[#allocation40_spill] sm:$0xff] }
 0x1cd   : > { %v2455_v59 = vpop.eup %2454  ;;  %v1755_v53 = vmul.f32 %v2453_v19, %v4240_v44  ;;  %v1761_v13 = vmul.f32 %v1753_v25, %v4203_v56  ;;  %1767 = vst [vmem:[%s4341_s20 + $0x8] sm:$0xff] %v1759_v62  ;;  %2470 = vlog2.f32 %v1780_v40  ;;  %v1795_v24 = vadd.f32 1e-08, %v4722_v2  ;;  %v4725_v19 = vld [vmem:[#allocation41_spill] sm:$0xff]  ;;  %v4727_v40 = vld [vmem:[#allocation42_spill] sm:$0xff] }
 0x1ce   : > { %v2457_v21 = vpop.eup %2456  ;;  %v1756_v27 = vmul.f32 %v2455_v59, %v4243_v22  ;;  %v1762_v54 = vmul.f32 %v1754_v6, %v4205_v45  ;;  %1768 = vst [vmem:[%s4341_s20 + $0x10] sm:$0xff] %v1760_v61  ;;  %v1783_v22 = vadd.f32 1e-08, %v4048_v12  ;;  %2472 = vlog2.f32 %v1781_v41  ;;  %v4726_v61 = vld [vmem:[#allocation45_spill] sm:$0xff] }
 0x1cf   : > { %v1757_v44 = vmul.f32 %v2457_v21, %v4246_v7  ;;  %v1763_v56 = vmul.f32 %v1755_v53, %v4207_v55  ;;  %1769 = vst [vmem:[%s4341_s20 + $0x18] sm:$0xff] %v1761_v13  ;;  %v1786_v7 = vadd.f32 1e-08, %v4054_v52  ;;  %v1788_v55 = vadd.f32 1e-08, %v4060_v39  ;;  %v2459_v47 = vpop.eup %2458 }
 0x1d0   : > { %v1764_v50 = vmul.f32 %v1756_v27, %v4209_v29  ;;  %1770 = vst [vmem:[%s4341_s20 + $0x20] sm:$0xff] %v1762_v54  ;;  %2474 = vlog2.f32 %v1782_v35  ;;  %v1785_v29 = vadd.f32 1e-08, %v4051_v34  ;;  %v2461_v57 = vpop.eup %2460  ;;  %v1796_v58 = vadd.f32 1e-08, %v4723_v18  ;;  %v4728_v27 = vld [vmem:[#allocation46_spill] sm:$0xff] }
 0x1d1   : > { %v1765_v45 = vmul.f32 %v1757_v44, %v4211_v51  ;;  %1771 = vst [vmem:[%s4341_s20 + $0x28] sm:$0xff] %v1763_v56  ;;  %2476 = vlog2.f32 %v1783_v22  ;;  %v2463_v51 = vpop.eup %2462  ;;  %v1807_v63 = vmul.f32 0.6931472, %v2459_v47  ;;  %v4387_v25 = vadd.f32 1e-08, %v4724_v0  ;;  %v4729_v56 = vld [vmem:[#allocation43_spill] sm:$0xff] }
 0x1d2   : > { %1772 = vst [vmem:[%s4341_s20 + $0x30] sm:$0xff] %v1764_v50  ;;  %2478 = vlog2.f32 %v1784_v38  ;;  %v2465_v42 = vpop.eup %2464  ;;  %v1809_v62 = vmul.f32 0.6931472, %v2461_v57  ;;  %v1811_v60 = vmul.f32 0.6931472, %v2463_v51  ;;  %v4730_v38 = vld [vmem:[#allocation2_spill] sm:$0xff] }
 0x1d3   : > { %1773 = vst [vmem:[%s4341_s20 + $0x38] sm:$0xff] %v1765_v45  ;;  %2480 = vlog2.f32 %v1786_v7  ;;  %v1798_v6 = vadd.f32 1e-08, %v4725_v19  ;;  %v4391_v59 = vadd.f32 1e-08, %v4726_v61  ;;  %v4731_v57 = vld [vmem:[#allocation44_spill] sm:$0xff] }
 0x1d4   : > { %2482 = vlog2.f32 %v1788_v55  ;;  %v2467_v33 = vpop.eup %2466  ;;  %v1813_v53 = vmul.f32 0.6931472, %v2465_v42  ;;  %v1800_v21 = vadd.f32 1e-08, %v4727_v40  ;;  %v4395_v54 = vadd.f32 1e-08, %v4728_v27 }
 0x1d5   : > { %2484 = vlog2.f32 %v1785_v29  ;;  %v2469_v30 = vpop.eup %2468  ;;  %v1815_v41 = vmul.f32 0.6931472, %v2467_v33  ;;  %v1802_v35 = vadd.f32 1e-08, %v4729_v56  ;;  %v1870_v22 = vmul.f32 0.6213349, %v1807_v63 }
 0x1d6   : > { %2486 = vlog2.f32 %v1790_v43  ;;  %v1817_v50 = vmul.f32 0.6931472, %v2469_v30  ;;  %v4399_v7 = vadd.f32 1e-08, %v4730_v38  ;;  %v1871_v55 = vmul.f32 0.6213349, %v1809_v62 }
 0x1d7   : > { %v2471_v13 = vpop.eup %2470  ;;  %2488 = vlog2.f32 %v1792_v23  ;;  %v1872_v47 = vmul.f32 0.6213349, %v1811_v60  ;;  %v1804_v43 = vadd.f32 1e-08, %v4731_v57  ;;  %v1873_v42 = vmul.f32 0.6213349, %v1813_v53 }
 0x1d8   : > { %v2473_v44 = vpop.eup %2472  ;;  %2490 = vlog2.f32 %v1787_v26  ;;  %v1819_v51 = vmul.f32 0.6931472, %v2471_v13  ;;  %v4732_v33 = vld [vmem:[#allocation3_spill] sm:$0xff]  ;;  %v1874_v26 = vmul.f32 0.6213349, %v1815_v41  ;;  %v4407_v13 = vmul.f32 %v1871_v55, %v4027_v20 }
 0x1d9   : > { %2492 = vlog2.f32 %v1794_v48  ;;  %v4403_v27 = vadd.f32 1e-08, %v4732_v33  ;;  %v1821_v30 = vmul.f32 0.6931472, %v2473_v44  ;;  %v1875_v38 = vmul.f32 0.6213349, %v1817_v50 }
 0x1da   : > { %v2475_v45 = vpop.eup %2474  ;;  %2494 = vlog2.f32 %v1796_v58  ;;  %v1902_v48 = vmul.f32 %v1870_v22, %v4018_v4  ;;  %v1904_v58 = vmul.f32 %v1872_v47, %v4021_v5  ;;  %v1876_v44 = vmul.f32 0.6213349, %v1819_v51 }
 0x1db   : > { %v2477_v29 = vpop.eup %2476  ;;  %2496 = vlog2.f32 %v1789_v11  ;;  %v1823_v61 = vmul.f32 0.6931472, %v2475_v45  ;;  %v4411_v11 = vmul.f32 %v1873_v42, %v4030_v9  ;;  %v1877_v50 = vmul.f32 0.6213349, %v1821_v30 }
 0x1dc   : > { %v2479_v23 = vpop.eup %2478  ;;  %2498 = vlog2.f32 %v1791_v1  ;;  %v1825_v60 = vmul.f32 0.6931472, %v2477_v29  ;;  %v1906_v4 = vmul.f32 %v1874_v26, %v4024_v3  ;;  %v4415_v20 = vmul.f32 %v1875_v38, %v4033_v8 }
 0x1dd   : > { %v2481_v63 = vpop.eup %2480  ;;  %2500 = vlog2.f32 %v1798_v6  ;;  %v1827_v33 = vmul.f32 0.6931472, %v2479_v23  ;;  %v1878_v6 = vmul.f32 0.6213349, %v1823_v61  ;;  %v1935_v55 = vsel %vm1934_vm0, %v1902_v48, 0.0 }
 0x1de   : > { %v2483_v62 = vpop.eup %2482  ;;  %2502 = vlog2.f32 %v1800_v21  ;;  %v1831_v1 = vmul.f32 0.6931472, %v2481_v63  ;;  %v1879_v21 = vmul.f32 0.6213349, %v1825_v60  ;;  %v1936_v51 = vsel %vm1934_vm0, %v1904_v58, 0.0 }
 0x1df   : > { %v2485_v53 = vpop.eup %2484  ;;  %2504 = vlog2.f32 %v1793_v10  ;;  %v1835_v22 = vmul.f32 0.6931472, %v2483_v62  ;;  %v1880_v29 = vmul.f32 0.6213349, %v1827_v33  ;;  %v1908_v10 = vmul.f32 %v1876_v44, %v4036_v31 }
 0x1e0   : > { %v2487_v41 = vpop.eup %2486  ;;  %2506 = vlog2.f32 %v1795_v24  ;;  %v1829_v45 = vmul.f32 0.6931472, %v2485_v53  ;;  %v1882_v24 = vmul.f32 0.6213349, %v1831_v1  ;;  %v4421_v61 = vmul.f32 %v1877_v50, %v4039_v36 }
 0x1e1   : > { %v2489_v5 = vpop.eup %2488  ;;  %2508 = vlog2.f32 %v1802_v35  ;;  %v1839_v47 = vmul.f32 0.6931472, %v2487_v41  ;;  %v1937_v8 = vadd.f32 %v1936_v51, %v1935_v55  ;;  %v1884_v35 = vmul.f32 0.6213349, %v1835_v22 }
 0x1e2   : > { %v2491_v9 = vpop.eup %2490  ;;  %2510 = vlog2.f32 %v1804_v43  ;;  %v1843_v42 = vmul.f32 0.6931472, %v2489_v5  ;;  %v1910_v23 = vmul.f32 %v1878_v6, %v4042_v32  ;;  %v1938_v30 = vsel %vm1934_vm0, %v1906_v4, 0.0 }
 0x1e3   : > { %v2493_v3 = vpop.eup %2492  ;;  %v1833_v33 = vmul.f32 0.6931472, %v2491_v9  ;;  %2512 = vlog2.f32 %v4387_v25  ;;  %v1881_v31 = vmul.f32 0.6213349, %v1829_v45  ;;  %v1939_v63 = vadd.f32 %v1938_v30, %v1937_v8 }
 0x1e4   : > { %v2495_v38 = vpop.eup %2494  ;;  %v1847_v43 = vmul.f32 0.6931472, %v2493_v3  ;;  %v1886_v62 = vmul.f32 0.6213349, %v1839_v47  ;;  %v1912_v36 = vmul.f32 %v1880_v29, %v4045_v17  ;;  %v1940_v60 = vsel %vm1934_vm0, %v1908_v10, 0.0 }
 0x1e5   : > { %v2497_v26 = vpop.eup %2496  ;;  %v1851_v53 = vmul.f32 0.6931472, %v2495_v38  ;;  %2514 = vlog2.f32 %v4391_v59  ;;  %v1911_v32 = vmul.f32 %v1879_v21, %v4048_v12  ;;  %v1941_v44 = vadd.f32 %v1940_v60, %v1939_v63 }
 0x1e6   : > { %v2499_v48 = vpop.eup %2498  ;;  %v1888_v1 = vmul.f32 0.6213349, %v1843_v42  ;;  %v1914_v25 = vmul.f32 %v1882_v24, %v4054_v52  ;;  %v1916_v50 = vmul.f32 %v1884_v35, %v4060_v39  ;;  %v1942_v4 = vsel %vm1934_vm0, %v1910_v23, 0.0 }
 0x1e7   : > { %v2501_v58 = vpop.eup %2500  ;;  %v1837_v6 = vmul.f32 0.6931472, %v2497_v26  ;;  %v1883_v17 = vmul.f32 0.6213349, %v1833_v33  ;;  %v1913_v5 = vmul.f32 %v1881_v31, %v4051_v34  ;;  %v1943_v45 = vadd.f32 %v1942_v4, %v1941_v44 }
 0x1e8   : > { %v2503_v41 = vpop.eup %2502  ;;  %v1855_v9 = vmul.f32 0.6931472, %v2501_v58  ;;  %v1890_v59 = vmul.f32 0.6213349, %v1847_v43  ;;  %v1918_v12 = vmul.f32 %v1886_v62, %v4066_v37  ;;  %v1944_v21 = vsel %vm1934_vm0, %v1912_v36, 0.0 }
 0x1e9   : > { %v2505_v22 = vpop.eup %2504  ;;  %v1859_v29 = vmul.f32 0.6931472, %v2503_v41  ;;  %2516 = vlog2.f32 %v4395_v54  ;;  %v1892_v52 = vmul.f32 0.6213349, %v1851_v53  ;;  %v1945_v39 = vadd.f32 %v1944_v21, %v1943_v45 }
 0x1ea   : > { %v2507_v55 = vpop.eup %2506  ;;  %v1841_v10 = vmul.f32 0.6931472, %v2499_v48  ;;  %v1920_v51 = vmul.f32 %v1888_v1, %v4719_v28  ;;  %v1946_v3 = vsel %vm1934_vm0, %v1914_v25, 0.0  ;;  %v1948_v34 = vsel %vm1934_vm0, %v1916_v50, 0.0 }
 0x1eb   : > { %v2509_v47 = vpop.eup %2508  ;;  %2518 = vlog2.f32 %v4399_v7  ;;  %v1885_v8 = vmul.f32 0.6213349, %v1837_v6  ;;  %v1915_v37 = vmul.f32 %v1883_v17, %v4057_v15  ;;  %v1947_v38 = vadd.f32 %v1946_v3, %v1945_v39 }
 0x1ec   : > { %v2511_v24 = vpop.eup %2510  ;;  %v1863_v42 = vmul.f32 0.6931472, %v2509_v47  ;;  %v1894_v35 = vmul.f32 0.6213349, %v1855_v9  ;;  %v1922_v54 = vmul.f32 %v1890_v59, %v4721_v14  ;;  %v1950_v23 = vsel %vm1934_vm0, %v1918_v12, 0.0 }
 0x1ed   : > { %v2513_v30 = vpop.eup %2512  ;;  %v1845_v26 = vmul.f32 0.6931472, %v2505_v22  ;;  %v1896_v28 = vmul.f32 0.6213349, %v1859_v29  ;;  %v1924_v33 = vmul.f32 %v1892_v52, %v4723_v18  ;;  %v1949_v31 = vadd.f32 %v1948_v34, %v1947_v38 }
 0x1ee   : > { %v1867_v63 = vmul.f32 0.6931472, %v2511_v24  ;;  %v1952_v48 = vsel %vm1934_vm0, %v1920_v51, 0.0  ;;  %v1972_v7 = vsel %vm1934_vm0, %v4407_v13, 0.0  ;;  %v1973_v15 = vsel %vm1934_vm0, %v4411_v11, 0.0 }
 0x1ef   : > { %v2515_v43 = vpop.eup %2514  ;;  %2520 = vlog2.f32 %v4403_v27  ;;  %v1951_v14 = vadd.f32 %v1950_v23, %v1949_v31  ;;  %v1974_v62 = vadd.f32 %v1973_v15, %v1972_v7  ;;  %v1975_v36 = vsel %vm1934_vm0, %v4415_v20, 0.0 }
 0x1f0   : > { %v1898_v60 = vmul.f32 0.6213349, %v1863_v42  ;;  %v1926_v18 = vmul.f32 %v1894_v35, %v4725_v19  ;;  %v1954_v58 = vsel %vm1934_vm0, %v1922_v54, 0.0  ;;  %v1977_v53 = vsel %vm1934_vm0, %v4421_v61, 0.0 }
 0x1f1   : > { %v1849_v13 = vmul.f32 0.6931472, %v2507_v55  ;;  %v1887_v44 = vmul.f32 0.6213349, %v1841_v10  ;;  %v1953_v41 = vadd.f32 %v1952_v48, %v1951_v14  ;;  %v1976_v11 = vadd.f32 %v1975_v36, %v1974_v62 }
 0x1f2   : > { %v1900_v1 = vmul.f32 0.6213349, %v1867_v63  ;;  %v1928_v27 = vmul.f32 %v1896_v28, %v4727_v40  ;;  %v1956_v25 = vsel %vm1934_vm0, %v1924_v33, 0.0  ;;  %v1979_v50 = vsel %vm1934_vm0, %v1911_v32, 0.0 }
 0x1f3   : > { %v2517_v20 = vpop.eup %2516  ;;  %v1889_v4 = vmul.f32 0.6213349, %v1845_v26  ;;  %v1917_v19 = vmul.f32 %v1885_v8, %v4063_v16  ;;  %v1955_v22 = vadd.f32 %v1954_v58, %v1953_v41  ;;  %v1978_v6 = vadd.f32 %v1977_v53, %v1976_v11 }
 0x1f4   : > { %v1853_v17 = vmul.f32 0.6931472, %v2513_v30  ;;  %v1930_v61 = vmul.f32 %v1898_v60, %v4729_v56  ;;  %v1958_v45 = vsel %vm1934_vm0, %v1926_v18, 0.0  ;;  %v1981_v55 = vsel %vm1934_vm0, %v1913_v5, 0.0  ;;  %v4735_v18 = vld [vmem:[#allocation2_spill] sm:$0xff] }
 0x1f5   : > { %v2519_v9 = vpop.eup %2518  ;;  %v1891_v59 = vmul.f32 0.6213349, %v1849_v13  ;;  %v1919_v40 = vmul.f32 %v1887_v44, %v4718_v46  ;;  %v1957_v12 = vadd.f32 %v1956_v25, %v1955_v22  ;;  %v1980_v21 = vadd.f32 %v1979_v50, %v1978_v6  ;;  %v4736_v13 = vld [vmem:[#allocation3_spill] sm:$0xff] }
 0x1f6   : > { %v1857_v32 = vmul.f32 0.6931472, %v2515_v43  ;;  %v1932_v47 = vmul.f32 %v1900_v1, %v4731_v57  ;;  %v1960_v16 = vsel %vm1934_vm0, %v1928_v27, 0.0  ;;  %v1983_v29 = vsel %vm1934_vm0, %v1915_v37, 0.0  ;;  %v4734_v43 = vld [vmem:[#allocation46_spill] sm:$0xff] }
 0x1f7   : > { %v1921_v52 = vmul.f32 %v1889_v4, %v4720_v49  ;;  %v1959_v56 = vadd.f32 %v1958_v45, %v1957_v12  ;;  %v1982_v39 = vadd.f32 %v1981_v55, %v1980_v21  ;;  %v1861_v10 = vmul.f32 0.6931472, %v2517_v20 }
 0x1f8   : > { %v1893_v51 = vmul.f32 0.6213349, %v1853_v17  ;;  %v1962_v5 = vsel %vm1934_vm0, %v1930_v61, 0.0  ;;  %v1985_v3 = vsel %vm1934_vm0, %v1917_v19, 0.0  ;;  %v1923_v34 = vmul.f32 %v1891_v59, %v4722_v2  ;;  %v4733_v2 = vld [vmem:[#allocation45_spill] sm:$0xff] }
 0x1f9   : > { %v2521_v46 = vpop.eup %2520  ;;  %v1961_v24 = vadd.f32 %v1960_v16, %v1959_v56  ;;  %v1984_v8 = vadd.f32 %v1983_v29, %v1982_v39  ;;  %v1865_v57 = vmul.f32 0.6931472, %v2519_v9  ;;  %v1895_v38 = vmul.f32 0.6213349, %v1857_v32 }
 0x1fa   : > { %v1964_v42 = vsel %vm1934_vm0, %v1932_v47, 0.0  ;;  %v1987_v37 = vsel %vm1934_vm0, %v1919_v40, 0.0  ;;  %v1869_v54 = vmul.f32 0.6931472, %v2521_v46  ;;  %v1897_v23 = vmul.f32 0.6213349, %v1861_v10 }
 0x1fb   : > { %v1963_v49 = vadd.f32 %v1962_v5, %v1961_v24  ;;  %v1986_v35 = vadd.f32 %v1985_v3, %v1984_v8  ;;  %v1925_v30 = vmul.f32 %v1893_v51, %v4724_v0  ;;  %v1989_v26 = vsel %vm1934_vm0, %v1921_v52, 0.0 }
 0x1fc   : > { %v1899_v31 = vmul.f32 0.6213349, %v1865_v57  ;;  %v1927_v63 = vmul.f32 %v1895_v38, %v4733_v2  ;;  %v1991_v48 = vsel %vm1934_vm0, %v1923_v34, 0.0  ;;  %v1901_v15 = vmul.f32 0.6213349, %v1869_v54 }
 0x1fd   : > { %v1965_v28 = vadd.f32 %v1964_v42, %v1963_v49  ;;  %v1988_v33 = vadd.f32 %v1987_v37, %v1986_v35  ;;  %v1929_v14 = vmul.f32 %v1897_v23, %v4734_v43  ;;  %v1993_v62 = vsel %vm1934_vm0, %v1925_v30, 0.0 }
 0x1fe   : > { %v1931_v58 = vmul.f32 %v1899_v31, %v4735_v18  ;;  %v1995_v0 = vsel %vm1934_vm0, %v1927_v63, 0.0  ;;  %v1933_v44 = vmul.f32 %v1901_v15, %v4736_v13  ;;  %v2610_v61 = vmov 1966171168  }
 0x1ff   : > { %v1990_v7 = vadd.f32 %v1989_v26, %v1988_v33  ;;  %v1966_v36 = vrot.slane %v1965_v28, 4  ;;  %v1997_v41 = vsel %vm1934_vm0, %v1929_v14, 0.0  ;;  %v2013_v45 = vunpack.c.l.s4 %v2610_v61 }
 0x200   : > { %v1999_v27 = vsel %vm1934_vm0, %v1931_v58, 0.0  ;;  %v2001_v50 = vsel %vm1934_vm0, %v1933_v44, 0.0  ;;  %v2015_v55 = vlaneseq }
 0x201   : > { %v1992_v60 = vadd.f32 %v1991_v48, %v1990_v7  ;;  %v1967_v11 = vadd.f32 %v1966_v36, %v1965_v28  ;;  %v2014_v12 = vunpack.c.0.s8 %v2013_v45 }
 0x202   : > { %v2016_v21 = vshrl.u32 %v2015_v55, 7  ;;  %vm2029_vm1 = vcmp.lt.s32.totalorder %v2015_v55, 256 }
 0x203   : > { %v1994_v53 = vadd.f32 %v1993_v62, %v1992_v60  ;;  %v1968_v20 = vrot.slane %v1967_v11, 2 }
 0x204   : > { %v2017_v29 = vsub.s32 %v2014_v12, %v2016_v21 }
 0x205   : > { %v1996_v1 = vadd.f32 %v1995_v0, %v1994_v53  ;;  %v1969_v22 = vadd.f32 %v1968_v20, %v1967_v11 }
 0x207   : > { %v1998_v25 = vadd.f32 %v1997_v41, %v1996_v1  ;;  %v1970_v9 = vrot.slane %v1969_v22, 1 }
 0x209   : > { %v2000_v4 = vadd.f32 %v1999_v27, %v1998_v25  ;;  %v1971_v32 = vadd.f32 %v1970_v9, %v1969_v22 }
 0x20b   : > { %v2002_v19 = vadd.f32 %v2001_v50, %v2000_v4 }
 0x20d   : > { %v2003_v6 = vrot.slane %v2002_v19, 4 }
 0x20f   : > { %v2004_v17 = vadd.f32 %v2003_v6, %v2002_v19 }
 0x211   : > { %v2005_v59 = vrot.slane %v2004_v17, 2 }
 0x213   : > { %v2006_v40 = vadd.f32 %v2005_v59, %v2004_v17 }
 0x215   : > { %v2007_v47 = vrot.slane %v2006_v40, 1 }
 0x217   : > { %v2008_v16 = vadd.f32 %v2007_v47, %v2006_v40 }
 0x219   : > { %v2011_v52 = vcombine.low %v1971_v32, %v2008_v16 }
 0x21b   : > { %v2018_v56 = vrot.slane %v2011_v52, %v2017_v29 }
 0x21d   : > { %v2025_v39 = vrot.slane %v2018_v56, %v2017_v29 }
 0x21f   : > { %2031 = vst.msk [vmem:[%s203_s24] sm:$0x3] %vm2029_vm1, %v2025_v39 }
 0x220 PF: > { %s13_s11 = sadd.s32 1, %s2608_s11   ;;  %s4737_s9 = smov %s2604_s10 }
 0x221   : > { %p10_p5 = scmp.ge.s32.totalorder %s13_s11, 4   ;;  %s4738_s10 = smov %s4740_s12 }
 0x223   :  { %12 = sbr.rel (!%p10_p5) target bundleno = 2 (0x2), region = 66 }

</bundles_post_ra>
